<compile_context>
chip_gen: v7x
topology: tpu7x:2x2x1
jax: 0.10.0
libtpu: 0.0.40
codegen_flags: <defaults>
</compile_context>

<pallas_src>
import functools

import jax
import jax.numpy as jnp
from jax import lax
from jax.experimental import pallas as pl
from jax.experimental.pallas import tpu as pltpu

MM_DTYPE = jnp.bfloat16            # MXU operand dtype (accumulation is always f32)


def _tpu_config():
    """Generation-aware (vmem_limit_bytes, row-tile target)."""
    try:
        info = pltpu.get_tpu_info()
        vmem_bytes = getattr(info, "vmem_capacity_bytes", None) or 0
    except Exception:
        vmem_bytes = 0
    if vmem_bytes >= 100 * 1024 * 1024:        # v5e / v6e: 128 MiB physical VMEM
        return 96 * 1024 * 1024, 512
    return 48 * 1024 * 1024, 256               # v7x (64 MiB physical) / unknown: stay safe


VMEM_LIMIT_BYTES, ROW_TARGET = _tpu_config()


# ------------------------------- small helpers ------------------------------ #

def _compiler_params(n_axes=1):
    return pltpu.CompilerParams(
        dimension_semantics=("parallel",) * n_axes,
        vmem_limit_bytes=VMEM_LIMIT_BYTES)


def _row_block(t, target=None):
    """Largest multiple of 8 that divides t and is <= target (else t itself)."""
    if target is None:
        target = ROW_TARGET
    cap = min(target, t)
    cap -= cap % 8
    for cand in range(cap, 7, -8):
        if t % cand == 0:
            return cand
    # TODO(synk): pad the row dim up to a multiple of 8 and mask the tail block instead
    #             of falling back to a full-extent tile for awkward sequence lengths.
    return t


def _mm(a, b):
    """MXU matmul: bf16 operands, f32 accumulation."""
    return jnp.dot(a.astype(MM_DTYPE), b.astype(MM_DTYPE),
                   preferred_element_type=jnp.float32)


def _sigmoid(x):
    # tanh form: a single EUP push per vreg (vs exp + reciprocal = 2 pushes).
    return 0.5 * (1.0 + jnp.tanh(0.5 * x))


def _layernorm(x, g, b, eps):
    mu = jnp.mean(x, axis=-1, keepdims=True)
    xc = x - mu
    var = jnp.mean(xc * xc, axis=-1, keepdims=True)
    return xc * lax.rsqrt(var + eps) * g + b


# ----------------------------- Pallas kernels ------------------------------ #

def _ffn_kernel(*refs, eps, factor, post_ln, add_pe):
    """Fused: (optional +PE) -> LN -> W1 -> Swish -> W2 -> residual (+ optional block-final LN)."""
    if add_pe:
        (x_ref, pe_ref, g_ref, b_ref, w1_ref, b1_ref, w2_ref, b2_ref,
         og_ref, ob_ref, o_ref) = refs
    else:
        (x_ref, g_ref, b_ref, w1_ref, b1_ref, w2_ref, b2_ref,
         og_ref, ob_ref, o_ref) = refs

    x = x_ref[...]
    if add_pe:
        x = x + pe_ref[...]
    h = _layernorm(x, g_ref[...], b_ref[...], eps)
    h = _mm(h, w1_ref[...]) + b1_ref[...]
    h = h * _sigmoid(h)                               # Swish
    h = _mm(h, w2_ref[...]) + b2_ref[...]
    y = x + factor * h
    if post_ln:
        y = _layernorm(y, og_ref[...], ob_ref[...], eps)
    o_ref[...] = y


def ffn_module(x2d, g, b, w1, b1, w2, b2, out_g, out_b, *, seq_len, pe=None,
               eps=1e-5, factor=0.5, post_ln=False):
    M, D = x2d.shape
    F = w1.shape[1]
    # Row tile divides the sequence length so an optional PE block lines up with each tile.
    TM = _row_block(seq_len)
    add_pe = pe is not None

    in_specs = [pl.BlockSpec((TM, D), lambda i: (i, 0))]
    inputs = [x2d]
    if add_pe:
        n_t = seq_len // TM
        in_specs.append(pl.BlockSpec((TM, D), lambda i: (i % n_t, 0)))
        inputs.append(pe)
    # TODO(synk): on v7x with large D/F, single-buffer the constant-index weight blocks
    #             (pipeline_mode=pl.Buffered(1)) to halve their resident VMEM footprint.
    in_specs += [pl.BlockSpec((1, D), lambda i: (0, 0)),
                 pl.BlockSpec((1, D), lambda i: (0, 0)),
                 pl.BlockSpec((D, F), lambda i: (0, 0)),
                 pl.BlockSpec((1, F), lambda i: (0, 0)),
                 pl.BlockSpec((F, D), lambda i: (0, 0)),
                 pl.BlockSpec((1, D), lambda i: (0, 0)),
                 pl.BlockSpec((1, D), lambda i: (0, 0)),
                 pl.BlockSpec((1, D), lambda i: (0, 0))]
    inputs += [g, b, w1, b1, w2, b2, out_g, out_b]

    return pl.pallas_call(
        functools.partial(_ffn_kernel, eps=eps, factor=factor,
                          post_ln=post_ln, add_pe=add_pe),
        grid=(M // TM,),
        in_specs=in_specs,
        out_specs=pl.BlockSpec((TM, D), lambda i: (i, 0)),
        out_shape=jax.ShapeDtypeStruct((M, D), jnp.float32),
        compiler_params=_compiler_params(),
    )(*inputs)


def _mhsa_kernel(x_ref, bias_ref, g_ref, b_ref, wqkv_ref, bqkv_ref, wo_ref, bo_ref,
                 o_ref, qkv_ref, ctx_ref, *, eps, num_heads, kv_chunk):
    """Fused MHSA module for one batch element:
       LN -> QKV matmul -> flash-style attention (online softmax over KV chunks)
       -> Wo projection + residual."""
    x = x_ref[0]                                       # (T, D) f32
    T, D = x.shape
    Dh = D // num_heads
    scale = 1.0 / float(Dh) ** 0.5

    h = _layernorm(x, g_ref[...], b_ref[...], eps)
    qkv_ref[...] = (_mm(h, wqkv_ref[...]) + bqkv_ref[...]).astype(qkv_ref.dtype)

    bias = bias_ref[0]                                 # (1, T) additive mask (0 / -1e9)

    # TODO(synk): for large D emit the QKV projection head-major so per-head slices are
    #             128-lane aligned; per-head column slices here are fine for small Dh.
    for hd in range(num_heads):                        # per-head; context stored directly
        q = qkv_ref[:, hd * Dh:(hd + 1) * Dh]          # (T, Dh) bf16
        m_i = jnp.full((T, 1), -jnp.inf, jnp.float32)
        l_i = jnp.zeros((T, 1), jnp.float32)
        acc = jnp.zeros((T, Dh), jnp.float32)
        for c0 in range(0, T, kv_chunk):               # online softmax over KV chunks
            c1 = min(c0 + kv_chunk, T)
            k = qkv_ref[c0:c1, D + hd * Dh:D + (hd + 1) * Dh]
            v = qkv_ref[c0:c1, 2 * D + hd * Dh:2 * D + (hd + 1) * Dh]
            s = lax.dot_general(q, k, (((1,), (1,)), ((), ())),     # q @ k^T (NT matmul)
                                preferred_element_type=jnp.float32) * scale
            s = s + bias[:, c0:c1]
            m_new = jnp.maximum(m_i, jnp.max(s, axis=-1, keepdims=True))
            alpha = jnp.exp(m_i - m_new)
            p = jnp.exp(s - m_new)
            l_i = alpha * l_i + jnp.sum(p, axis=-1, keepdims=True)
            acc = alpha * acc + jnp.dot(p.astype(MM_DTYPE), v,
                                        preferred_element_type=jnp.float32)
            m_i = m_new
        ctx_ref[:, hd * Dh:(hd + 1) * Dh] = (acc / l_i).astype(ctx_ref.dtype)

    # Wo projection + residual epilogue (lane-dense (T, D) store).
    o_ref[0] = x + _mm(ctx_ref[...], wo_ref[...]) + bo_ref[...]


def mhsa_module(x, attn_bias, p, num_heads, *, eps=1e-5, kv_chunk=512):
    """x: (B, T, D) f32; attn_bias: (B, 1, T) f32 additive key-mask bias."""
    B, T, D = x.shape
    assert D % num_heads == 0
    kv_chunk = min(kv_chunk, T)
    # TODO(synk): add a second parallel grid axis (heads or query tiles) so both v7x
    #             TensorCores stay busy when B is small/odd.
    return pl.pallas_call(
        functools.partial(_mhsa_kernel, eps=eps, num_heads=num_heads, kv_chunk=kv_chunk),
        grid=(B,),
        in_specs=[pl.BlockSpec((1, T, D), lambda b: (b, 0, 0)),
                  pl.BlockSpec((1, 1, T), lambda b: (b, 0, 0)),
                  pl.BlockSpec((1, D), lambda b: (0, 0)),
                  pl.BlockSpec((1, D), lambda b: (0, 0)),
                  pl.BlockSpec((D, 3 * D), lambda b: (0, 0)),
                  pl.BlockSpec((1, 3 * D), lambda b: (0, 0)),
                  pl.BlockSpec((D, D), lambda b: (0, 0)),
                  pl.BlockSpec((1, D), lambda b: (0, 0))],
        out_specs=pl.BlockSpec((1, T, D), lambda b: (b, 0, 0)),
        out_shape=jax.ShapeDtypeStruct((B, T, D), jnp.float32),
        scratch_shapes=[pltpu.VMEM((T, 3 * D), MM_DTYPE),     # qkv (bf16, stays in VMEM)
                        pltpu.VMEM((T, D), MM_DTYPE)],        # attention context
        compiler_params=_compiler_params(),
    )(x, attn_bias, p["mha_ln_g"], p["mha_ln_b"],
      p["w_qkv"], p["b_qkv"], p["wo"], p["bo"])


def _conv_module_kernel(x_ref, m_ref, g_ref, b_ref, wa_ref, ba_ref, wb_ref, bb_ref,
                        dw_ref, dwb_ref, bng_ref, bnb_ref, w2_ref, b2_ref,
                        o_ref, pad_ref, *, eps, K):
    """Fused Conformer conv module: LN -> pw1 (GLU) -> dwconv -> BN -> Swish -> pw2 -> residual."""
    x = x_ref[0]                                      # (T, D)
    m = m_ref[0]                                      # (T, 1) f32, 1.0 = valid frame
    T, D = x.shape
    pad = (K - 1) // 2

    h = _layernorm(x, g_ref[...], b_ref[...], eps)
    # pointwise conv 1 + GLU (weights pre-split so both halves are lane-aligned)
    a = _mm(h, wa_ref[...]) + ba_ref[...]
    gate = _mm(h, wb_ref[...]) + bb_ref[...]
    u = (a * _sigmoid(gate)) * m                      # zero padded frames before the conv

    # "same" zero padding: only the 2*pad border rows are cleared each step
    if pad > 0:
        pad_ref[0:pad, :] = jnp.zeros((pad, D), jnp.float32)
        pad_ref[pad + T:pad + T + pad, :] = jnp.zeros((pad, D), jnp.float32)
    pad_ref[pad:pad + T, :] = u

    # TODO(synk): group taps by k % 8 and move the residual shift to pltpu.roll (XLU slot)
    #             so the tap reads are sublane-aligned instead of 31 unaligned loads.
    acc = jnp.zeros((T, D), jnp.float32)
    for k in range(K):                                # static unroll over kernel taps
        acc = acc + pad_ref[k:k + T, :] * dw_ref[k:k + 1, :]
    acc = acc + dwb_ref[...]
    # BatchNorm1d eval mode with default running stats (mean=0, var=1), then Swish.
    # TODO(synk): plug in real BN running statistics from a trained checkpoint.
    acc = acc * bng_ref[...] + bnb_ref[...]
    acc = acc * _sigmoid(acc)
    # pointwise conv 2 + residual
    y = _mm(acc, w2_ref[...]) + b2_ref[...]
    o_ref[0] = x + y


def conv_module(x, mask_bt1, p, *, eps=1e-5):
    B, T, D = x.shape
    K = p["dw_w"].shape[0]
    pad = (K - 1) // 2
    return pl.pallas_call(
        functools.partial(_conv_module_kernel, eps=eps, K=K),
        grid=(B,),
        in_specs=[pl.BlockSpec((1, T, D), lambda b: (b, 0, 0)),
                  pl.BlockSpec((1, T, 1), lambda b: (b, 0, 0)),
                  pl.BlockSpec((1, D), lambda b: (0, 0)),
                  pl.BlockSpec((1, D), lambda b: (0, 0)),
                  pl.BlockSpec((D, D), lambda b: (0, 0)),
                  pl.BlockSpec((1, D), lambda b: (0, 0)),
                  pl.BlockSpec((D, D), lambda b: (0, 0)),
                  pl.BlockSpec((1, D), lambda b: (0, 0)),
                  pl.BlockSpec((K, D), lambda b: (0, 0)),
                  pl.BlockSpec((1, D), lambda b: (0, 0)),
                  pl.BlockSpec((1, D), lambda b: (0, 0)),
                  pl.BlockSpec((1, D), lambda b: (0, 0)),
                  pl.BlockSpec((D, D), lambda b: (0, 0)),
                  pl.BlockSpec((1, D), lambda b: (0, 0))],
        out_specs=pl.BlockSpec((1, T, D), lambda b: (b, 0, 0)),
        out_shape=jax.ShapeDtypeStruct((B, T, D), jnp.float32),
        scratch_shapes=[pltpu.VMEM((T + 2 * pad, D), jnp.float32)],
        compiler_params=_compiler_params(),
    )(x, mask_bt1, p["conv_ln_g"], p["conv_ln_b"],
      p["pw1a_w"], p["pw1a_b"], p["pw1b_w"], p["pw1b_b"],
      p["dw_w"], p["dw_b"], p["bn_g"], p["bn_b"],
      p["pw2_w"], p["pw2_b"])


def _layernorm_kernel(x_ref, g_ref, b_ref, o_ref, *, eps):
    o_ref[...] = _layernorm(x_ref[...], g_ref[...], b_ref[...], eps)


def layernorm_2d(x2d, g, b, *, seq_len, eps):
    M, D = x2d.shape
    TM = _row_block(seq_len)
    return pl.pallas_call(
        functools.partial(_layernorm_kernel, eps=eps),
        grid=(M // TM,),
        in_specs=[pl.BlockSpec((TM, D), lambda i: (i, 0)),
                  pl.BlockSpec((1, D), lambda i: (0, 0)),
                  pl.BlockSpec((1, D), lambda i: (0, 0))],
        out_specs=pl.BlockSpec((TM, D), lambda i: (i, 0)),
        out_shape=jax.ShapeDtypeStruct((M, D), jnp.float32),
        compiler_params=_compiler_params(),
    )(x2d, g, b)


# ------------------------------- glue / model ------------------------------ #

def sinusoidal_pe(T, D):
    pos = jnp.arange(T, dtype=jnp.float32)[:, None]
    i = jnp.arange(0, D, 2, dtype=jnp.float32)[None, :]
    angle = pos / jnp.power(10000.0, i / float(D))
    pe = jnp.zeros((T, D), jnp.float32)
    pe = pe.at[:, 0::2].set(jnp.sin(angle))
    pe = pe.at[:, 1::2].set(jnp.cos(angle))
    return pe


def conformer_layer(x, attn_bias, mask_bt1, p, num_heads, *, pe=None):
    B, T, D = x.shape
    M = B * T
    flat = lambda a: a.reshape(M, -1)
    unflat = lambda a: a.reshape(B, T, -1)

    # ---- feed-forward module 1 (half-step residual); PE add fused in for layer 0 ----
    x2d = ffn_module(flat(x), p["ff1_ln_g"], p["ff1_ln_b"],
                     p["ff1_w1"], p["ff1_b1"], p["ff1_w2"], p["ff1_b2"],
                     p["out_ln_g"], p["out_ln_b"], seq_len=T, pe=pe,
                     eps=1e-5, factor=0.5, post_ln=False)

    # ---- multi-head self-attention module (single fused kernel) ----
    x3d = mhsa_module(unflat(x2d), attn_bias, p, num_heads)

    # ---- convolution module (one fused kernel, per batch element) ----
    x3d = conv_module(x3d, mask_bt1, p, eps=1e-5)

    # ---- feed-forward module 2 (half-step residual) + block-final LayerNorm ----
    x2d = ffn_module(flat(x3d), p["ff2_ln_g"], p["ff2_ln_b"],
                     p["ff2_w1"], p["ff2_b1"], p["ff2_w2"], p["ff2_b2"],
                     p["out_ln_g"], p["out_ln_b"], seq_len=T,
                     eps=1e-5, factor=0.5, post_ln=True)
    return unflat(x2d)


def transformer_encoder_forward(params, embed_src, src_length, mask, num_heads):
    """Matches TransformerEncoder.forward:
       returns (output (B,T,D), hidden_concat (B,D) = output[:, 0, :])."""
    del src_length  # lengths are expressed through `mask`
    B, T, D = embed_src.shape
    pe = sinusoidal_pe(T, D)
    mask_f = mask.astype(jnp.float32)                   # (B, 1, T), 1.0 = valid key
    attn_bias = (mask_f - 1.0) * 1e9                    # additive bias: 0 valid, -1e9 pad
    mask_bt1 = jnp.transpose(mask_f, (0, 2, 1))         # (B, T, 1) frame mask for the conv
    # emb_dropout: identity at inference
    layers = params["layers"]
    if not layers:
        x = embed_src + pe[None]
    else:
        x = embed_src
        for li, p in enumerate(layers):
            x = conformer_layer(x, attn_bias, mask_bt1, p, num_heads,
                                pe=pe if li == 0 else None)
    out2d = layernorm_2d(x.reshape(B * T, D), params["final"]["ln_g"],
                         params["final"]["ln_b"], seq_len=T, eps=1e-6)
    output = out2d.reshape(B, T, D)
    hidden_concat = output[:, 0, :]
    return output, hidden_concat


def init_params(key, hidden_size, ff_size, num_layers, conv_kernel_size=31):
    D, F = hidden_size, ff_size

    def dense(k, fan_in, shape, dtype=MM_DTYPE):
        w = jax.random.normal(k, shape, jnp.float32) * (float(fan_in) ** -0.5)
        return w.astype(dtype)

    layers = []
    for l in range(num_layers):
        ks = jax.random.split(jax.random.fold_in(key, l), 12)
        wq = dense(ks[2], D, (D, D))
        wk = dense(ks[3], D, (D, D))
        wv = dense(ks[4], D, (D, D))
        layers.append(dict(
            ff1_ln_g=jnp.ones((1, D)), ff1_ln_b=jnp.zeros((1, D)),
            ff1_w1=dense(ks[0], D, (D, F)), ff1_b1=jnp.zeros((1, F)),
            ff1_w2=dense(ks[1], F, (F, D)), ff1_b2=jnp.zeros((1, D)),
            mha_ln_g=jnp.ones((1, D)), mha_ln_b=jnp.zeros((1, D)),
            w_qkv=jnp.concatenate([wq, wk, wv], axis=1),      # fused (D, 3D) projection
            b_qkv=jnp.zeros((1, 3 * D)),
            wo=dense(ks[5], D, (D, D)), bo=jnp.zeros((1, D)),
            conv_ln_g=jnp.ones((1, D)), conv_ln_b=jnp.zeros((1, D)),
            # pointwise conv 1 pre-split into value / gate halves (lane-aligned GLU)
            pw1a_w=dense(ks[6], D, (D, D)), pw1a_b=jnp.zeros((1, D)),
            pw1b_w=dense(ks[7], D, (D, D)), pw1b_b=jnp.zeros((1, D)),
            dw_w=dense(ks[8], conv_kernel_size, (conv_kernel_size, D), jnp.float32),
            dw_b=jnp.zeros((1, D)),
            bn_g=jnp.ones((1, D)), bn_b=jnp.zeros((1, D)),
            pw2_w=dense(ks[9], D, (D, D)), pw2_b=jnp.zeros((1, D)),
            ff2_ln_g=jnp.ones((1, D)), ff2_ln_b=jnp.zeros((1, D)),
            ff2_w1=dense(ks[10], D, (D, F)), ff2_b1=jnp.zeros((1, F)),
            ff2_w2=dense(ks[11], F, (F, D)), ff2_b2=jnp.zeros((1, D)),
            out_ln_g=jnp.ones((1, D)), out_ln_b=jnp.zeros((1, D)),
        ))
    return dict(layers=layers,
                final=dict(ln_g=jnp.ones((1, D)), ln_b=jnp.zeros((1, D))))


if __name__ == "__main__":
    # small shapes: batch=2, src_len=16, hidden=32, ff=64, heads=4, layers=2
    B, T, D = 2, 16, 32
    FF = 64
    NUM_LAYERS = 2
    NUM_HEADS = 4

    key = jax.random.PRNGKey(0)
    k_emb, k_par = jax.random.split(key)

    embed_src = jax.random.normal(k_emb, (B, T, D), jnp.float32)
    src_length = jnp.array([T, T - 5], jnp.int32)
    mask = jnp.arange(T)[None, None, :] < src_length[:, None, None]   # (B,1,T), True = valid

    params = init_params(k_par, D, FF, NUM_LAYERS, conv_kernel_size=7)

    fwd = jax.jit(functools.partial(transformer_encoder_forward, num_heads=NUM_HEADS))
    output, hidden_concat = fwd(params, embed_src, src_length, mask)
    jax.block_until_ready((output, hidden_concat))

    assert output.shape == (B, T, D)
    assert hidden_concat.shape == (B, D)
    assert jnp.all(jnp.isfinite(output)) and jnp.all(jnp.isfinite(hidden_concat))
    print("KERNEL_OK")
</pallas_src>

<mosaic_0001>
module attributes {stable_mosaic.version = 11 : i64} {
  func.func @_ffn_kernel(%arg0: i32, %arg1: memref<16x32xf32, #tpu.memory_space<vmem>>, %arg2: memref<16x32xf32, #tpu.memory_space<vmem>>, %arg3: memref<1x32xf32, #tpu.memory_space<vmem>>, %arg4: memref<1x32xf32, #tpu.memory_space<vmem>>, %arg5: memref<32x64xbf16, #tpu.memory_space<vmem>>, %arg6: memref<1x64xf32, #tpu.memory_space<vmem>>, %arg7: memref<64x32xbf16, #tpu.memory_space<vmem>>, %arg8: memref<1x32xf32, #tpu.memory_space<vmem>>, %arg9: memref<1x32xf32, #tpu.memory_space<vmem>>, %arg10: memref<1x32xf32, #tpu.memory_space<vmem>>, %arg11: memref<16x32xf32, #tpu.memory_space<vmem>>) attributes {dimension_semantics = [#tpu.dimension_semantics<parallel>], iteration_bounds = array<i64: 2>, scalar_prefetch = 0 : i64, scratch_operands = 0 : i64, tpu.core_type = #tpu.core_type<tc>, window_params = [{transform_indices = @transform_0, window_bounds = array<i64: 16, 32>}, {transform_indices = @transform_1, window_bounds = array<i64: 16, 32>}, {pipeline_mode = #tpu.pipeline_mode<synchronous>, transform_indices = @transform_2, window_bounds = array<i64: 1, 32>}, {pipeline_mode = #tpu.pipeline_mode<synchronous>, transform_indices = @transform_3, window_bounds = array<i64: 1, 32>}, {pipeline_mode = #tpu.pipeline_mode<synchronous>, transform_indices = @transform_4, window_bounds = array<i64: 32, 64>}, {pipeline_mode = #tpu.pipeline_mode<synchronous>, transform_indices = @transform_5, window_bounds = array<i64: 1, 64>}, {pipeline_mode = #tpu.pipeline_mode<synchronous>, transform_indices = @transform_6, window_bounds = array<i64: 64, 32>}, {pipeline_mode = #tpu.pipeline_mode<synchronous>, transform_indices = @transform_7, window_bounds = array<i64: 1, 32>}, {pipeline_mode = #tpu.pipeline_mode<synchronous>, transform_indices = @transform_8, window_bounds = array<i64: 1, 32>}, {pipeline_mode = #tpu.pipeline_mode<synchronous>, transform_indices = @transform_9, window_bounds = array<i64: 1, 32>}, {transform_indices = @transform_10, window_bounds = array<i64: 16, 32>}]} {
    %c0 = arith.constant 0 : index
    %c0_0 = arith.constant 0 : index
    %0 = vector.load %arg1[%c0, %c0_0] : memref<16x32xf32, #tpu.memory_space<vmem>>, vector<16x32xf32>
    %c0_1 = arith.constant 0 : index
    %c0_2 = arith.constant 0 : index
    %1 = vector.load %arg2[%c0_1, %c0_2] : memref<16x32xf32, #tpu.memory_space<vmem>>, vector<16x32xf32>
    %2 = arith.addf %0, %1 : vector<16x32xf32>
    %c0_3 = arith.constant 0 : index
    %c0_4 = arith.constant 0 : index
    %3 = vector.load %arg3[%c0_3, %c0_4] : memref<1x32xf32, #tpu.memory_space<vmem>>, vector<1x32xf32>
    %c0_5 = arith.constant 0 : index
    %c0_6 = arith.constant 0 : index
    %4 = vector.load %arg4[%c0_5, %c0_6] : memref<1x32xf32, #tpu.memory_space<vmem>>, vector<1x32xf32>
    %cst = arith.constant dense<0.000000e+00> : vector<16xf32>
    %5 = vector.multi_reduction <add>, %2, %cst [1] : vector<16x32xf32> to vector<16xf32>
    %6 = vector.shape_cast %5 : vector<16xf32> to vector<16x1xf32>
    %cst_7 = arith.constant 3.200000e+01 : f32
    %7 = vector.broadcast %cst_7 : f32 to vector<16x1xf32>
    %8 = arith.divf %6, %7 : vector<16x1xf32>
    %9 = vector.broadcast %8 : vector<16x1xf32> to vector<16x32xf32>
    %10 = arith.subf %2, %9 : vector<16x32xf32>
    %11 = arith.mulf %10, %10 : vector<16x32xf32>
    %cst_8 = arith.constant dense<0.000000e+00> : vector<16xf32>
    %12 = vector.multi_reduction <add>, %11, %cst_8 [1] : vector<16x32xf32> to vector<16xf32>
    %13 = vector.shape_cast %12 : vector<16xf32> to vector<16x1xf32>
    %cst_9 = arith.constant 3.200000e+01 : f32
    %14 = vector.broadcast %cst_9 : f32 to vector<16x1xf32>
    %15 = arith.divf %13, %14 : vector<16x1xf32>
    %cst_10 = arith.constant 9.99999974E-6 : f32
    %16 = vector.broadcast %cst_10 : f32 to vector<16x1xf32>
    %17 = arith.addf %15, %16 : vector<16x1xf32>
    %18 = math.rsqrt %17 : vector<16x1xf32>
    %19 = vector.broadcast %18 : vector<16x1xf32> to vector<16x32xf32>
    %20 = arith.mulf %10, %19 : vector<16x32xf32>
    %21 = vector.broadcast %3 : vector<1x32xf32> to vector<16x32xf32>
    %22 = arith.mulf %20, %21 : vector<16x32xf32>
    %23 = vector.broadcast %4 : vector<1x32xf32> to vector<16x32xf32>
    %24 = arith.addf %22, %23 : vector<16x32xf32>
    %c0_11 = arith.constant 0 : index
    %c0_12 = arith.constant 0 : index
    %25 = vector.load %arg5[%c0_11, %c0_12] : memref<32x64xbf16, #tpu.memory_space<vmem>>, vector<32x64xbf16>
    %26 = arith.truncf %24 : vector<16x32xf32> to vector<16x32xbf16>
    %cst_13 = arith.constant dense<0.000000e+00> : vector<16x64xf32>
    %27 = tpu.matmul %26, %25, %cst_13 {dimension_numbers = #tpu.dot_dimension_numbers<[1], [0], [0], [1], [0, 0, 1, 1], [], []>} : vector<16x32xbf16>, vector<32x64xbf16>, vector<16x64xf32> -> vector<16x64xf32>
    %c0_14 = arith.constant 0 : index
    %c0_15 = arith.constant 0 : index
    %28 = vector.load %arg6[%c0_14, %c0_15] : memref<1x64xf32, #tpu.memory_space<vmem>>, vector<1x64xf32>
    %29 = vector.broadcast %28 : vector<1x64xf32> to vector<16x64xf32>
    %30 = arith.addf %27, %29 : vector<16x64xf32>
    %cst_16 = arith.constant 5.000000e-01 : f32
    %31 = vector.broadcast %cst_16 : f32 to vector<16x64xf32>
    %32 = arith.mulf %31, %30 : vector<16x64xf32>
    %33 = math.tanh %32 : vector<16x64xf32>
    %cst_17 = arith.constant 1.000000e+00 : f32
    %34 = vector.broadcast %cst_17 : f32 to vector<16x64xf32>
    %35 = arith.addf %34, %33 : vector<16x64xf32>
    %cst_18 = arith.constant 5.000000e-01 : f32
    %36 = vector.broadcast %cst_18 : f32 to vector<16x64xf32>
    %37 = arith.mulf %36, %35 : vector<16x64xf32>
    %38 = arith.mulf %30, %37 : vector<16x64xf32>
    %c0_19 = arith.constant 0 : index
    %c0_20 = arith.constant 0 : index
    %39 = vector.load %arg7[%c0_19, %c0_20] : memref<64x32xbf16, #tpu.memory_space<vmem>>, vector<64x32xbf16>
    %40 = arith.truncf %38 : vector<16x64xf32> to vector<16x64xbf16>
    %cst_21 = arith.constant dense<0.000000e+00> : vector<16x32xf32>
    %41 = tpu.matmul %40, %39, %cst_21 {dimension_numbers = #tpu.dot_dimension_numbers<[1], [0], [0], [1], [0, 0, 1, 1], [], []>} : vector<16x64xbf16>, vector<64x32xbf16>, vector<16x32xf32> -> vector<16x32xf32>
    %c0_22 = arith.constant 0 : index
    %c0_23 = arith.constant 0 : index
    %42 = vector.load %arg8[%c0_22, %c0_23] : memref<1x32xf32, #tpu.memory_space<vmem>>, vector<1x32xf32>
    %43 = vector.broadcast %42 : vector<1x32xf32> to vector<16x32xf32>
    %44 = arith.addf %41, %43 : vector<16x32xf32>
    %cst_24 = arith.constant 5.000000e-01 : f32
    %45 = vector.broadcast %cst_24 : f32 to vector<16x32xf32>
    %46 = arith.mulf %45, %44 : vector<16x32xf32>
    %47 = arith.addf %2, %46 : vector<16x32xf32>
    %c0_25 = arith.constant 0 : index
    %c0_26 = arith.constant 0 : index
    %48 = vector.load %arg11[%c0_25, %c0_26] : memref<16x32xf32, #tpu.memory_space<vmem>>, vector<16x32xf32>
    tpu.vector_store %arg11[%c0_25, %c0_26], %47 {strides = array<i32>} : memref<16x32xf32, #tpu.memory_space<vmem>>, vector<16x32xf32>,
    return
  }
  func.func @transform_0(%arg0: i32) -> (i32, i32) {
    %c0_i32 = arith.constant 0 : i32
    %c0_i32_0 = arith.constant 0 : i32
    return %arg0, %c0_i32 : i32, i32
  }
  func.func @transform_1(%arg0: i32) -> (i32, i32) {
    %c1_i32 = arith.constant 1 : i32
    %c0_i32 = arith.constant 0 : i32
    %0 = arith.cmpi eq, %c1_i32, %c0_i32 : i32
    %c1_i32_0 = arith.constant 1 : i32
    %1 = arith.select %0, %c1_i32_0, %c1_i32 : i32
    %2 = arith.remsi %arg0, %1 : i32
    %c0_i32_1 = arith.constant 0 : i32
    %3 = arith.cmpi ne, %2, %c0_i32_1 : i32
    %c0_i32_2 = arith.constant 0 : i32
    %4 = arith.cmpi slt, %2, %c0_i32_2 : i32
    %c0_i32_3 = arith.constant 0 : i32
    %5 = arith.cmpi slt, %1, %c0_i32_3 : i32
    %6 = arith.xori %4, %5 : i1
    %7 = arith.andi %6, %3 : i1
    %8 = arith.addi %2, %1 : i32
    %9 = arith.select %7, %8, %2 : i32
    %c0_i32_4 = arith.constant 0 : i32
    %c0_i32_5 = arith.constant 0 : i32
    return %9, %c0_i32_4 : i32, i32
  }
  func.func @transform_2(%arg0: i32) -> (i32, i32) {
    %c0_i32 = arith.constant 0 : i32
    %c0_i32_0 = arith.constant 0 : i32
    %c0_i32_1 = arith.constant 0 : i32
    return %c0_i32, %c0_i32_0 : i32, i32
  }
  func.func @transform_3(%arg0: i32) -> (i32, i32) {
    %c0_i32 = arith.constant 0 : i32
    %c0_i32_0 = arith.constant 0 : i32
    %c0_i32_1 = arith.constant 0 : i32
    return %c0_i32, %c0_i32_0 : i32, i32
  }
  func.func @transform_4(%arg0: i32) -> (i32, i32) {
    %c0_i32 = arith.constant 0 : i32
    %c0_i32_0 = arith.constant 0 : i32
    %c0_i32_1 = arith.constant 0 : i32
    return %c0_i32, %c0_i32_0 : i32, i32
  }
  func.func @transform_5(%arg0: i32) -> (i32, i32) {
    %c0_i32 = arith.constant 0 : i32
    %c0_i32_0 = arith.constant 0 : i32
    %c0_i32_1 = arith.constant 0 : i32
    return %c0_i32, %c0_i32_0 : i32, i32
  }
  func.func @transform_6(%arg0: i32) -> (i32, i32) {
    %c0_i32 = arith.constant 0 : i32
    %c0_i32_0 = arith.constant 0 : i32
    %c0_i32_1 = arith.constant 0 : i32
    return %c0_i32, %c0_i32_0 : i32, i32
  }
  func.func @transform_7(%arg0: i32) -> (i32, i32) {
    %c0_i32 = arith.constant 0 : i32
    %c0_i32_0 = arith.constant 0 : i32
    %c0_i32_1 = arith.constant 0 : i32
    return %c0_i32, %c0_i32_0 : i32, i32
  }
  func.func @transform_8(%arg0: i32) -> (i32, i32) {
    %c0_i32 = arith.constant 0 : i32
    %c0_i32_0 = arith.constant 0 : i32
    %c0_i32_1 = arith.constant 0 : i32
    return %c0_i32, %c0_i32_0 : i32, i32
  }
  func.func @transform_9(%arg0: i32) -> (i32, i32) {
    %c0_i32 = arith.constant 0 : i32
    %c0_i32_0 = arith.constant 0 : i32
    %c0_i32_1 = arith.constant 0 : i32
    return %c0_i32, %c0_i32_0 : i32, i32
  }
  func.func @transform_10(%arg0: i32) -> (i32, i32) {
    %c0_i32 = arith.constant 0 : i32
    %c0_i32_0 = arith.constant 0 : i32
    return %arg0, %c0_i32 : i32, i32
  }
}

module attributes {stable_mosaic.version = 11 : i64} {
  func.func @_mhsa_kernel(%arg0: i32, %arg1: memref<1x16x32xf32, #tpu.memory_space<vmem>>, %arg2: memref<1x1x16xf32, #tpu.memory_space<vmem>>, %arg3: memref<1x32xf32, #tpu.memory_space<vmem>>, %arg4: memref<1x32xf32, #tpu.memory_space<vmem>>, %arg5: memref<32x96xbf16, #tpu.memory_space<vmem>>, %arg6: memref<1x96xf32, #tpu.memory_space<vmem>>, %arg7: memref<32x32xbf16, #tpu.memory_space<vmem>>, %arg8: memref<1x32xf32, #tpu.memory_space<vmem>>, %arg9: memref<1x16x32xf32, #tpu.memory_space<vmem>>, %arg10: memref<16x96xbf16, #tpu.memory_space<vmem>>, %arg11: memref<16x32xbf16, #tpu.memory_space<vmem>>) attributes {dimension_semantics = [#tpu.dimension_semantics<parallel>], iteration_bounds = array<i64: 2>, scalar_prefetch = 0 : i64, scratch_operands = 2 : i64, tpu.core_type = #tpu.core_type<tc>, window_params = [{transform_indices = @transform_0, window_bounds = array<i64: 1, 16, 32>}, {transform_indices = @transform_1, window_bounds = array<i64: 1, 1, 16>}, {pipeline_mode = #tpu.pipeline_mode<synchronous>, transform_indices = @transform_2, window_bounds = array<i64: 1, 32>}, {pipeline_mode = #tpu.pipeline_mode<synchronous>, transform_indices = @transform_3, window_bounds = array<i64: 1, 32>}, {pipeline_mode = #tpu.pipeline_mode<synchronous>, transform_indices = @transform_4, window_bounds = array<i64: 32, 96>}, {pipeline_mode = #tpu.pipeline_mode<synchronous>, transform_indices = @transform_5, window_bounds = array<i64: 1, 96>}, {pipeline_mode = #tpu.pipeline_mode<synchronous>, transform_indices = @transform_6, window_bounds = array<i64: 32, 32>}, {pipeline_mode = #tpu.pipeline_mode<synchronous>, transform_indices = @transform_7, window_bounds = array<i64: 1, 32>}, {transform_indices = @transform_8, window_bounds = array<i64: 1, 16, 32>}]} {
    %c0 = arith.constant 0 : index
    %c0_0 = arith.constant 0 : index
    %c0_1 = arith.constant 0 : index
    %0 = vector.load %arg1[%c0, %c0_0, %c0_1] : memref<1x16x32xf32, #tpu.memory_space<vmem>>, vector<1x16x32xf32>
    %1 = vector.shape_cast %0 : vector<1x16x32xf32> to vector<16x32xf32>
    %c0_2 = arith.constant 0 : index
    %c0_3 = arith.constant 0 : index
    %2 = vector.load %arg3[%c0_2, %c0_3] : memref<1x32xf32, #tpu.memory_space<vmem>>, vector<1x32xf32>
    %c0_4 = arith.constant 0 : index
    %c0_5 = arith.constant 0 : index
    %3 = vector.load %arg4[%c0_4, %c0_5] : memref<1x32xf32, #tpu.memory_space<vmem>>, vector<1x32xf32>
    %cst = arith.constant dense<0.000000e+00> : vector<16xf32>
    %4 = vector.multi_reduction <add>, %1, %cst [1] : vector<16x32xf32> to vector<16xf32>
    %5 = vector.shape_cast %4 : vector<16xf32> to vector<16x1xf32>
    %cst_6 = arith.constant 3.200000e+01 : f32
    %6 = vector.broadcast %cst_6 : f32 to vector<16x1xf32>
    %7 = arith.divf %5, %6 : vector<16x1xf32>
    %8 = vector.broadcast %7 : vector<16x1xf32> to vector<16x32xf32>
    %9 = arith.subf %1, %8 : vector<16x32xf32>
    %10 = arith.mulf %9, %9 : vector<16x32xf32>
    %cst_7 = arith.constant dense<0.000000e+00> : vector<16xf32>
    %11 = vector.multi_reduction <add>, %10, %cst_7 [1] : vector<16x32xf32> to vector<16xf32>
    %12 = vector.shape_cast %11 : vector<16xf32> to vector<16x1xf32>
    %cst_8 = arith.constant 3.200000e+01 : f32
    %13 = vector.broadcast %cst_8 : f32 to vector<16x1xf32>
    %14 = arith.divf %12, %13 : vector<16x1xf32>
    %cst_9 = arith.constant 9.99999974E-6 : f32
    %15 = vector.broadcast %cst_9 : f32 to vector<16x1xf32>
    %16 = arith.addf %14, %15 : vector<16x1xf32>
    %17 = math.rsqrt %16 : vector<16x1xf32>
    %18 = vector.broadcast %17 : vector<16x1xf32> to vector<16x32xf32>
    %19 = arith.mulf %9, %18 : vector<16x32xf32>
    %20 = vector.broadcast %2 : vector<1x32xf32> to vector<16x32xf32>
    %21 = arith.mulf %19, %20 : vector<16x32xf32>
    %22 = vector.broadcast %3 : vector<1x32xf32> to vector<16x32xf32>
    %23 = arith.addf %21, %22 : vector<16x32xf32>
    %c0_10 = arith.constant 0 : index
    %c0_11 = arith.constant 0 : index
    %24 = vector.load %arg5[%c0_10, %c0_11] : memref<32x96xbf16, #tpu.memory_space<vmem>>, vector<32x96xbf16>
    %25 = arith.truncf %23 : vector<16x32xf32> to vector<16x32xbf16>
    %cst_12 = arith.constant dense<0.000000e+00> : vector<16x96xf32>
    %26 = tpu.matmul %25, %24, %cst_12 {dimension_numbers = #tpu.dot_dimension_numbers<[1], [0], [0], [1], [0, 0, 1, 1], [], []>} : vector<16x32xbf16>, vector<32x96xbf16>, vector<16x96xf32> -> vector<16x96xf32>
    %c0_13 = arith.constant 0 : index
    %c0_14 = arith.constant 0 : index
    %27 = vector.load %arg6[%c0_13, %c0_14] : memref<1x96xf32, #tpu.memory_space<vmem>>, vector<1x96xf32>
    %28 = vector.broadcast %27 : vector<1x96xf32> to vector<16x96xf32>
    %29 = arith.addf %26, %28 : vector<16x96xf32>
    %30 = arith.truncf %29 : vector<16x96xf32> to vector<16x96xbf16>
    %c0_15 = arith.constant 0 : index
    %c0_16 = arith.constant 0 : index
    %31 = vector.load %arg10[%c0_15, %c0_16] : memref<16x96xbf16, #tpu.memory_space<vmem>>, vector<16x96xbf16>
    tpu.vector_store %arg10[%c0_15, %c0_16], %30 {strides = array<i32>} : memref<16x96xbf16, #tpu.memory_space<vmem>>, vector<16x96xbf16>,
    %c0_17 = arith.constant 0 : index
    %c0_18 = arith.constant 0 : index
    %c0_19 = arith.constant 0 : index
    %32 = vector.load %arg2[%c0_17, %c0_18, %c0_19] : memref<1x1x16xf32, #tpu.memory_space<vmem>>, vector<1x1x16xf32>
    %33 = vector.shape_cast %32 : vector<1x1x16xf32> to vector<1x16xf32>
    %c0_20 = arith.constant 0 : index
    %c0_21 = arith.constant 0 : index
    %34 = vector.load %arg10[%c0_20, %c0_21] : memref<16x96xbf16, #tpu.memory_space<vmem>>, vector<16x8xbf16>
    %cst_22 = arith.constant 0xFF800000 : f32
    %35 = vector.broadcast %cst_22 : f32 to vector<16x1xf32>
    %cst_23 = arith.constant 0.000000e+00 : f32
    %36 = vector.broadcast %cst_23 : f32 to vector<16x1xf32>
    %cst_24 = arith.constant 0.000000e+00 : f32
    %37 = vector.broadcast %cst_24 : f32 to vector<16x8xf32>
    %c0_25 = arith.constant 0 : index
    %c32 = arith.constant 32 : index
    %38 = vector.load %arg10[%c0_25, %c32] : memref<16x96xbf16, #tpu.memory_space<vmem>>, vector<16x8xbf16>
    %c0_26 = arith.constant 0 : index
    %c64 = arith.constant 64 : index
    %39 = vector.load %arg10[%c0_26, %c64] : memref<16x96xbf16, #tpu.memory_space<vmem>>, vector<16x8xbf16>
    %cst_27 = arith.constant dense<0.000000e+00> : vector<16x16xf32>
    %40 = tpu.matmul %34, %38, %cst_27 {dimension_numbers = #tpu.dot_dimension_numbers<[1], [1], [0], [0], [0, 0, 1, 0], [], []>} : vector<16x8xbf16>, vector<16x8xbf16>, vector<16x16xf32> -> vector<16x16xf32>
    %cst_28 = arith.constant 0.353553385 : f32
    %41 = vector.broadcast %cst_28 : f32 to vector<16x16xf32>
    %42 = arith.mulf %40, %41 : vector<16x16xf32>
    %43 = vector.broadcast %33 : vector<1x16xf32> to vector<16x16xf32>
    %44 = arith.addf %42, %43 : vector<16x16xf32>
    %cst_29 = arith.constant dense<0xFF800000> : vector<16xf32>
    %45 = vector.multi_reduction <maximumf>, %44, %cst_29 [1] : vector<16x16xf32> to vector<16xf32>
    %46 = vector.shape_cast %45 : vector<16xf32> to vector<16x1xf32>
    %47 = arith.maximumf %35, %46 : vector<16x1xf32>
    %48 = arith.subf %35, %47 : vector<16x1xf32>
    %49 = math.exp %48 : vector<16x1xf32>
    %50 = vector.broadcast %47 : vector<16x1xf32> to vector<16x16xf32>
    %51 = arith.subf %44, %50 : vector<16x16xf32>
    %52 = math.exp %51 : vector<16x16xf32>
    %53 = arith.mulf %49, %36 : vector<16x1xf32>
    %cst_30 = arith.constant dense<0.000000e+00> : vector<16xf32>
    %54 = vector.multi_reduction <add>, %52, %cst_30 [1] : vector<16x16xf32> to vector<16xf32>
    %55 = vector.shape_cast %54 : vector<16xf32> to vector<16x1xf32>
    %56 = arith.addf %53, %55 : vector<16x1xf32>
    %57 = vector.broadcast %49 : vector<16x1xf32> to vector<16x8xf32>
    %58 = arith.mulf %57, %37 : vector<16x8xf32>
    %59 = arith.truncf %52 : vector<16x16xf32> to vector<16x16xbf16>
    %cst_31 = arith.constant dense<0.000000e+00> : vector<16x8xf32>
    %60 = tpu.matmul %59, %39, %cst_31 {dimension_numbers = #tpu.dot_dimension_numbers<[1], [0], [0], [1], [0, 0, 1, 1], [], []>} : vector<16x16xbf16>, vector<16x8xbf16>, vector<16x8xf32> -> vector<16x8xf32>
    %61 = arith.addf %58, %60 : vector<16x8xf32>
    %62 = vector.broadcast %56 : vector<16x1xf32> to vector<16x8xf32>
    %63 = arith.divf %61, %62 : vector<16x8xf32>
    %64 = arith.truncf %63 : vector<16x8xf32> to vector<16x8xbf16>
    %c0_32 = arith.constant 0 : index
    %c0_33 = arith.constant 0 : index
    %65 = vector.load %arg11[%c0_32, %c0_33] : memref<16x32xbf16, #tpu.memory_space<vmem>>, vector<16x8xbf16>
    tpu.vector_store %arg11[%c0_32, %c0_33], %64 {strides = array<i32>} : memref<16x32xbf16, #tpu.memory_space<vmem>>, vector<16x8xbf16>,
    %c0_34 = arith.constant 0 : index
    %c8 = arith.constant 8 : index
    %66 = vector.load %arg10[%c0_34, %c8] : memref<16x96xbf16, #tpu.memory_space<vmem>>, vector<16x8xbf16>
    %cst_35 = arith.constant 0xFF800000 : f32
    %67 = vector.broadcast %cst_35 : f32 to vector<16x1xf32>
    %cst_36 = arith.constant 0.000000e+00 : f32
    %68 = vector.broadcast %cst_36 : f32 to vector<16x1xf32>
    %cst_37 = arith.constant 0.000000e+00 : f32
    %69 = vector.broadcast %cst_37 : f32 to vector<16x8xf32>
    %c0_38 = arith.constant 0 : index
    %c40 = arith.constant 40 : index
    %70 = vector.load %arg10[%c0_38, %c40] : memref<16x96xbf16, #tpu.memory_space<vmem>>, vector<16x8xbf16>
    %c0_39 = arith.constant 0 : index
    %c72 = arith.constant 72 : index
    %71 = vector.load %arg10[%c0_39, %c72] : memref<16x96xbf16, #tpu.memory_space<vmem>>, vector<16x8xbf16>
    %cst_40 = arith.constant dense<0.000000e+00> : vector<16x16xf32>
    %72 = tpu.matmul %66, %70, %cst_40 {dimension_numbers = #tpu.dot_dimension_numbers<[1], [1], [0], [0], [0, 0, 1, 0], [], []>} : vector<16x8xbf16>, vector<16x8xbf16>, vector<16x16xf32> -> vector<16x16xf32>
    %cst_41 = arith.constant 0.353553385 : f32
    %73 = vector.broadcast %cst_41 : f32 to vector<16x16xf32>
    %74 = arith.mulf %72, %73 : vector<16x16xf32>
    %75 = vector.broadcast %33 : vector<1x16xf32> to vector<16x16xf32>
    %76 = arith.addf %74, %75 : vector<16x16xf32>
    %cst_42 = arith.constant dense<0xFF800000> : vector<16xf32>
    %77 = vector.multi_reduction <maximumf>, %76, %cst_42 [1] : vector<16x16xf32> to vector<16xf32>
    %78 = vector.shape_cast %77 : vector<16xf32> to vector<16x1xf32>
    %79 = arith.maximumf %67, %78 : vector<16x1xf32>
    %80 = arith.subf %67, %79 : vector<16x1xf32>
    %81 = math.exp %80 : vector<16x1xf32>
    %82 = vector.broadcast %79 : vector<16x1xf32> to vector<16x16xf32>
    %83 = arith.subf %76, %82 : vector<16x16xf32>
    %84 = math.exp %83 : vector<16x16xf32>
    %85 = arith.mulf %81, %68 : vector<16x1xf32>
    %cst_43 = arith.constant dense<0.000000e+00> : vector<16xf32>
    %86 = vector.multi_reduction <add>, %84, %cst_43 [1] : vector<16x16xf32> to vector<16xf32>
    %87 = vector.shape_cast %86 : vector<16xf32> to vector<16x1xf32>
    %88 = arith.addf %85, %87 : vector<16x1xf32>
    %89 = vector.broadcast %81 : vector<16x1xf32> to vector<16x8xf32>
    %90 = arith.mulf %89, %69 : vector<16x8xf32>
    %91 = arith.truncf %84 : vector<16x16xf32> to vector<16x16xbf16>
    %cst_44 = arith.constant dense<0.000000e+00> : vector<16x8xf32>
    %92 = tpu.matmul %91, %71, %cst_44 {dimension_numbers = #tpu.dot_dimension_numbers<[1], [0], [0], [1], [0, 0, 1, 1], [], []>} : vector<16x16xbf16>, vector<16x8xbf16>, vector<16x8xf32> -> vector<16x8xf32>
    %93 = arith.addf %90, %92 : vector<16x8xf32>
    %94 = vector.broadcast %88 : vector<16x1xf32> to vector<16x8xf32>
    %95 = arith.divf %93, %94 : vector<16x8xf32>
    %96 = arith.truncf %95 : vector<16x8xf32> to vector<16x8xbf16>
    %c0_45 = arith.constant 0 : index
    %c8_46 = arith.constant 8 : index
    %97 = vector.load %arg11[%c0_45, %c8_46] : memref<16x32xbf16, #tpu.memory_space<vmem>>, vector<16x8xbf16>
    tpu.vector_store %arg11[%c0_45, %c8_46], %96 {strides = array<i32>} : memref<16x32xbf16, #tpu.memory_space<vmem>>, vector<16x8xbf16>,
    %c0_47 = arith.constant 0 : index
    %c16 = arith.constant 16 : index
    %98 = vector.load %arg10[%c0_47, %c16] : memref<16x96xbf16, #tpu.memory_space<vmem>>, vector<16x8xbf16>
    %cst_48 = arith.constant 0xFF800000 : f32
    %99 = vector.broadcast %cst_48 : f32 to vector<16x1xf32>
    %cst_49 = arith.constant 0.000000e+00 : f32
    %100 = vector.broadcast %cst_49 : f32 to vector<16x1xf32>
    %cst_50 = arith.constant 0.000000e+00 : f32
    %101 = vector.broadcast %cst_50 : f32 to vector<16x8xf32>
    %c0_51 = arith.constant 0 : index
    %c48 = arith.constant 48 : index
    %102 = vector.load %arg10[%c0_51, %c48] : memref<16x96xbf16, #tpu.memory_space<vmem>>, vector<16x8xbf16>
    %c0_52 = arith.constant 0 : index
    %c80 = arith.constant 80 : index
    %103 = vector.load %arg10[%c0_52, %c80] : memref<16x96xbf16, #tpu.memory_space<vmem>>, vector<16x8xbf16>
    %cst_53 = arith.constant dense<0.000000e+00> : vector<16x16xf32>
    %104 = tpu.matmul %98, %102, %cst_53 {dimension_numbers = #tpu.dot_dimension_numbers<[1], [1], [0], [0], [0, 0, 1, 0], [], []>} : vector<16x8xbf16>, vector<16x8xbf16>, vector<16x16xf32> -> vector<16x16xf32>
    %cst_54 = arith.constant 0.353553385 : f32
    %105 = vector.broadcast %cst_54 : f32 to vector<16x16xf32>
    %106 = arith.mulf %104, %105 : vector<16x16xf32>
    %107 = vector.broadcast %33 : vector<1x16xf32> to vector<16x16xf32>
    %108 = arith.addf %106, %107 : vector<16x16xf32>
    %cst_55 = arith.constant dense<0xFF800000> : vector<16xf32>
    %109 = vector.multi_reduction <maximumf>, %108, %cst_55 [1] : vector<16x16xf32> to vector<16xf32>
    %110 = vector.shape_cast %109 : vector<16xf32> to vector<16x1xf32>
    %111 = arith.maximumf %99, %110 : vector<16x1xf32>
    %112 = arith.subf %99, %111 : vector<16x1xf32>
    %113 = math.exp %112 : vector<16x1xf32>
    %114 = vector.broadcast %111 : vector<16x1xf32> to vector<16x16xf32>
    %115 = arith.subf %108, %114 : vector<16x16xf32>
    %116 = math.exp %115 : vector<16x16xf32>
    %117 = arith.mulf %113, %100 : vector<16x1xf32>
    %cst_56 = arith.constant dense<0.000000e+00> : vector<16xf32>
    %118 = vector.multi_reduction <add>, %116, %cst_56 [1] : vector<16x16xf32> to vector<16xf32>
    %119 = vector.shape_cast %118 : vector<16xf32> to vector<16x1xf32>
    %120 = arith.addf %117, %119 : vector<16x1xf32>
    %121 = vector.broadcast %113 : vector<16x1xf32> to vector<16x8xf32>
    %122 = arith.mulf %121, %101 : vector<16x8xf32>
    %123 = arith.truncf %116 : vector<16x16xf32> to vector<16x16xbf16>
    %cst_57 = arith.constant dense<0.000000e+00> : vector<16x8xf32>
    %124 = tpu.matmul %123, %103, %cst_57 {dimension_numbers = #tpu.dot_dimension_numbers<[1], [0], [0], [1], [0, 0, 1, 1], [], []>} : vector<16x16xbf16>, vector<16x8xbf16>, vector<16x8xf32> -> vector<16x8xf32>
    %125 = arith.addf %122, %124 : vector<16x8xf32>
    %126 = vector.broadcast %120 : vector<16x1xf32> to vector<16x8xf32>
    %127 = arith.divf %125, %126 : vector<16x8xf32>
    %128 = arith.truncf %127 : vector<16x8xf32> to vector<16x8xbf16>
    %c0_58 = arith.constant 0 : index
    %c16_59 = arith.constant 16 : index
    %129 = vector.load %arg11[%c0_58, %c16_59] : memref<16x32xbf16, #tpu.memory_space<vmem>>, vector<16x8xbf16>
    tpu.vector_store %arg11[%c0_58, %c16_59], %128 {strides = array<i32>} : memref<16x32xbf16, #tpu.memory_space<vmem>>, vector<16x8xbf16>,
    %c0_60 = arith.constant 0 : index
    %c24 = arith.constant 24 : index
    %130 = vector.load %arg10[%c0_60, %c24] : memref<16x96xbf16, #tpu.memory_space<vmem>>, vector<16x8xbf16>
    %cst_61 = arith.constant 0xFF800000 : f32
    %131 = vector.broadcast %cst_61 : f32 to vector<16x1xf32>
    %cst_62 = arith.constant 0.000000e+00 : f32
    %132 = vector.broadcast %cst_62 : f32 to vector<16x1xf32>
    %cst_63 = arith.constant 0.000000e+00 : f32
    %133 = vector.broadcast %cst_63 : f32 to vector<16x8xf32>
    %c0_64 = arith.constant 0 : index
    %c56 = arith.constant 56 : index
    %134 = vector.load %arg10[%c0_64, %c56] : memref<16x96xbf16, #tpu.memory_space<vmem>>, vector<16x8xbf16>
    %c0_65 = arith.constant 0 : index
    %c88 = arith.constant 88 : index
    %135 = vector.load %arg10[%c0_65, %c88] : memref<16x96xbf16, #tpu.memory_space<vmem>>, vector<16x8xbf16>
    %cst_66 = arith.constant dense<0.000000e+00> : vector<16x16xf32>
    %136 = tpu.matmul %130, %134, %cst_66 {dimension_numbers = #tpu.dot_dimension_numbers<[1], [1], [0], [0], [0, 0, 1, 0], [], []>} : vector<16x8xbf16>, vector<16x8xbf16>, vector<16x16xf32> -> vector<16x16xf32>
    %cst_67 = arith.constant 0.353553385 : f32
    %137 = vector.broadcast %cst_67 : f32 to vector<16x16xf32>
    %138 = arith.mulf %136, %137 : vector<16x16xf32>
    %139 = vector.broadcast %33 : vector<1x16xf32> to vector<16x16xf32>
    %140 = arith.addf %138, %139 : vector<16x16xf32>
    %cst_68 = arith.constant dense<0xFF800000> : vector<16xf32>
    %141 = vector.multi_reduction <maximumf>, %140, %cst_68 [1] : vector<16x16xf32> to vector<16xf32>
    %142 = vector.shape_cast %141 : vector<16xf32> to vector<16x1xf32>
    %143 = arith.maximumf %131, %142 : vector<16x1xf32>
    %144 = arith.subf %131, %143 : vector<16x1xf32>
    %145 = math.exp %144 : vector<16x1xf32>
    %146 = vector.broadcast %143 : vector<16x1xf32> to vector<16x16xf32>
    %147 = arith.subf %140, %146 : vector<16x16xf32>
    %148 = math.exp %147 : vector<16x16xf32>
    %149 = arith.mulf %145, %132 : vector<16x1xf32>
    %cst_69 = arith.constant dense<0.000000e+00> : vector<16xf32>
    %150 = vector.multi_reduction <add>, %148, %cst_69 [1] : vector<16x16xf32> to vector<16xf32>
    %151 = vector.shape_cast %150 : vector<16xf32> to vector<16x1xf32>
    %152 = arith.addf %149, %151 : vector<16x1xf32>
    %153 = vector.broadcast %145 : vector<16x1xf32> to vector<16x8xf32>
    %154 = arith.mulf %153, %133 : vector<16x8xf32>
    %155 = arith.truncf %148 : vector<16x16xf32> to vector<16x16xbf16>
    %cst_70 = arith.constant dense<0.000000e+00> : vector<16x8xf32>
    %156 = tpu.matmul %155, %135, %cst_70 {dimension_numbers = #tpu.dot_dimension_numbers<[1], [0], [0], [1], [0, 0, 1, 1], [], []>} : vector<16x16xbf16>, vector<16x8xbf16>, vector<16x8xf32> -> vector<16x8xf32>
    %157 = arith.addf %154, %156 : vector<16x8xf32>
    %158 = vector.broadcast %152 : vector<16x1xf32> to vector<16x8xf32>
    %159 = arith.divf %157, %158 : vector<16x8xf32>
    %160 = arith.truncf %159 : vector<16x8xf32> to vector<16x8xbf16>
    %c0_71 = arith.constant 0 : index
    %c24_72 = arith.constant 24 : index
    %161 = vector.load %arg11[%c0_71, %c24_72] : memref<16x32xbf16, #tpu.memory_space<vmem>>, vector<16x8xbf16>
    tpu.vector_store %arg11[%c0_71, %c24_72], %160 {strides = array<i32>} : memref<16x32xbf16, #tpu.memory_space<vmem>>, vector<16x8xbf16>,
    %c0_73 = arith.constant 0 : index
    %c0_74 = arith.constant 0 : index
    %162 = vector.load %arg11[%c0_73, %c0_74] : memref<16x32xbf16, #tpu.memory_space<vmem>>, vector<16x32xbf16>
    %c0_75 = arith.constant 0 : index
    %c0_76 = arith.constant 0 : index
    %163 = vector.load %arg7[%c0_75, %c0_76] : memref<32x32xbf16, #tpu.memory_space<vmem>>, vector<32x32xbf16>
    %cst_77 = arith.constant dense<0.000000e+00> : vector<16x32xf32>
    %164 = tpu.matmul %162, %163, %cst_77 {dimension_numbers = #tpu.dot_dimension_numbers<[1], [0], [0], [1], [0, 0, 1, 1], [], []>} : vector<16x32xbf16>, vector<32x32xbf16>, vector<16x32xf32> -> vector<16x32xf32>
    %165 = arith.addf %1, %164 : vector<16x32xf32>
    %c0_78 = arith.constant 0 : index
    %c0_79 = arith.constant 0 : index
    %166 = vector.load %arg8[%c0_78, %c0_79] : memref<1x32xf32, #tpu.memory_space<vmem>>, vector<1x32xf32>
    %167 = vector.broadcast %166 : vector<1x32xf32> to vector<16x32xf32>
    %168 = arith.addf %165, %167 : vector<16x32xf32>
    %c0_80 = arith.constant 0 : index
    %c0_81 = arith.constant 0 : index
    %c0_82 = arith.constant 0 : index
    %169 = vector.load %arg9[%c0_80, %c0_81, %c0_82] : memref<1x16x32xf32, #tpu.memory_space<vmem>>, vector<1x16x32xf32>
    %170 = vector.shape_cast %169 : vector<1x16x32xf32> to vector<16x32xf32>
    %171 = vector.shape_cast %168 : vector<16x32xf32> to vector<1x16x32xf32>
    tpu.vector_store %arg9[%c0_80, %c0_81, %c0_82], %171 {strides = array<i32>} : memref<1x16x32xf32, #tpu.memory_space<vmem>>, vector<1x16x32xf32>,
    return
  }
  func.func @transform_0(%arg0: i32) -> (i32, i32, i32) {
    %c0_i32 = arith.constant 0 : i32
    %c0_i32_0 = arith.constant 0 : i32
    %c0_i32_1 = arith.constant 0 : i32
    return %arg0, %c0_i32, %c0_i32_0 : i32, i32, i32
  }
  func.func @transform_1(%arg0: i32) -> (i32, i32, i32) {
    %c0_i32 = arith.constant 0 : i32
    %c0_i32_0 = arith.constant 0 : i32
    %c0_i32_1 = arith.constant 0 : i32
    return %arg0, %c0_i32, %c0_i32_0 : i32, i32, i32
  }
  func.func @transform_2(%arg0: i32) -> (i32, i32) {
    %c0_i32 = arith.constant 0 : i32
    %c0_i32_0 = arith.constant 0 : i32
    %c0_i32_1 = arith.constant 0 : i32
    return %c0_i32, %c0_i32_0 : i32, i32
  }
  func.func @transform_3(%arg0: i32) -> (i32, i32) {
    %c0_i32 = arith.constant 0 : i32
    %c0_i32_0 = arith.constant 0 : i32
    %c0_i32_1 = arith.constant 0 : i32
    return %c0_i32, %c0_i32_0 : i32, i32
  }
  func.func @transform_4(%arg0: i32) -> (i32, i32) {
    %c0_i32 = arith.constant 0 : i32
    %c0_i32_0 = arith.constant 0 : i32
    %c0_i32_1 = arith.constant 0 : i32
    return %c0_i32, %c0_i32_0 : i32, i32
  }
  func.func @transform_5(%arg0: i32) -> (i32, i32) {
    %c0_i32 = arith.constant 0 : i32
    %c0_i32_0 = arith.constant 0 : i32
    %c0_i32_1 = arith.constant 0 : i32
    return %c0_i32, %c0_i32_0 : i32, i32
  }
  func.func @transform_6(%arg0: i32) -> (i32, i32) {
    %c0_i32 = arith.constant 0 : i32
    %c0_i32_0 = arith.constant 0 : i32
    %c0_i32_1 = arith.constant 0 : i32
    return %c0_i32, %c0_i32_0 : i32, i32
  }
  func.func @transform_7(%arg0: i32) -> (i32, i32) {
    %c0_i32 = arith.constant 0 : i32
    %c0_i32_0 = arith.constant 0 : i32
    %c0_i32_1 = arith.constant 0 : i32
    return %c0_i32, %c0_i32_0 : i32, i32
  }
  func.func @transform_8(%arg0: i32) -> (i32, i32, i32) {
    %c0_i32 = arith.constant 0 : i32
    %c0_i32_0 = arith.constant 0 : i32
    %c0_i32_1 = arith.constant 0 : i32
    return %arg0, %c0_i32, %c0_i32_0 : i32, i32, i32
  }
}

module attributes {stable_mosaic.version = 11 : i64} {
  func.func @_conv_module_kernel(%arg0: i32, %arg1: memref<1x16x32xf32, #tpu.memory_space<vmem>>, %arg2: memref<1x16x1xf32, #tpu.memory_space<vmem>>, %arg3: memref<1x32xf32, #tpu.memory_space<vmem>>, %arg4: memref<1x32xf32, #tpu.memory_space<vmem>>, %arg5: memref<32x32xbf16, #tpu.memory_space<vmem>>, %arg6: memref<1x32xf32, #tpu.memory_space<vmem>>, %arg7: memref<32x32xbf16, #tpu.memory_space<vmem>>, %arg8: memref<1x32xf32, #tpu.memory_space<vmem>>, %arg9: memref<7x32xf32, #tpu.memory_space<vmem>>, %arg10: memref<1x32xf32, #tpu.memory_space<vmem>>, %arg11: memref<1x32xf32, #tpu.memory_space<vmem>>, %arg12: memref<1x32xf32, #tpu.memory_space<vmem>>, %arg13: memref<32x32xbf16, #tpu.memory_space<vmem>>, %arg14: memref<1x32xf32, #tpu.memory_space<vmem>>, %arg15: memref<1x16x32xf32, #tpu.memory_space<vmem>>, %arg16: memref<22x32xf32, #tpu.memory_space<vmem>>) attributes {dimension_semantics = [#tpu.dimension_semantics<parallel>], iteration_bounds = array<i64: 2>, scalar_prefetch = 0 : i64, scratch_operands = 1 : i64, tpu.core_type = #tpu.core_type<tc>, window_params = [{transform_indices = @transform_0, window_bounds = array<i64: 1, 16, 32>}, {transform_indices = @transform_1, window_bounds = array<i64: 1, 16, 1>}, {pipeline_mode = #tpu.pipeline_mode<synchronous>, transform_indices = @transform_2, window_bounds = array<i64: 1, 32>}, {pipeline_mode = #tpu.pipeline_mode<synchronous>, transform_indices = @transform_3, window_bounds = array<i64: 1, 32>}, {pipeline_mode = #tpu.pipeline_mode<synchronous>, transform_indices = @transform_4, window_bounds = array<i64: 32, 32>}, {pipeline_mode = #tpu.pipeline_mode<synchronous>, transform_indices = @transform_5, window_bounds = array<i64: 1, 32>}, {pipeline_mode = #tpu.pipeline_mode<synchronous>, transform_indices = @transform_6, window_bounds = array<i64: 32, 32>}, {pipeline_mode = #tpu.pipeline_mode<synchronous>, transform_indices = @transform_7, window_bounds = array<i64: 1, 32>}, {pipeline_mode = #tpu.pipeline_mode<synchronous>, transform_indices = @transform_8, window_bounds = array<i64: 7, 32>}, {pipeline_mode = #tpu.pipeline_mode<synchronous>, transform_indices = @transform_9, window_bounds = array<i64: 1, 32>}, {pipeline_mode = #tpu.pipeline_mode<synchronous>, transform_indices = @transform_10, window_bounds = array<i64: 1, 32>}, {pipeline_mode = #tpu.pipeline_mode<synchronous>, transform_indices = @transform_11, window_bounds = array<i64: 1, 32>}, {pipeline_mode = #tpu.pipeline_mode<synchronous>, transform_indices = @transform_12, window_bounds = array<i64: 32, 32>}, {pipeline_mode = #tpu.pipeline_mode<synchronous>, transform_indices = @transform_13, window_bounds = array<i64: 1, 32>}, {transform_indices = @transform_14, window_bounds = array<i64: 1, 16, 32>}]} {
    %c0 = arith.constant 0 : index
    %c0_0 = arith.constant 0 : index
    %c0_1 = arith.constant 0 : index
    %0 = vector.load %arg1[%c0, %c0_0, %c0_1] : memref<1x16x32xf32, #tpu.memory_space<vmem>>, vector<1x16x32xf32>
    %1 = vector.shape_cast %0 : vector<1x16x32xf32> to vector<16x32xf32>
    %c0_2 = arith.constant 0 : index
    %c0_3 = arith.constant 0 : index
    %c0_4 = arith.constant 0 : index
    %2 = vector.load %arg2[%c0_2, %c0_3, %c0_4] : memref<1x16x1xf32, #tpu.memory_space<vmem>>, vector<1x16x1xf32>
    %3 = vector.shape_cast %2 : vector<1x16x1xf32> to vector<16x1xf32>
    %c0_5 = arith.constant 0 : index
    %c0_6 = arith.constant 0 : index
    %4 = vector.load %arg3[%c0_5, %c0_6] : memref<1x32xf32, #tpu.memory_space<vmem>>, vector<1x32xf32>
    %c0_7 = arith.constant 0 : index
    %c0_8 = arith.constant 0 : index
    %5 = vector.load %arg4[%c0_7, %c0_8] : memref<1x32xf32, #tpu.memory_space<vmem>>, vector<1x32xf32>
    %cst = arith.constant dense<0.000000e+00> : vector<16xf32>
    %6 = vector.multi_reduction <add>, %1, %cst [1] : vector<16x32xf32> to vector<16xf32>
    %7 = vector.shape_cast %6 : vector<16xf32> to vector<16x1xf32>
    %cst_9 = arith.constant 3.200000e+01 : f32
    %8 = vector.broadcast %cst_9 : f32 to vector<16x1xf32>
    %9 = arith.divf %7, %8 : vector<16x1xf32>
    %10 = vector.broadcast %9 : vector<16x1xf32> to vector<16x32xf32>
    %11 = arith.subf %1, %10 : vector<16x32xf32>
    %12 = arith.mulf %11, %11 : vector<16x32xf32>
    %cst_10 = arith.constant dense<0.000000e+00> : vector<16xf32>
    %13 = vector.multi_reduction <add>, %12, %cst_10 [1] : vector<16x32xf32> to vector<16xf32>
    %14 = vector.shape_cast %13 : vector<16xf32> to vector<16x1xf32>
    %cst_11 = arith.constant 3.200000e+01 : f32
    %15 = vector.broadcast %cst_11 : f32 to vector<16x1xf32>
    %16 = arith.divf %14, %15 : vector<16x1xf32>
    %cst_12 = arith.constant 9.99999974E-6 : f32
    %17 = vector.broadcast %cst_12 : f32 to vector<16x1xf32>
    %18 = arith.addf %16, %17 : vector<16x1xf32>
    %19 = math.rsqrt %18 : vector<16x1xf32>
    %20 = vector.broadcast %19 : vector<16x1xf32> to vector<16x32xf32>
    %21 = arith.mulf %11, %20 : vector<16x32xf32>
    %22 = vector.broadcast %4 : vector<1x32xf32> to vector<16x32xf32>
    %23 = arith.mulf %21, %22 : vector<16x32xf32>
    %24 = vector.broadcast %5 : vector<1x32xf32> to vector<16x32xf32>
    %25 = arith.addf %23, %24 : vector<16x32xf32>
    %c0_13 = arith.constant 0 : index
    %c0_14 = arith.constant 0 : index
    %26 = vector.load %arg5[%c0_13, %c0_14] : memref<32x32xbf16, #tpu.memory_space<vmem>>, vector<32x32xbf16>
    %27 = arith.truncf %25 : vector<16x32xf32> to vector<16x32xbf16>
    %cst_15 = arith.constant dense<0.000000e+00> : vector<16x32xf32>
    %28 = tpu.matmul %27, %26, %cst_15 {dimension_numbers = #tpu.dot_dimension_numbers<[1], [0], [0], [1], [0, 0, 1, 1], [], []>} : vector<16x32xbf16>, vector<32x32xbf16>, vector<16x32xf32> -> vector<16x32xf32>
    %c0_16 = arith.constant 0 : index
    %c0_17 = arith.constant 0 : index
    %29 = vector.load %arg6[%c0_16, %c0_17] : memref<1x32xf32, #tpu.memory_space<vmem>>, vector<1x32xf32>
    %30 = vector.broadcast %29 : vector<1x32xf32> to vector<16x32xf32>
    %31 = arith.addf %28, %30 : vector<16x32xf32>
    %c0_18 = arith.constant 0 : index
    %c0_19 = arith.constant 0 : index
    %32 = vector.load %arg7[%c0_18, %c0_19] : memref<32x32xbf16, #tpu.memory_space<vmem>>, vector<32x32xbf16>
    %33 = arith.truncf %25 : vector<16x32xf32> to vector<16x32xbf16>
    %cst_20 = arith.constant dense<0.000000e+00> : vector<16x32xf32>
    %34 = tpu.matmul %33, %32, %cst_20 {dimension_numbers = #tpu.dot_dimension_numbers<[1], [0], [0], [1], [0, 0, 1, 1], [], []>} : vector<16x32xbf16>, vector<32x32xbf16>, vector<16x32xf32> -> vector<16x32xf32>
    %c0_21 = arith.constant 0 : index
    %c0_22 = arith.constant 0 : index
    %35 = vector.load %arg8[%c0_21, %c0_22] : memref<1x32xf32, #tpu.memory_space<vmem>>, vector<1x32xf32>
    %36 = vector.broadcast %35 : vector<1x32xf32> to vector<16x32xf32>
    %37 = arith.addf %34, %36 : vector<16x32xf32>
    %cst_23 = arith.constant 5.000000e-01 : f32
    %38 = vector.broadcast %cst_23 : f32 to vector<16x32xf32>
    %39 = arith.mulf %38, %37 : vector<16x32xf32>
    %40 = math.tanh %39 : vector<16x32xf32>
    %cst_24 = arith.constant 1.000000e+00 : f32
    %41 = vector.broadcast %cst_24 : f32 to vector<16x32xf32>
    %42 = arith.addf %41, %40 : vector<16x32xf32>
    %cst_25 = arith.constant 5.000000e-01 : f32
    %43 = vector.broadcast %cst_25 : f32 to vector<16x32xf32>
    %44 = arith.mulf %43, %42 : vector<16x32xf32>
    %45 = arith.mulf %31, %44 : vector<16x32xf32>
    %46 = vector.broadcast %3 : vector<16x1xf32> to vector<16x32xf32>
    %47 = arith.mulf %45, %46 : vector<16x32xf32>
    %cst_26 = arith.constant 0.000000e+00 : f32
    %48 = vector.broadcast %cst_26 : f32 to vector<3x32xf32>
    %c0_27 = arith.constant 0 : index
    %c0_28 = arith.constant 0 : index
    %49 = vector.load %arg16[%c0_27, %c0_28] : memref<22x32xf32, #tpu.memory_space<vmem>>, vector<3x32xf32>
    tpu.vector_store %arg16[%c0_27, %c0_28], %48 {strides = array<i32>} : memref<22x32xf32, #tpu.memory_space<vmem>>, vector<3x32xf32>,
    %cst_29 = arith.constant 0.000000e+00 : f32
    %50 = vector.broadcast %cst_29 : f32 to vector<3x32xf32>
    %c19 = arith.constant 19 : index
    %c0_30 = arith.constant 0 : index
    %51 = vector.load %arg16[%c19, %c0_30] : memref<22x32xf32, #tpu.memory_space<vmem>>, vector<3x32xf32>
    tpu.vector_store %arg16[%c19, %c0_30], %50 {strides = array<i32>} : memref<22x32xf32, #tpu.memory_space<vmem>>, vector<3x32xf32>,
    %c3 = arith.constant 3 : index
    %c0_31 = arith.constant 0 : index
    %52 = vector.load %arg16[%c3, %c0_31] : memref<22x32xf32, #tpu.memory_space<vmem>>, vector<16x32xf32>
    tpu.vector_store %arg16[%c3, %c0_31], %47 {strides = array<i32>} : memref<22x32xf32, #tpu.memory_space<vmem>>, vector<16x32xf32>,
    %cst_32 = arith.constant 0.000000e+00 : f32
    %53 = vector.broadcast %cst_32 : f32 to vector<16x32xf32>
    %c0_33 = arith.constant 0 : index
    %c0_34 = arith.constant 0 : index
    %54 = vector.load %arg16[%c0_33, %c0_34] : memref<22x32xf32, #tpu.memory_space<vmem>>, vector<16x32xf32>
    %c0_35 = arith.constant 0 : index
    %c0_36 = arith.constant 0 : index
    %55 = vector.load %arg9[%c0_35, %c0_36] : memref<7x32xf32, #tpu.memory_space<vmem>>, vector<1x32xf32>
    %56 = vector.broadcast %55 : vector<1x32xf32> to vector<16x32xf32>
    %57 = arith.mulf %54, %56 : vector<16x32xf32>
    %58 = arith.addf %53, %57 : vector<16x32xf32>
    %c1 = arith.constant 1 : index
    %c0_37 = arith.constant 0 : index
    %59 = vector.load %arg16[%c1, %c0_37] : memref<22x32xf32, #tpu.memory_space<vmem>>, vector<16x32xf32>
    %c1_38 = arith.constant 1 : index
    %c0_39 = arith.constant 0 : index
    %60 = vector.load %arg9[%c1_38, %c0_39] : memref<7x32xf32, #tpu.memory_space<vmem>>, vector<1x32xf32>
    %61 = vector.broadcast %60 : vector<1x32xf32> to vector<16x32xf32>
    %62 = arith.mulf %59, %61 : vector<16x32xf32>
    %63 = arith.addf %58, %62 : vector<16x32xf32>
    %c2 = arith.constant 2 : index
    %c0_40 = arith.constant 0 : index
    %64 = vector.load %arg16[%c2, %c0_40] : memref<22x32xf32, #tpu.memory_space<vmem>>, vector<16x32xf32>
    %c2_41 = arith.constant 2 : index
    %c0_42 = arith.constant 0 : index
    %65 = vector.load %arg9[%c2_41, %c0_42] : memref<7x32xf32, #tpu.memory_space<vmem>>, vector<1x32xf32>
    %66 = vector.broadcast %65 : vector<1x32xf32> to vector<16x32xf32>
    %67 = arith.mulf %64, %66 : vector<16x32xf32>
    %68 = arith.addf %63, %67 : vector<16x32xf32>
    %c3_43 = arith.constant 3 : index
    %c0_44 = arith.constant 0 : index
    %69 = vector.load %arg16[%c3_43, %c0_44] : memref<22x32xf32, #tpu.memory_space<vmem>>, vector<16x32xf32>
    %c3_45 = arith.constant 3 : index
    %c0_46 = arith.constant 0 : index
    %70 = vector.load %arg9[%c3_45, %c0_46] : memref<7x32xf32, #tpu.memory_space<vmem>>, vector<1x32xf32>
    %71 = vector.broadcast %70 : vector<1x32xf32> to vector<16x32xf32>
    %72 = arith.mulf %69, %71 : vector<16x32xf32>
    %73 = arith.addf %68, %72 : vector<16x32xf32>
    %c4 = arith.constant 4 : index
    %c0_47 = arith.constant 0 : index
    %74 = vector.load %arg16[%c4, %c0_47] : memref<22x32xf32, #tpu.memory_space<vmem>>, vector<16x32xf32>
    %c4_48 = arith.constant 4 : index
    %c0_49 = arith.constant 0 : index
    %75 = vector.load %arg9[%c4_48, %c0_49] : memref<7x32xf32, #tpu.memory_space<vmem>>, vector<1x32xf32>
    %76 = vector.broadcast %75 : vector<1x32xf32> to vector<16x32xf32>
    %77 = arith.mulf %74, %76 : vector<16x32xf32>
    %78 = arith.addf %73, %77 : vector<16x32xf32>
    %c5 = arith.constant 5 : index
    %c0_50 = arith.constant 0 : index
    %79 = vector.load %arg16[%c5, %c0_50] : memref<22x32xf32, #tpu.memory_space<vmem>>, vector<16x32xf32>
    %c5_51 = arith.constant 5 : index
    %c0_52 = arith.constant 0 : index
    %80 = vector.load %arg9[%c5_51, %c0_52] : memref<7x32xf32, #tpu.memory_space<vmem>>, vector<1x32xf32>
    %81 = vector.broadcast %80 : vector<1x32xf32> to vector<16x32xf32>
    %82 = arith.mulf %79, %81 : vector<16x32xf32>
    %83 = arith.addf %78, %82 : vector<16x32xf32>
    %c6 = arith.constant 6 : index
    %c0_53 = arith.constant 0 : index
    %84 = vector.load %arg16[%c6, %c0_53] : memref<22x32xf32, #tpu.memory_space<vmem>>, vector<16x32xf32>
    %c6_54 = arith.constant 6 : index
    %c0_55 = arith.constant 0 : index
    %85 = vector.load %arg9[%c6_54, %c0_55] : memref<7x32xf32, #tpu.memory_space<vmem>>, vector<1x32xf32>
    %86 = vector.broadcast %85 : vector<1x32xf32> to vector<16x32xf32>
    %87 = arith.mulf %84, %86 : vector<16x32xf32>
    %88 = arith.addf %83, %87 : vector<16x32xf32>
    %c0_56 = arith.constant 0 : index
    %c0_57 = arith.constant 0 : index
    %89 = vector.load %arg10[%c0_56, %c0_57] : memref<1x32xf32, #tpu.memory_space<vmem>>, vector<1x32xf32>
    %90 = vector.broadcast %89 : vector<1x32xf32> to vector<16x32xf32>
    %91 = arith.addf %88, %90 : vector<16x32xf32>
    %c0_58 = arith.constant 0 : index
    %c0_59 = arith.constant 0 : index
    %92 = vector.load %arg11[%c0_58, %c0_59] : memref<1x32xf32, #tpu.memory_space<vmem>>, vector<1x32xf32>
    %93 = vector.broadcast %92 : vector<1x32xf32> to vector<16x32xf32>
    %94 = arith.mulf %91, %93 : vector<16x32xf32>
    %c0_60 = arith.constant 0 : index
    %c0_61 = arith.constant 0 : index
    %95 = vector.load %arg12[%c0_60, %c0_61] : memref<1x32xf32, #tpu.memory_space<vmem>>, vector<1x32xf32>
    %96 = vector.broadcast %95 : vector<1x32xf32> to vector<16x32xf32>
    %97 = arith.addf %94, %96 : vector<16x32xf32>
    %cst_62 = arith.constant 5.000000e-01 : f32
    %98 = vector.broadcast %cst_62 : f32 to vector<16x32xf32>
    %99 = arith.mulf %98, %97 : vector<16x32xf32>
    %100 = math.tanh %99 : vector<16x32xf32>
    %cst_63 = arith.constant 1.000000e+00 : f32
    %101 = vector.broadcast %cst_63 : f32 to vector<16x32xf32>
    %102 = arith.addf %101, %100 : vector<16x32xf32>
    %cst_64 = arith.constant 5.000000e-01 : f32
    %103 = vector.broadcast %cst_64 : f32 to vector<16x32xf32>
    %104 = arith.mulf %103, %102 : vector<16x32xf32>
    %105 = arith.mulf %97, %104 : vector<16x32xf32>
    %c0_65 = arith.constant 0 : index
    %c0_66 = arith.constant 0 : index
    %106 = vector.load %arg13[%c0_65, %c0_66] : memref<32x32xbf16, #tpu.memory_space<vmem>>, vector<32x32xbf16>
    %107 = arith.truncf %105 : vector<16x32xf32> to vector<16x32xbf16>
    %cst_67 = arith.constant dense<0.000000e+00> : vector<16x32xf32>
    %108 = tpu.matmul %107, %106, %cst_67 {dimension_numbers = #tpu.dot_dimension_numbers<[1], [0], [0], [1], [0, 0, 1, 1], [], []>} : vector<16x32xbf16>, vector<32x32xbf16>, vector<16x32xf32> -> vector<16x32xf32>
    %c0_68 = arith.constant 0 : index
    %c0_69 = arith.constant 0 : index
    %109 = vector.load %arg14[%c0_68, %c0_69] : memref<1x32xf32, #tpu.memory_space<vmem>>, vector<1x32xf32>
    %110 = vector.broadcast %109 : vector<1x32xf32> to vector<16x32xf32>
    %111 = arith.addf %108, %110 : vector<16x32xf32>
    %112 = arith.addf %1, %111 : vector<16x32xf32>
    %c0_70 = arith.constant 0 : index
    %c0_71 = arith.constant 0 : index
    %c0_72 = arith.constant 0 : index
    %113 = vector.load %arg15[%c0_70, %c0_71, %c0_72] : memref<1x16x32xf32, #tpu.memory_space<vmem>>, vector<1x16x32xf32>
    %114 = vector.shape_cast %113 : vector<1x16x32xf32> to vector<16x32xf32>
    %115 = vector.shape_cast %112 : vector<16x32xf32> to vector<1x16x32xf32>
    tpu.vector_store %arg15[%c0_70, %c0_71, %c0_72], %115 {strides = array<i32>} : memref<1x16x32xf32, #tpu.memory_space<vmem>>, vector<1x16x32xf32>,
    return
  }
  func.func @transform_0(%arg0: i32) -> (i32, i32, i32) {
    %c0_i32 = arith.constant 0 : i32
    %c0_i32_0 = arith.constant 0 : i32
    %c0_i32_1 = arith.constant 0 : i32
    return %arg0, %c0_i32, %c0_i32_0 : i32, i32, i32
  }
  func.func @transform_1(%arg0: i32) -> (i32, i32, i32) {
    %c0_i32 = arith.constant 0 : i32
    %c0_i32_0 = arith.constant 0 : i32
    %c0_i32_1 = arith.constant 0 : i32
    return %arg0, %c0_i32, %c0_i32_0 : i32, i32, i32
  }
  func.func @transform_2(%arg0: i32) -> (i32, i32) {
    %c0_i32 = arith.constant 0 : i32
    %c0_i32_0 = arith.constant 0 : i32
    %c0_i32_1 = arith.constant 0 : i32
    return %c0_i32, %c0_i32_0 : i32, i32
  }
  func.func @transform_3(%arg0: i32) -> (i32, i32) {
    %c0_i32 = arith.constant 0 : i32
    %c0_i32_0 = arith.constant 0 : i32
    %c0_i32_1 = arith.constant 0 : i32
    return %c0_i32, %c0_i32_0 : i32, i32
  }
  func.func @transform_4(%arg0: i32) -> (i32, i32) {
    %c0_i32 = arith.constant 0 : i32
    %c0_i32_0 = arith.constant 0 : i32
    %c0_i32_1 = arith.constant 0 : i32
    return %c0_i32, %c0_i32_0 : i32, i32
  }
  func.func @transform_5(%arg0: i32) -> (i32, i32) {
    %c0_i32 = arith.constant 0 : i32
    %c0_i32_0 = arith.constant 0 : i32
    %c0_i32_1 = arith.constant 0 : i32
    return %c0_i32, %c0_i32_0 : i32, i32
  }
  func.func @transform_6(%arg0: i32) -> (i32, i32) {
    %c0_i32 = arith.constant 0 : i32
    %c0_i32_0 = arith.constant 0 : i32
    %c0_i32_1 = arith.constant 0 : i32
    return %c0_i32, %c0_i32_0 : i32, i32
  }
  func.func @transform_7(%arg0: i32) -> (i32, i32) {
    %c0_i32 = arith.constant 0 : i32
    %c0_i32_0 = arith.constant 0 : i32
    %c0_i32_1 = arith.constant 0 : i32
    return %c0_i32, %c0_i32_0 : i32, i32
  }
  func.func @transform_8(%arg0: i32) -> (i32, i32) {
    %c0_i32 = arith.constant 0 : i32
    %c0_i32_0 = arith.constant 0 : i32
    %c0_i32_1 = arith.constant 0 : i32
    return %c0_i32, %c0_i32_0 : i32, i32
  }
  func.func @transform_9(%arg0: i32) -> (i32, i32) {
    %c0_i32 = arith.constant 0 : i32
    %c0_i32_0 = arith.constant 0 : i32
    %c0_i32_1 = arith.constant 0 : i32
    return %c0_i32, %c0_i32_0 : i32, i32
  }
  func.func @transform_10(%arg0: i32) -> (i32, i32) {
    %c0_i32 = arith.constant 0 : i32
    %c0_i32_0 = arith.constant 0 : i32
    %c0_i32_1 = arith.constant 0 : i32
    return %c0_i32, %c0_i32_0 : i32, i32
  }
  func.func @transform_11(%arg0: i32) -> (i32, i32) {
    %c0_i32 = arith.constant 0 : i32
    %c0_i32_0 = arith.constant 0 : i32
    %c0_i32_1 = arith.constant 0 : i32
    return %c0_i32, %c0_i32_0 : i32, i32
  }
  func.func @transform_12(%arg0: i32) -> (i32, i32) {
    %c0_i32 = arith.constant 0 : i32
    %c0_i32_0 = arith.constant 0 : i32
    %c0_i32_1 = arith.constant 0 : i32
    return %c0_i32, %c0_i32_0 : i32, i32
  }
  func.func @transform_13(%arg0: i32) -> (i32, i32) {
    %c0_i32 = arith.constant 0 : i32
    %c0_i32_0 = arith.constant 0 : i32
    %c0_i32_1 = arith.constant 0 : i32
    return %c0_i32, %c0_i32_0 : i32, i32
  }
  func.func @transform_14(%arg0: i32) -> (i32, i32, i32) {
    %c0_i32 = arith.constant 0 : i32
    %c0_i32_0 = arith.constant 0 : i32
    %c0_i32_1 = arith.constant 0 : i32
    return %arg0, %c0_i32, %c0_i32_0 : i32, i32, i32
  }
}

module attributes {stable_mosaic.version = 11 : i64} {
  func.func @_ffn_kernel(%arg0: i32, %arg1: memref<16x32xf32, #tpu.memory_space<vmem>>, %arg2: memref<1x32xf32, #tpu.memory_space<vmem>>, %arg3: memref<1x32xf32, #tpu.memory_space<vmem>>, %arg4: memref<32x64xbf16, #tpu.memory_space<vmem>>, %arg5: memref<1x64xf32, #tpu.memory_space<vmem>>, %arg6: memref<64x32xbf16, #tpu.memory_space<vmem>>, %arg7: memref<1x32xf32, #tpu.memory_space<vmem>>, %arg8: memref<1x32xf32, #tpu.memory_space<vmem>>, %arg9: memref<1x32xf32, #tpu.memory_space<vmem>>, %arg10: memref<16x32xf32, #tpu.memory_space<vmem>>) attributes {dimension_semantics = [#tpu.dimension_semantics<parallel>], iteration_bounds = array<i64: 2>, scalar_prefetch = 0 : i64, scratch_operands = 0 : i64, tpu.core_type = #tpu.core_type<tc>, window_params = [{transform_indices = @transform_0, window_bounds = array<i64: 16, 32>}, {pipeline_mode = #tpu.pipeline_mode<synchronous>, transform_indices = @transform_1, window_bounds = array<i64: 1, 32>}, {pipeline_mode = #tpu.pipeline_mode<synchronous>, transform_indices = @transform_2, window_bounds = array<i64: 1, 32>}, {pipeline_mode = #tpu.pipeline_mode<synchronous>, transform_indices = @transform_3, window_bounds = array<i64: 32, 64>}, {pipeline_mode = #tpu.pipeline_mode<synchronous>, transform_indices = @transform_4, window_bounds = array<i64: 1, 64>}, {pipeline_mode = #tpu.pipeline_mode<synchronous>, transform_indices = @transform_5, window_bounds = array<i64: 64, 32>}, {pipeline_mode = #tpu.pipeline_mode<synchronous>, transform_indices = @transform_6, window_bounds = array<i64: 1, 32>}, {pipeline_mode = #tpu.pipeline_mode<synchronous>, transform_indices = @transform_7, window_bounds = array<i64: 1, 32>}, {pipeline_mode = #tpu.pipeline_mode<synchronous>, transform_indices = @transform_8, window_bounds = array<i64: 1, 32>}, {transform_indices = @transform_9, window_bounds = array<i64: 16, 32>}]} {
    %c0 = arith.constant 0 : index
    %c0_0 = arith.constant 0 : index
    %0 = vector.load %arg1[%c0, %c0_0] : memref<16x32xf32, #tpu.memory_space<vmem>>, vector<16x32xf32>
    %c0_1 = arith.constant 0 : index
    %c0_2 = arith.constant 0 : index
    %1 = vector.load %arg2[%c0_1, %c0_2] : memref<1x32xf32, #tpu.memory_space<vmem>>, vector<1x32xf32>
    %c0_3 = arith.constant 0 : index
    %c0_4 = arith.constant 0 : index
    %2 = vector.load %arg3[%c0_3, %c0_4] : memref<1x32xf32, #tpu.memory_space<vmem>>, vector<1x32xf32>
    %cst = arith.constant dense<0.000000e+00> : vector<16xf32>
    %3 = vector.multi_reduction <add>, %0, %cst [1] : vector<16x32xf32> to vector<16xf32>
    %4 = vector.shape_cast %3 : vector<16xf32> to vector<16x1xf32>
    %cst_5 = arith.constant 3.200000e+01 : f32
    %5 = vector.broadcast %cst_5 : f32 to vector<16x1xf32>
    %6 = arith.divf %4, %5 : vector<16x1xf32>
    %7 = vector.broadcast %6 : vector<16x1xf32> to vector<16x32xf32>
    %8 = arith.subf %0, %7 : vector<16x32xf32>
    %9 = arith.mulf %8, %8 : vector<16x32xf32>
    %cst_6 = arith.constant dense<0.000000e+00> : vector<16xf32>
    %10 = vector.multi_reduction <add>, %9, %cst_6 [1] : vector<16x32xf32> to vector<16xf32>
    %11 = vector.shape_cast %10 : vector<16xf32> to vector<16x1xf32>
    %cst_7 = arith.constant 3.200000e+01 : f32
    %12 = vector.broadcast %cst_7 : f32 to vector<16x1xf32>
    %13 = arith.divf %11, %12 : vector<16x1xf32>
    %cst_8 = arith.constant 9.99999974E-6 : f32
    %14 = vector.broadcast %cst_8 : f32 to vector<16x1xf32>
    %15 = arith.addf %13, %14 : vector<16x1xf32>
    %16 = math.rsqrt %15 : vector<16x1xf32>
    %17 = vector.broadcast %16 : vector<16x1xf32> to vector<16x32xf32>
    %18 = arith.mulf %8, %17 : vector<16x32xf32>
    %19 = vector.broadcast %1 : vector<1x32xf32> to vector<16x32xf32>
    %20 = arith.mulf %18, %19 : vector<16x32xf32>
    %21 = vector.broadcast %2 : vector<1x32xf32> to vector<16x32xf32>
    %22 = arith.addf %20, %21 : vector<16x32xf32>
    %c0_9 = arith.constant 0 : index
    %c0_10 = arith.constant 0 : index
    %23 = vector.load %arg4[%c0_9, %c0_10] : memref<32x64xbf16, #tpu.memory_space<vmem>>, vector<32x64xbf16>
    %24 = arith.truncf %22 : vector<16x32xf32> to vector<16x32xbf16>
    %cst_11 = arith.constant dense<0.000000e+00> : vector<16x64xf32>
    %25 = tpu.matmul %24, %23, %cst_11 {dimension_numbers = #tpu.dot_dimension_numbers<[1], [0], [0], [1], [0, 0, 1, 1], [], []>} : vector<16x32xbf16>, vector<32x64xbf16>, vector<16x64xf32> -> vector<16x64xf32>
    %c0_12 = arith.constant 0 : index
    %c0_13 = arith.constant 0 : index
    %26 = vector.load %arg5[%c0_12, %c0_13] : memref<1x64xf32, #tpu.memory_space<vmem>>, vector<1x64xf32>
    %27 = vector.broadcast %26 : vector<1x64xf32> to vector<16x64xf32>
    %28 = arith.addf %25, %27 : vector<16x64xf32>
    %cst_14 = arith.constant 5.000000e-01 : f32
    %29 = vector.broadcast %cst_14 : f32 to vector<16x64xf32>
    %30 = arith.mulf %29, %28 : vector<16x64xf32>
    %31 = math.tanh %30 : vector<16x64xf32>
    %cst_15 = arith.constant 1.000000e+00 : f32
    %32 = vector.broadcast %cst_15 : f32 to vector<16x64xf32>
    %33 = arith.addf %32, %31 : vector<16x64xf32>
    %cst_16 = arith.constant 5.000000e-01 : f32
    %34 = vector.broadcast %cst_16 : f32 to vector<16x64xf32>
    %35 = arith.mulf %34, %33 : vector<16x64xf32>
    %36 = arith.mulf %28, %35 : vector<16x64xf32>
    %c0_17 = arith.constant 0 : index
    %c0_18 = arith.constant 0 : index
    %37 = vector.load %arg6[%c0_17, %c0_18] : memref<64x32xbf16, #tpu.memory_space<vmem>>, vector<64x32xbf16>
    %38 = arith.truncf %36 : vector<16x64xf32> to vector<16x64xbf16>
    %cst_19 = arith.constant dense<0.000000e+00> : vector<16x32xf32>
    %39 = tpu.matmul %38, %37, %cst_19 {dimension_numbers = #tpu.dot_dimension_numbers<[1], [0], [0], [1], [0, 0, 1, 1], [], []>} : vector<16x64xbf16>, vector<64x32xbf16>, vector<16x32xf32> -> vector<16x32xf32>
    %c0_20 = arith.constant 0 : index
    %c0_21 = arith.constant 0 : index
    %40 = vector.load %arg7[%c0_20, %c0_21] : memref<1x32xf32, #tpu.memory_space<vmem>>, vector<1x32xf32>
    %41 = vector.broadcast %40 : vector<1x32xf32> to vector<16x32xf32>
    %42 = arith.addf %39, %41 : vector<16x32xf32>
    %cst_22 = arith.constant 5.000000e-01 : f32
    %43 = vector.broadcast %cst_22 : f32 to vector<16x32xf32>
    %44 = arith.mulf %43, %42 : vector<16x32xf32>
    %45 = arith.addf %0, %44 : vector<16x32xf32>
    %c0_23 = arith.constant 0 : index
    %c0_24 = arith.constant 0 : index
    %46 = vector.load %arg8[%c0_23, %c0_24] : memref<1x32xf32, #tpu.memory_space<vmem>>, vector<1x32xf32>
    %c0_25 = arith.constant 0 : index
    %c0_26 = arith.constant 0 : index
    %47 = vector.load %arg9[%c0_25, %c0_26] : memref<1x32xf32, #tpu.memory_space<vmem>>, vector<1x32xf32>
    %cst_27 = arith.constant dense<0.000000e+00> : vector<16xf32>
    %48 = vector.multi_reduction <add>, %45, %cst_27 [1] : vector<16x32xf32> to vector<16xf32>
    %49 = vector.shape_cast %48 : vector<16xf32> to vector<16x1xf32>
    %cst_28 = arith.constant 3.200000e+01 : f32
    %50 = vector.broadcast %cst_28 : f32 to vector<16x1xf32>
    %51 = arith.divf %49, %50 : vector<16x1xf32>
    %52 = vector.broadcast %51 : vector<16x1xf32> to vector<16x32xf32>
    %53 = arith.subf %45, %52 : vector<16x32xf32>
    %54 = arith.mulf %53, %53 : vector<16x32xf32>
    %cst_29 = arith.constant dense<0.000000e+00> : vector<16xf32>
    %55 = vector.multi_reduction <add>, %54, %cst_29 [1] : vector<16x32xf32> to vector<16xf32>
    %56 = vector.shape_cast %55 : vector<16xf32> to vector<16x1xf32>
    %cst_30 = arith.constant 3.200000e+01 : f32
    %57 = vector.broadcast %cst_30 : f32 to vector<16x1xf32>
    %58 = arith.divf %56, %57 : vector<16x1xf32>
    %cst_31 = arith.constant 9.99999974E-6 : f32
    %59 = vector.broadcast %cst_31 : f32 to vector<16x1xf32>
    %60 = arith.addf %58, %59 : vector<16x1xf32>
    %61 = math.rsqrt %60 : vector<16x1xf32>
    %62 = vector.broadcast %61 : vector<16x1xf32> to vector<16x32xf32>
    %63 = arith.mulf %53, %62 : vector<16x32xf32>
    %64 = vector.broadcast %46 : vector<1x32xf32> to vector<16x32xf32>
    %65 = arith.mulf %63, %64 : vector<16x32xf32>
    %66 = vector.broadcast %47 : vector<1x32xf32> to vector<16x32xf32>
    %67 = arith.addf %65, %66 : vector<16x32xf32>
    %c0_32 = arith.constant 0 : index
    %c0_33 = arith.constant 0 : index
    %68 = vector.load %arg10[%c0_32, %c0_33] : memref<16x32xf32, #tpu.memory_space<vmem>>, vector<16x32xf32>
    tpu.vector_store %arg10[%c0_32, %c0_33], %67 {strides = array<i32>} : memref<16x32xf32, #tpu.memory_space<vmem>>, vector<16x32xf32>,
    return
  }
  func.func @transform_0(%arg0: i32) -> (i32, i32) {
    %c0_i32 = arith.constant 0 : i32
    %c0_i32_0 = arith.constant 0 : i32
    return %arg0, %c0_i32 : i32, i32
  }
  func.func @transform_1(%arg0: i32) -> (i32, i32) {
    %c0_i32 = arith.constant 0 : i32
    %c0_i32_0 = arith.constant 0 : i32
    %c0_i32_1 = arith.constant 0 : i32
    return %c0_i32, %c0_i32_0 : i32, i32
  }
  func.func @transform_2(%arg0: i32) -> (i32, i32) {
    %c0_i32 = arith.constant 0 : i32
    %c0_i32_0 = arith.constant 0 : i32
    %c0_i32_1 = arith.constant 0 : i32
    return %c0_i32, %c0_i32_0 : i32, i32
  }
  func.func @transform_3(%arg0: i32) -> (i32, i32) {
    %c0_i32 = arith.constant 0 : i32
    %c0_i32_0 = arith.constant 0 : i32
    %c0_i32_1 = arith.constant 0 : i32
    return %c0_i32, %c0_i32_0 : i32, i32
  }
  func.func @transform_4(%arg0: i32) -> (i32, i32) {
    %c0_i32 = arith.constant 0 : i32
    %c0_i32_0 = arith.constant 0 : i32
    %c0_i32_1 = arith.constant 0 : i32
    return %c0_i32, %c0_i32_0 : i32, i32
  }
  func.func @transform_5(%arg0: i32) -> (i32, i32) {
    %c0_i32 = arith.constant 0 : i32
    %c0_i32_0 = arith.constant 0 : i32
    %c0_i32_1 = arith.constant 0 : i32
    return %c0_i32, %c0_i32_0 : i32, i32
  }
  func.func @transform_6(%arg0: i32) -> (i32, i32) {
    %c0_i32 = arith.constant 0 : i32
    %c0_i32_0 = arith.constant 0 : i32
    %c0_i32_1 = arith.constant 0 : i32
    return %c0_i32, %c0_i32_0 : i32, i32
  }
  func.func @transform_7(%arg0: i32) -> (i32, i32) {
    %c0_i32 = arith.constant 0 : i32
    %c0_i32_0 = arith.constant 0 : i32
    %c0_i32_1 = arith.constant 0 : i32
    return %c0_i32, %c0_i32_0 : i32, i32
  }
  func.func @transform_8(%arg0: i32) -> (i32, i32) {
    %c0_i32 = arith.constant 0 : i32
    %c0_i32_0 = arith.constant 0 : i32
    %c0_i32_1 = arith.constant 0 : i32
    return %c0_i32, %c0_i32_0 : i32, i32
  }
  func.func @transform_9(%arg0: i32) -> (i32, i32) {
    %c0_i32 = arith.constant 0 : i32
    %c0_i32_0 = arith.constant 0 : i32
    return %arg0, %c0_i32 : i32, i32
  }
}

module attributes {stable_mosaic.version = 11 : i64} {
  func.func @_ffn_kernel(%arg0: i32, %arg1: memref<16x32xf32, #tpu.memory_space<vmem>>, %arg2: memref<1x32xf32, #tpu.memory_space<vmem>>, %arg3: memref<1x32xf32, #tpu.memory_space<vmem>>, %arg4: memref<32x64xbf16, #tpu.memory_space<vmem>>, %arg5: memref<1x64xf32, #tpu.memory_space<vmem>>, %arg6: memref<64x32xbf16, #tpu.memory_space<vmem>>, %arg7: memref<1x32xf32, #tpu.memory_space<vmem>>, %arg8: memref<1x32xf32, #tpu.memory_space<vmem>>, %arg9: memref<1x32xf32, #tpu.memory_space<vmem>>, %arg10: memref<16x32xf32, #tpu.memory_space<vmem>>) attributes {dimension_semantics = [#tpu.dimension_semantics<parallel>], iteration_bounds = array<i64: 2>, scalar_prefetch = 0 : i64, scratch_operands = 0 : i64, tpu.core_type = #tpu.core_type<tc>, window_params = [{transform_indices = @transform_0, window_bounds = array<i64: 16, 32>}, {pipeline_mode = #tpu.pipeline_mode<synchronous>, transform_indices = @transform_1, window_bounds = array<i64: 1, 32>}, {pipeline_mode = #tpu.pipeline_mode<synchronous>, transform_indices = @transform_2, window_bounds = array<i64: 1, 32>}, {pipeline_mode = #tpu.pipeline_mode<synchronous>, transform_indices = @transform_3, window_bounds = array<i64: 32, 64>}, {pipeline_mode = #tpu.pipeline_mode<synchronous>, transform_indices = @transform_4, window_bounds = array<i64: 1, 64>}, {pipeline_mode = #tpu.pipeline_mode<synchronous>, transform_indices = @transform_5, window_bounds = array<i64: 64, 32>}, {pipeline_mode = #tpu.pipeline_mode<synchronous>, transform_indices = @transform_6, window_bounds = array<i64: 1, 32>}, {pipeline_mode = #tpu.pipeline_mode<synchronous>, transform_indices = @transform_7, window_bounds = array<i64: 1, 32>}, {pipeline_mode = #tpu.pipeline_mode<synchronous>, transform_indices = @transform_8, window_bounds = array<i64: 1, 32>}, {transform_indices = @transform_9, window_bounds = array<i64: 16, 32>}]} {
    %c0 = arith.constant 0 : index
    %c0_0 = arith.constant 0 : index
    %0 = vector.load %arg1[%c0, %c0_0] : memref<16x32xf32, #tpu.memory_space<vmem>>, vector<16x32xf32>
    %c0_1 = arith.constant 0 : index
    %c0_2 = arith.constant 0 : index
    %1 = vector.load %arg2[%c0_1, %c0_2] : memref<1x32xf32, #tpu.memory_space<vmem>>, vector<1x32xf32>
    %c0_3 = arith.constant 0 : index
    %c0_4 = arith.constant 0 : index
    %2 = vector.load %arg3[%c0_3, %c0_4] : memref<1x32xf32, #tpu.memory_space<vmem>>, vector<1x32xf32>
    %cst = arith.constant dense<0.000000e+00> : vector<16xf32>
    %3 = vector.multi_reduction <add>, %0, %cst [1] : vector<16x32xf32> to vector<16xf32>
    %4 = vector.shape_cast %3 : vector<16xf32> to vector<16x1xf32>
    %cst_5 = arith.constant 3.200000e+01 : f32
    %5 = vector.broadcast %cst_5 : f32 to vector<16x1xf32>
    %6 = arith.divf %4, %5 : vector<16x1xf32>
    %7 = vector.broadcast %6 : vector<16x1xf32> to vector<16x32xf32>
    %8 = arith.subf %0, %7 : vector<16x32xf32>
    %9 = arith.mulf %8, %8 : vector<16x32xf32>
    %cst_6 = arith.constant dense<0.000000e+00> : vector<16xf32>
    %10 = vector.multi_reduction <add>, %9, %cst_6 [1] : vector<16x32xf32> to vector<16xf32>
    %11 = vector.shape_cast %10 : vector<16xf32> to vector<16x1xf32>
    %cst_7 = arith.constant 3.200000e+01 : f32
    %12 = vector.broadcast %cst_7 : f32 to vector<16x1xf32>
    %13 = arith.divf %11, %12 : vector<16x1xf32>
    %cst_8 = arith.constant 9.99999974E-6 : f32
    %14 = vector.broadcast %cst_8 : f32 to vector<16x1xf32>
    %15 = arith.addf %13, %14 : vector<16x1xf32>
    %16 = math.rsqrt %15 : vector<16x1xf32>
    %17 = vector.broadcast %16 : vector<16x1xf32> to vector<16x32xf32>
    %18 = arith.mulf %8, %17 : vector<16x32xf32>
    %19 = vector.broadcast %1 : vector<1x32xf32> to vector<16x32xf32>
    %20 = arith.mulf %18, %19 : vector<16x32xf32>
    %21 = vector.broadcast %2 : vector<1x32xf32> to vector<16x32xf32>
    %22 = arith.addf %20, %21 : vector<16x32xf32>
    %c0_9 = arith.constant 0 : index
    %c0_10 = arith.constant 0 : index
    %23 = vector.load %arg4[%c0_9, %c0_10] : memref<32x64xbf16, #tpu.memory_space<vmem>>, vector<32x64xbf16>
    %24 = arith.truncf %22 : vector<16x32xf32> to vector<16x32xbf16>
    %cst_11 = arith.constant dense<0.000000e+00> : vector<16x64xf32>
    %25 = tpu.matmul %24, %23, %cst_11 {dimension_numbers = #tpu.dot_dimension_numbers<[1], [0], [0], [1], [0, 0, 1, 1], [], []>} : vector<16x32xbf16>, vector<32x64xbf16>, vector<16x64xf32> -> vector<16x64xf32>
    %c0_12 = arith.constant 0 : index
    %c0_13 = arith.constant 0 : index
    %26 = vector.load %arg5[%c0_12, %c0_13] : memref<1x64xf32, #tpu.memory_space<vmem>>, vector<1x64xf32>
    %27 = vector.broadcast %26 : vector<1x64xf32> to vector<16x64xf32>
    %28 = arith.addf %25, %27 : vector<16x64xf32>
    %cst_14 = arith.constant 5.000000e-01 : f32
    %29 = vector.broadcast %cst_14 : f32 to vector<16x64xf32>
    %30 = arith.mulf %29, %28 : vector<16x64xf32>
    %31 = math.tanh %30 : vector<16x64xf32>
    %cst_15 = arith.constant 1.000000e+00 : f32
    %32 = vector.broadcast %cst_15 : f32 to vector<16x64xf32>
    %33 = arith.addf %32, %31 : vector<16x64xf32>
    %cst_16 = arith.constant 5.000000e-01 : f32
    %34 = vector.broadcast %cst_16 : f32 to vector<16x64xf32>
    %35 = arith.mulf %34, %33 : vector<16x64xf32>
    %36 = arith.mulf %28, %35 : vector<16x64xf32>
    %c0_17 = arith.constant 0 : index
    %c0_18 = arith.constant 0 : index
    %37 = vector.load %arg6[%c0_17, %c0_18] : memref<64x32xbf16, #tpu.memory_space<vmem>>, vector<64x32xbf16>
    %38 = arith.truncf %36 : vector<16x64xf32> to vector<16x64xbf16>
    %cst_19 = arith.constant dense<0.000000e+00> : vector<16x32xf32>
    %39 = tpu.matmul %38, %37, %cst_19 {dimension_numbers = #tpu.dot_dimension_numbers<[1], [0], [0], [1], [0, 0, 1, 1], [], []>} : vector<16x64xbf16>, vector<64x32xbf16>, vector<16x32xf32> -> vector<16x32xf32>
    %c0_20 = arith.constant 0 : index
    %c0_21 = arith.constant 0 : index
    %40 = vector.load %arg7[%c0_20, %c0_21] : memref<1x32xf32, #tpu.memory_space<vmem>>, vector<1x32xf32>
    %41 = vector.broadcast %40 : vector<1x32xf32> to vector<16x32xf32>
    %42 = arith.addf %39, %41 : vector<16x32xf32>
    %cst_22 = arith.constant 5.000000e-01 : f32
    %43 = vector.broadcast %cst_22 : f32 to vector<16x32xf32>
    %44 = arith.mulf %43, %42 : vector<16x32xf32>
    %45 = arith.addf %0, %44 : vector<16x32xf32>
    %c0_23 = arith.constant 0 : index
    %c0_24 = arith.constant 0 : index
    %46 = vector.load %arg10[%c0_23, %c0_24] : memref<16x32xf32, #tpu.memory_space<vmem>>, vector<16x32xf32>
    tpu.vector_store %arg10[%c0_23, %c0_24], %45 {strides = array<i32>} : memref<16x32xf32, #tpu.memory_space<vmem>>, vector<16x32xf32>,
    return
  }
  func.func @transform_0(%arg0: i32) -> (i32, i32) {
    %c0_i32 = arith.constant 0 : i32
    %c0_i32_0 = arith.constant 0 : i32
    return %arg0, %c0_i32 : i32, i32
  }
  func.func @transform_1(%arg0: i32) -> (i32, i32) {
    %c0_i32 = arith.constant 0 : i32
    %c0_i32_0 = arith.constant 0 : i32
    %c0_i32_1 = arith.constant 0 : i32
    return %c0_i32, %c0_i32_0 : i32, i32
  }
  func.func @transform_2(%arg0: i32) -> (i32, i32) {
    %c0_i32 = arith.constant 0 : i32
    %c0_i32_0 = arith.constant 0 : i32
    %c0_i32_1 = arith.constant 0 : i32
    return %c0_i32, %c0_i32_0 : i32, i32
  }
  func.func @transform_3(%arg0: i32) -> (i32, i32) {
    %c0_i32 = arith.constant 0 : i32
    %c0_i32_0 = arith.constant 0 : i32
    %c0_i32_1 = arith.constant 0 : i32
    return %c0_i32, %c0_i32_0 : i32, i32
  }
  func.func @transform_4(%arg0: i32) -> (i32, i32) {
    %c0_i32 = arith.constant 0 : i32
    %c0_i32_0 = arith.constant 0 : i32
    %c0_i32_1 = arith.constant 0 : i32
    return %c0_i32, %c0_i32_0 : i32, i32
  }
  func.func @transform_5(%arg0: i32) -> (i32, i32) {
    %c0_i32 = arith.constant 0 : i32
    %c0_i32_0 = arith.constant 0 : i32
    %c0_i32_1 = arith.constant 0 : i32
    return %c0_i32, %c0_i32_0 : i32, i32
  }
  func.func @transform_6(%arg0: i32) -> (i32, i32) {
    %c0_i32 = arith.constant 0 : i32
    %c0_i32_0 = arith.constant 0 : i32
    %c0_i32_1 = arith.constant 0 : i32
    return %c0_i32, %c0_i32_0 : i32, i32
  }
  func.func @transform_7(%arg0: i32) -> (i32, i32) {
    %c0_i32 = arith.constant 0 : i32
    %c0_i32_0 = arith.constant 0 : i32
    %c0_i32_1 = arith.constant 0 : i32
    return %c0_i32, %c0_i32_0 : i32, i32
  }
  func.func @transform_8(%arg0: i32) -> (i32, i32) {
    %c0_i32 = arith.constant 0 : i32
    %c0_i32_0 = arith.constant 0 : i32
    %c0_i32_1 = arith.constant 0 : i32
    return %c0_i32, %c0_i32_0 : i32, i32
  }
  func.func @transform_9(%arg0: i32) -> (i32, i32) {
    %c0_i32 = arith.constant 0 : i32
    %c0_i32_0 = arith.constant 0 : i32
    return %arg0, %c0_i32 : i32, i32
  }
}

module attributes {stable_mosaic.version = 11 : i64} {
  func.func @_layernorm_kernel(%arg0: i32, %arg1: memref<16x32xf32, #tpu.memory_space<vmem>>, %arg2: memref<1x32xf32, #tpu.memory_space<vmem>>, %arg3: memref<1x32xf32, #tpu.memory_space<vmem>>, %arg4: memref<16x32xf32, #tpu.memory_space<vmem>>) attributes {dimension_semantics = [#tpu.dimension_semantics<parallel>], iteration_bounds = array<i64: 2>, scalar_prefetch = 0 : i64, scratch_operands = 0 : i64, tpu.core_type = #tpu.core_type<tc>, window_params = [{transform_indices = @transform_0, window_bounds = array<i64: 16, 32>}, {pipeline_mode = #tpu.pipeline_mode<synchronous>, transform_indices = @transform_1, window_bounds = array<i64: 1, 32>}, {pipeline_mode = #tpu.pipeline_mode<synchronous>, transform_indices = @transform_2, window_bounds = array<i64: 1, 32>}, {transform_indices = @transform_3, window_bounds = array<i64: 16, 32>}]} {
    %c0 = arith.constant 0 : index
    %c0_0 = arith.constant 0 : index
    %0 = vector.load %arg1[%c0, %c0_0] : memref<16x32xf32, #tpu.memory_space<vmem>>, vector<16x32xf32>
    %c0_1 = arith.constant 0 : index
    %c0_2 = arith.constant 0 : index
    %1 = vector.load %arg2[%c0_1, %c0_2] : memref<1x32xf32, #tpu.memory_space<vmem>>, vector<1x32xf32>
    %c0_3 = arith.constant 0 : index
    %c0_4 = arith.constant 0 : index
    %2 = vector.load %arg3[%c0_3, %c0_4] : memref<1x32xf32, #tpu.memory_space<vmem>>, vector<1x32xf32>
    %cst = arith.constant dense<0.000000e+00> : vector<16xf32>
    %3 = vector.multi_reduction <add>, %0, %cst [1] : vector<16x32xf32> to vector<16xf32>
    %4 = vector.shape_cast %3 : vector<16xf32> to vector<16x1xf32>
    %cst_5 = arith.constant 3.200000e+01 : f32
    %5 = vector.broadcast %cst_5 : f32 to vector<16x1xf32>
    %6 = arith.divf %4, %5 : vector<16x1xf32>
    %7 = vector.broadcast %6 : vector<16x1xf32> to vector<16x32xf32>
    %8 = arith.subf %0, %7 : vector<16x32xf32>
    %9 = arith.mulf %8, %8 : vector<16x32xf32>
    %cst_6 = arith.constant dense<0.000000e+00> : vector<16xf32>
    %10 = vector.multi_reduction <add>, %9, %cst_6 [1] : vector<16x32xf32> to vector<16xf32>
    %11 = vector.shape_cast %10 : vector<16xf32> to vector<16x1xf32>
    %cst_7 = arith.constant 3.200000e+01 : f32
    %12 = vector.broadcast %cst_7 : f32 to vector<16x1xf32>
    %13 = arith.divf %11, %12 : vector<16x1xf32>
    %cst_8 = arith.constant 9.99999997E-7 : f32
    %14 = vector.broadcast %cst_8 : f32 to vector<16x1xf32>
    %15 = arith.addf %13, %14 : vector<16x1xf32>
    %16 = math.rsqrt %15 : vector<16x1xf32>
    %17 = vector.broadcast %16 : vector<16x1xf32> to vector<16x32xf32>
    %18 = arith.mulf %8, %17 : vector<16x32xf32>
    %19 = vector.broadcast %1 : vector<1x32xf32> to vector<16x32xf32>
    %20 = arith.mulf %18, %19 : vector<16x32xf32>
    %21 = vector.broadcast %2 : vector<1x32xf32> to vector<16x32xf32>
    %22 = arith.addf %20, %21 : vector<16x32xf32>
    %c0_9 = arith.constant 0 : index
    %c0_10 = arith.constant 0 : index
    %23 = vector.load %arg4[%c0_9, %c0_10] : memref<16x32xf32, #tpu.memory_space<vmem>>, vector<16x32xf32>
    tpu.vector_store %arg4[%c0_9, %c0_10], %22 {strides = array<i32>} : memref<16x32xf32, #tpu.memory_space<vmem>>, vector<16x32xf32>,
    return
  }
  func.func @transform_0(%arg0: i32) -> (i32, i32) {
    %c0_i32 = arith.constant 0 : i32
    %c0_i32_0 = arith.constant 0 : i32
    return %arg0, %c0_i32 : i32, i32
  }
  func.func @transform_1(%arg0: i32) -> (i32, i32) {
    %c0_i32 = arith.constant 0 : i32
    %c0_i32_0 = arith.constant 0 : i32
    %c0_i32_1 = arith.constant 0 : i32
    return %c0_i32, %c0_i32_0 : i32, i32
  }
  func.func @transform_2(%arg0: i32) -> (i32, i32) {
    %c0_i32 = arith.constant 0 : i32
    %c0_i32_0 = arith.constant 0 : i32
    %c0_i32_1 = arith.constant 0 : i32
    return %c0_i32, %c0_i32_0 : i32, i32
  }
  func.func @transform_3(%arg0: i32) -> (i32, i32) {
    %c0_i32 = arith.constant 0 : i32
    %c0_i32_0 = arith.constant 0 : i32
    return %arg0, %c0_i32 : i32, i32
  }
}

</mosaic_0001>

<bundles_post_ra>
// kernel: transformer_encoder_forward.9
= control target key start
LH: loop header
LB: loop body
LE: loop exit
PB: predicated region body
PF: predicated region fallthrough
CT: control target
= control target key end

     0   :  { %s781_s13 = smov 0   ;;  %s858_s0 = inlined_call_operand.vmem [shape: f32[32,32], index: 0, kind: input, shape index: {}]   ;;  %s859_s1 = inlined_call_operand.vmem [shape: f32[16,32], index: 1, kind: input, shape index: {}]   ;;  %s860_s2 = inlined_call_operand.vmem [shape: f32[1,32], index: 2, kind: input, shape index: {}]   ;;  %s861_s3 = inlined_call_operand.vmem [shape: f32[1,32], index: 3, kind: input, shape index: {}]   ;;  %s862_s4 = inlined_call_operand.vmem [shape: bf16[32,64], index: 4, kind: input, shape index: {}]   ;;  %s863_s5 = inlined_call_operand.vmem [shape: f32[1,64], index: 5, kind: input, shape index: {}]   ;;  %s864_s6 = inlined_call_operand.vmem [shape: bf16[64,32], index: 6, kind: input, shape index: {}]   ;;  %s865_s7 = inlined_call_operand.vmem [shape: f32[1,32], index: 7, kind: input, shape index: {}]   ;;  %s866_s8 = inlined_call_operand.vmem [shape: f32[1,32], index: 8, kind: input, shape index: {}]   ;;  %s867_s9 = inlined_call_operand.vmem [shape: f32[1,32], index: 9, kind: input, shape index: {}]   ;;  %s868_s10 = inlined_call_operand.vmem [shape: f32[32,32], index: 10, kind: output, shape index: {}]  }
   0x1 LB: > { %s641_s14 = sadd.s32 4294967295, %s722_s13   ;;  %p645_p0 = scmp.ge.s32.totalorder %s722_s13, 1  ;;  %s722_s13 = sphi %s781_s13, %s20_s13  }
   0x2   : > { %p313_p1 = scmp.lt.s32.totalorder %s722_s13, 3 }
   0x4   : > { %p314_p2 = pnand %p645_p0, %p313_p1 }
   0x5   : > { %s646_s8 = sshll.u32 (!%p314_p2), %s641_s14, 1  ;;  %v366_v0 = vld [vmem:[%s859_s1] sm:$0xff] (!%p314_p2)  ;;  %v367_v1 = vld [vmem:[%s859_s1 + $0x8] sm:$0xff] (!%p314_p2)  ;;  %vm372_vm0 = vcmask (!%p314_p2), 261120   ;;  %v724_v19 = vmov (!%p314_p2), 0.0   ;;  %vm725_vm1 = vmmov (!%p314_p2), 0  }
   0x6   : > { %317 = sbr.rel (%p314_p2) target bundleno = 796 (0x31c), region = 60  ;;  %p352_p3 = scmp.lt.s32.totalorder (!%p314_p2), %s646_s8, 3  ;;  %v702_v18 = vld [vmem:[%s862_s4] sm:$0xff] (!%p314_p2)   ;;  %672 = vmatprep.subr.bf16.mxu0 (!%p314_p2), %v724_v19  ;;  %680 = vmatprep.subr.bf16.mxu1 (!%p314_p2), %v724_v19  ;;  %v703_v20 = vld [vmem:[%s862_s4 + $0x8] sm:$0xff] (!%p314_p2)   ;;  %v706_v40 = vld [vmem:[%s864_s6 + $0x10] sm:$0xff] (!%p314_p2)   ;;  %vm534_vm2 = vcmask (!%p314_p2), 523264  }
   0x7   : > { %673 = vmatpush3.bf16.msra.mxu0 (!%p314_p2), %v702_v18  ;;  %676 = vmatprep.mubr.msk.bf16.mxu0 (!%p314_p2), %vm725_vm1, %v724_v19  ;;  %v650_v29 = vld [vmem:[%s860_s2] ss:$0 sm:$0xff] (!%p314_p2)  ;;  %v705_v39 = vld [vmem:[%s864_s6 + $0x8] sm:$0xff] (!%p314_p2)   ;;  %v707_v41 = vld [vmem:[%s864_s6 + $0x18] sm:$0xff] (!%p314_p2)  }
   0x8   : > { %674 = vmatprep.subr.bf16.mxu0 (!%p314_p2), %v724_v19  ;;  %688 = vmatprep.mubr.msk.bf16.mxu1 (!%p314_p2), %vm725_vm1, %v724_v19  ;;  %v651_v33 = vld [vmem:[%s861_s3] ss:$0 sm:$0xff] (!%p314_p2) }
   0x9   : > { %v704_v38 = vld [vmem:[%s864_s6] sm:$0xff] (!%p314_p2)  }
   0xa   : > { %681 = vmatpush3.bf16.msra.mxu1 (!%p314_p2), %v704_v38  ;;  %v652_v42 = vld [vmem:[%s863_s5] ss:$0 sm:$0xff] (!%p314_p2) }
   0xb   : > { %675 = vmatpush3.bf16.msra.mxu0 (!%p314_p2), %v703_v20  ;;  %682 = vmatprep.subr.bf16.mxu1 (!%p314_p2), %v724_v19  ;;  %v656_v60 = vld [vmem:[%s865_s7] ss:$0 sm:$0xff] (!%p314_p2) }
   0xd   : > { %s870_s8 = smov (!%p352_p3, %s646_s8), 3 }
   0xe   : > { %s647_s9 = sshll.u32 %s870_s8, 3  ;;  %683 = vmatpush3.bf16.msra.mxu1 %v705_v39 }
   0xf   : > { %s355_s21 = scalar_lea.vmem %s858_s0, %s647_s9  ;;  %684 = vmatprep.subr.bf16.mxu1 %v724_v19  ;;  %s361_s25 = scalar_lea.vmem %s868_s10, %s647_s9 }
  0x10   : > { %v364_v2 = vld [vmem:[%s355_s21] sm:$0xff]  ;;  %v365_v3 = vld [vmem:[%s355_s21 + $0x8] sm:$0xff] }
  0x11   : > { %v803_v4 = vadd.f32 %v366_v0, %v364_v2  ;;  %v805_v5 = vadd.f32 %v367_v1, %v365_v3 }
  0x12   : > { %685 = vmatpush3.bf16.msra.mxu1 %v706_v40 }
  0x13   : > { %v373_v6 = vsel %vm372_vm0, %v803_v4, 0.0  ;;  %v376_v7 = vsel %vm372_vm0, %v805_v5, 0.0  ;;  %686 = vmatprep.subr.bf16.mxu1 %v724_v19 }
  0x14   : > { %374 = vadd.xlane.f32.xlu0 %v373_v6 }
  0x16   : > { %687 = vmatpush3.bf16.msra.mxu1 %v707_v41 }
  0x18   : > { %377 = vadd.xlane.f32.xlu0 %v376_v7 }
  0xa1   : > { %v375_v8 = vpop.xlane.xlu0 %374 }
  0xa2   : > { %v380_v9 = vmul.f32 0.03125, %v375_v8 }
  0xa4   : > { %v382_v10 = vsub.f32 %v803_v4, %v380_v9 }
  0xa5   : > { %v378_v11 = vpop.xlane.xlu0 %377 }
  0xa6   : > { %v381_v12 = vmul.f32 0.03125, %v378_v11  ;;  %v384_v13 = vmul.f32 %v382_v10, %v382_v10 }
  0xa8   : > { %v383_v14 = vsub.f32 %v805_v5, %v381_v12  ;;  %v386_v15 = vsel %vm372_vm0, %v384_v13, 0.0 }
  0xa9   : > { %387 = vadd.xlane.f32.xlu1 %v386_v15 }
  0xaa   : > { %v385_v16 = vmul.f32 %v383_v14, %v383_v14 }
  0xac   : > { %v389_v17 = vsel %vm372_vm0, %v385_v16, 0.0 }
  0xad   : > { %390 = vadd.xlane.f32.xlu1 %v389_v17 }
 0x136   : > { %v388_v21 = vpop.xlane.xlu1 %387 }
 0x137   : > { %v392_v22 = vmul.f32 0.03125, %v388_v21 }
 0x139   : > { %v394_v23 = vadd.f32 1e-05, %v392_v22 }
 0x13a   : > { %v391_v24 = vpop.xlane.xlu1 %390 }
 0x13b   : > { %708 = vrsqrt.f32 %v394_v23  ;;  %v393_v25 = vmul.f32 0.03125, %v391_v24 }
 0x13d   : > { %v395_v26 = vadd.f32 1e-05, %v393_v25 }
 0x13f   : > { %710 = vrsqrt.f32 %v395_v26 }
 0x145   : > { %v709_v27 = vpop.eup %708 }
 0x146   : > { %v398_v28 = vmul.f32 %v709_v27, %v382_v10 }
 0x148   : > { %v406_v32 = vmul.f32 %v650_v29, %v398_v28 }
 0x149   : > { %v711_v30 = vpop.eup %710 }
 0x14a   : > { %v399_v31 = vmul.f32 %v711_v30, %v383_v14  ;;  %v414_v35 = vadd.f32 %v651_v33, %v406_v32 }
 0x14c   : > { %v407_v34 = vmul.f32 %v650_v29, %v399_v31 }
 0x14e   : > { %v415_v36 = vadd.f32 %v651_v33, %v407_v34 }
 0x150   : > { %v420_v37 = vpack.c.bf16 %v415_v36, %v414_v35 }
 0x152   : > { %677 = vmatmul.mubr.msk.bf16.vlgmr.msra.gmra.mrb[0].mxu0 %vm372_vm0, %v420_v37 }
 0x225   : > { %v477_v43 = vpop.f32.mrb[0].mxu0 }
 0x226   : > { %v478_v44 = vadd.f32 %v652_v42, %v477_v43  ;;  %v678_v45 = vpop.f32.mrb[1].mxu0 }
 0x227   : > { %v480_v46 = vpop.f32.mrb[2].mxu0 }
 0x228   : > { %v484_v47 = vmul.f32 0.5, %v478_v44  ;;  %v481_v48 = vadd.f32 %v652_v42, %v480_v46  ;;  %v679_v49 = vpop.f32.mrb[3].mxu0 }
 0x22a   : > { %712 = vtanh.f32 %v484_v47  ;;  %v485_v50 = vmul.f32 0.5, %v481_v48 }
 0x22c   : > { %714 = vtanh.f32 %v485_v50 }
 0x234   : > { %v713_v51 = vpop.eup %712 }
 0x235   : > { %v488_v52 = vadd.f32 1.0, %v713_v51 }
 0x236   : > { %v715_v53 = vpop.eup %714 }
 0x237   : > { %v490_v54 = vmul.f32 0.5, %v488_v52  ;;  %v489_v55 = vadd.f32 1.0, %v715_v53 }
 0x239   : > { %v491_v56 = vmul.f32 0.5, %v489_v55  ;;  %v492_v57 = vmul.f32 %v490_v54, %v478_v44 }
 0x23b   : > { %v493_v58 = vmul.f32 %v491_v56, %v481_v48 }
 0x23d   : > { %v502_v59 = vpack.c.bf16 %v493_v58, %v492_v57 }
 0x23f   : > { %689 = vmatmul.mubr.msk.bf16.vlgmr.msra.gmra.mrb[0].mxu1 %vm534_vm2, %v502_v59 }
 0x312   : > { %v572_v61 = vpop.f32.mrb[0].mxu1 }
 0x313   : > { %v573_v62 = vadd.f32 %v656_v60, %v572_v61  ;;  %v690_v63 = vpop.f32.mrb[1].mxu1 }
 0x314   : > { %v575_v0 = vpop.f32.mrb[2].mxu1 }
 0x315   : > { %v579_v1 = vmul.f32 0.5, %v573_v62  ;;  %v576_v2 = vadd.f32 %v656_v60, %v575_v0  ;;  %v691_v3 = vpop.f32.mrb[3].mxu1 }
 0x317   : > { %v581_v6 = vadd.f32 %v579_v1, %v803_v4  ;;  %v580_v7 = vmul.f32 0.5, %v576_v2 }
 0x319   : > { %583 = vst.msk [vmem:[%s361_s25] sm:$0xff] %vm372_vm0, %v581_v6  ;;  %v582_v8 = vadd.f32 %v580_v7, %v805_v5 }
 0x31b   : > { %584 = vst.msk [vmem:[%s361_s25 + $0x8] sm:$0xff] %vm372_vm0, %v582_v8 }
 0x31c PF: > { %s20_s13 = sadd.s32 1, %s722_s13  }
 0x31d   : > { %p17_p4 = scmp.ge.s32.totalorder %s20_s13, 4  }
 0x31f   :  { %19 = sbr.rel (!%p17_p4) target bundleno = 1 (0x1), region = 90 }

// kernel: transformer_encoder_forward.11
= control target key start
LH: loop header
LB: loop body
LE: loop exit
PB: predicated region body
PF: predicated region fallthrough
CT: control target
= control target key end

     0   :  { %s1141_s29 = smov 0   ;;  %s1253_s0 = inlined_call_operand.vmem [shape: f32[2,16,32], index: 0, kind: input, shape index: {}]   ;;  %s1254_s1 = inlined_call_operand.vmem [shape: f32[2,16,1], index: 1, kind: input, shape index: {}]   ;;  %s1255_s2 = inlined_call_operand.vmem [shape: f32[1,32], index: 2, kind: input, shape index: {}]   ;;  %s1256_s3 = inlined_call_operand.vmem [shape: f32[1,32], index: 3, kind: input, shape index: {}]   ;;  %s1257_s4 = inlined_call_operand.vmem [shape: bf16[32,32], index: 4, kind: input, shape index: {}]   ;;  %s1258_s5 = inlined_call_operand.vmem [shape: f32[1,32], index: 5, kind: input, shape index: {}]   ;;  %s1259_s6 = inlined_call_operand.vmem [shape: bf16[32,32], index: 6, kind: input, shape index: {}]   ;;  %s1260_s7 = inlined_call_operand.vmem [shape: f32[1,32], index: 7, kind: input, shape index: {}]   ;;  %s1261_s8 = inlined_call_operand.vmem [shape: f32[7,32], index: 8, kind: input, shape index: {}]   ;;  %s1262_s9 = inlined_call_operand.vmem [shape: f32[1,32], index: 9, kind: input, shape index: {}]   ;;  %s1263_s10 = inlined_call_operand.vmem [shape: f32[1,32], index: 10, kind: input, shape index: {}]   ;;  %s1264_s11 = inlined_call_operand.vmem [shape: f32[1,32], index: 11, kind: input, shape index: {}]   ;;  %s1265_s12 = inlined_call_operand.vmem [shape: bf16[32,32], index: 12, kind: input, shape index: {}]   ;;  %s1266_s13 = inlined_call_operand.vmem [shape: f32[1,32], index: 13, kind: input, shape index: {}]   ;;  %s1267_s14 = inlined_call_operand.vmem [shape: f32[2,16,32], index: 14, kind: output, shape index: {}]  }
   0x1 LB: > { %s951_s30 = sadd.s32 4294967295, %s1061_s29   ;;  %p955_p0 = scmp.ge.s32.totalorder %s1061_s29, 1  ;;  %s1061_s29 = sphi %s1141_s29, %s24_s29  }
   0x2   : > { %p422_p1 = scmp.lt.s32.totalorder %s1061_s29, 3 }
   0x4   : > { %p423_p2 = pnand %p955_p0, %p422_p1 }
   0x5   : > { %p473_p3 = scmp.lt.s32.totalorder (!%p423_p2), %s951_s30, 1  ;;  %vm495_vm0 = vcmask (!%p423_p2), 261120   ;;  %v1037_v14 = vld [vmem:[%s1257_s4] sm:$0xff] (!%p423_p2)   ;;  %v1063_v16 = vmov (!%p423_p2), 0.0   ;;  %v1039_v17 = vld [vmem:[%s1257_s4 + $0x8] sm:$0xff] (!%p423_p2)   ;;  %vm1064_vm1 = vmmov (!%p423_p2), 0  }
   0x6   : > { %426 = sbr.rel (%p423_p2) target bundleno = 844 (0x34c), region = 76  ;;  %v1038_v15 = vld [vmem:[%s1259_s6] sm:$0xff] (!%p423_p2)   ;;  %1000 = vmatprep.subr.bf16.mxu0 (!%p423_p2), %v1063_v16  ;;  %1008 = vmatprep.subr.bf16.mxu1 (!%p423_p2), %v1063_v16  ;;  %v1040_v18 = vld [vmem:[%s1259_s6 + $0x8] sm:$0xff] (!%p423_p2)   ;;  %v1065_v19 = vmov (!%p423_p2), 0   ;;  %vm693_vm2 = vcmask (!%p423_p2), 256000  }
   0x7   : > { %1001 = vmatpush3.bf16.msra.mxu0 (!%p423_p2), %v1037_v14  ;;  %1009 = vmatpush3.bf16.msra.mxu1 (!%p423_p2), %v1038_v15  ;;  %v962_v30 = vld [vmem:[%s1255_s2] ss:$0 sm:$0xff] (!%p423_p2)  ;;  %694 = vst.msk [vmem:[#allocation2] sm:$0x7] (!%p423_p2), %vm693_vm2, %v1063_v16  ;;  %695 = vst.msk [vmem:[#allocation2 + $0x13] sm:$0x7] (!%p423_p2), %vm693_vm2, %v1063_v16 }
   0x8   : > { %1002 = vmatprep.subr.bf16.mxu0 (!%p423_p2), %v1063_v16  ;;  %1010 = vmatprep.subr.bf16.mxu1 (!%p423_p2), %v1063_v16  ;;  %v963_v34 = vld [vmem:[%s1256_s3] ss:$0 sm:$0xff] (!%p423_p2)  ;;  %v1042_v40 = vld [vmem:[%s1265_s12 + $0x8] sm:$0xff] (!%p423_p2)  }
   0x9   : > { %1004 = vmatprep.mubr.msk.bf16.mxu0 (!%p423_p2), %vm1064_vm1, %v1063_v16  ;;  %1012 = vmatprep.mubr.msk.bf16.mxu1 (!%p423_p2), %vm1064_vm1, %v1063_v16  ;;  %v1041_v39 = vld [vmem:[%s1265_s12] sm:$0xff] (!%p423_p2)  }
   0xa   : > { %1035 = vset.pattern.permute.xlu0 (!%p423_p2), %v1065_v19  ;;  %1036 = vset.pattern.permute.xlu1 (!%p423_p2), %v1065_v19  ;;  %v968_v41 = vld [vmem:[%s1260_s7] ss:$0 sm:$0xff] (!%p423_p2) }
   0xb   : > { %1003 = vmatpush3.bf16.msra.mxu0 (!%p423_p2), %v1039_v17  ;;  %1011 = vmatpush3.bf16.msra.mxu1 (!%p423_p2), %v1040_v18  ;;  %v964_v55 = vld [vmem:[%s1258_s5] ss:$0 sm:$0xff] (!%p423_p2) }
   0xc   : > { %1016 = vmatprep.subr.bf16.mxu0 (!%p423_p2), %v1063_v16 }
   0xd   : > { %s1269_s30 = smov (!%p473_p3, %s951_s30), 1 }
   0xe   : > { %s1149_s15 = sshll.u32 %s1269_s30, 4 }
   0xf   : > { %s477_s18 = scalar_lea.vmem %s1253_s0, %s1149_s15  ;;  %s482_s30 = scalar_lea.vmem %s1254_s1, %s1149_s15 }
  0x10   : > { %v1155_v0 = vld [vmem:[%s477_s18] sm:$0xff]  ;;  %v1157_v1 = vld [vmem:[%s477_s18 + $0x8] sm:$0xff]  ;;  %s487_s24 = scalar_lea.vmem %s1267_s14, %s1149_s15 }
  0x11   : > { %v496_v2 = vsel %vm495_vm0, %v1155_v0, 0.0  ;;  %v499_v3 = vsel %vm495_vm0, %v1157_v1, 0.0  ;;  %v491_v20 = vld [vmem:[%s482_s30] sm:$0xff]  ;;  %v492_v21 = vld [vmem:[%s482_s30 + $0x8] sm:$0xff] }
  0x12   : > { %497 = vadd.xlane.f32.xlu0 %v496_v2 }
  0x16   : > { %500 = vadd.xlane.f32.xlu0 %v499_v3 }
  0x2c   : > { %683 = vperm.xlu0 %1035, %v491_v20  }
  0x9f   : > { %v498_v4 = vpop.xlane.xlu0 %497 }
  0xa0   : > { %v503_v5 = vmul.f32 0.03125, %v498_v4 }
  0xa2   : > { %v505_v6 = vsub.f32 %v1155_v0, %v503_v5 }
  0xa3   : > { %v501_v7 = vpop.xlane.xlu0 %500 }
  0xa4   : > { %v504_v8 = vmul.f32 0.03125, %v501_v7  ;;  %v507_v9 = vmul.f32 %v505_v6, %v505_v6  ;;  %v972_v7 = vld [vmem:[%s1261_s8] ss:$0 sm:$0xff] }
  0xa6   : > { %v506_v10 = vsub.f32 %v1157_v1, %v504_v8  ;;  %v509_v11 = vsel %vm495_vm0, %v507_v9, 0.0  ;;  %v973_v8 = vld [vmem:[%s1261_s8 + $0x1] ss:$0 sm:$0xff]  ;;  %v974_v9 = vld [vmem:[%s1261_s8 + $0x2] ss:$0 sm:$0xff] }
  0xa7   : > { %510 = vadd.xlane.f32.xlu1 %v509_v11 }
  0xa8   : > { %v508_v12 = vmul.f32 %v506_v10, %v506_v10 }
  0xaa   : > { %v512_v13 = vsel %vm495_vm0, %v508_v12, 0.0 }
  0xab   : > { %513 = vadd.xlane.f32.xlu1 %v512_v13  ;;  %v684_v61 = vpop.permute.xlu0 %683 }
  0xbc   : > { %688 = vperm.xlu1 %1036, %v492_v21  }
 0x134   : > { %v511_v22 = vpop.xlane.xlu1 %510 }
 0x135   : > { %v515_v23 = vmul.f32 0.03125, %v511_v22 }
 0x137   : > { %v517_v24 = vadd.f32 1e-05, %v515_v23 }
 0x138   : > { %v514_v25 = vpop.xlane.xlu1 %513 }
 0x139   : > { %1043 = vrsqrt.f32 %v517_v24  ;;  %v516_v26 = vmul.f32 0.03125, %v514_v25 }
 0x13b   : > { %v518_v27 = vadd.f32 1e-05, %v516_v26  ;;  %v976_v26 = vld [vmem:[%s1261_s8 + $0x4] ss:$0 sm:$0xff] }
 0x13c   : > { %v689_v3 = vpop.permute.xlu1 %688 }
 0x13d   : > { %1045 = vrsqrt.f32 %v518_v27 }
 0x143   : > { %v1044_v28 = vpop.eup %1043 }
 0x144   : > { %v521_v29 = vmul.f32 %v1044_v28, %v505_v6 }
 0x146   : > { %v529_v33 = vmul.f32 %v962_v30, %v521_v29 }
 0x147   : > { %v1046_v31 = vpop.eup %1045 }
 0x148   : > { %v522_v32 = vmul.f32 %v1046_v31, %v506_v10  ;;  %v537_v36 = vadd.f32 %v963_v34, %v529_v33  ;;  %v977_v33 = vld [vmem:[%s1261_s8 + $0x5] ss:$0 sm:$0xff] }
 0x14a   : > { %v530_v35 = vmul.f32 %v962_v30, %v522_v32 }
 0x14c   : > { %v538_v37 = vadd.f32 %v963_v34, %v530_v35 }
 0x14e   : > { %v543_v38 = vpack.c.bf16 %v538_v37, %v537_v36 }
 0x150   : > { %1005 = vmatmul.mubr.msk.bf16.vlgmr.msra.gmra.mrb[0].mxu0 %vm495_vm0, %v543_v38  ;;  %1013 = vmatmul.mubr.msk.bf16.vlgmr.msra.gmra.mrb[0].mxu1 %vm495_vm0, %v543_v38 }
 0x151   : > { %1020 = vmatprep.mubr.msk.bf16.mxu0 %vm1064_vm1, %v1063_v16  ;;  %1017 = vmatpush3.bf16.msra.mxu0 %v1041_v39 }
 0x152   : > { %1018 = vmatprep.subr.bf16.mxu0 %v1063_v16  ;;  %v975_v16 = vld [vmem:[%s1261_s8 + $0x3] ss:$0 sm:$0xff] }
 0x155   : > { %1019 = vmatpush3.bf16.msra.mxu0 %v1042_v40  ;;  %v978_v40 = vld [vmem:[%s1261_s8 + $0x6] ss:$0 sm:$0xff] }
 0x223   : > { %v600_v42 = vpop.f32.mrb[0].mxu0  ;;  %v664_v43 = vpop.f32.mrb[0].mxu1 }
 0x224   : > { %v665_v44 = vadd.f32 %v968_v41, %v664_v43  ;;  %v1006_v45 = vpop.f32.mrb[1].mxu0  ;;  %v1014_v46 = vpop.f32.mrb[1].mxu1  ;;  %v601_v58 = vadd.f32 %v964_v55, %v600_v42 }
 0x225   : > { %v603_v47 = vpop.f32.mrb[2].mxu0  ;;  %v667_v48 = vpop.f32.mrb[2].mxu1 }
 0x226   : > { %v671_v49 = vmul.f32 0.5, %v665_v44  ;;  %v668_v50 = vadd.f32 %v968_v41, %v667_v48  ;;  %v1007_v51 = vpop.f32.mrb[3].mxu0  ;;  %v1015_v52 = vpop.f32.mrb[3].mxu1  ;;  %v604_v62 = vadd.f32 %v964_v55, %v603_v47 }
 0x228   : > { %1047 = vtanh.f32 %v671_v49  ;;  %v672_v53 = vmul.f32 0.5, %v668_v50  ;;  %v979_v50 = vld [vmem:[%s1262_s9] ss:$0 sm:$0xff] }
 0x22a   : > { %1049 = vtanh.f32 %v672_v53 }
 0x232   : > { %v1048_v54 = vpop.eup %1047 }
 0x233   : > { %v675_v56 = vadd.f32 1.0, %v1048_v54  ;;  %v980_v54 = vld [vmem:[%s1263_s10] ss:$0 sm:$0xff] }
 0x234   : > { %v1050_v57 = vpop.eup %1049 }
 0x235   : > { %v676_v59 = vadd.f32 1.0, %v1050_v57  ;;  %v677_v60 = vmul.f32 0.5, %v675_v56  ;;  %v981_v57 = vld [vmem:[%s1264_s11] ss:$0 sm:$0xff] }
 0x237   : > { %v679_v63 = vmul.f32 %v677_v60, %v601_v58  ;;  %v678_v2 = vmul.f32 0.5, %v676_v59 }
 0x239   : > { %v691_v4 = vmul.f32 %v684_v61, %v679_v63  ;;  %v680_v5 = vmul.f32 %v678_v2, %v604_v62 }
 0x23b   : > { %696 = vst.msk [vmem:[#allocation2 + $0x3] sm:$0xff] %vm495_vm0, %v691_v4  ;;  %v692_v6 = vmul.f32 %v689_v3, %v680_v5 }
 0x23d   : > { %697 = vst.msk [vmem:[#allocation2 + $0xb] sm:$0xff] %vm495_vm0, %v692_v6 }
 0x242   : > { %v698_v10 = vld [vmem:[#allocation2] sm:$0xff] }
 0x243   : > { %v709_v11 = vld [vmem:[#allocation2 + $0x1] sm:$0xff]  ;;  %v705_v13 = vmul.f32 %v972_v7, %v698_v10 }
 0x244   : > { %v720_v12 = vld [vmem:[#allocation2 + $0x2] sm:$0xff]  ;;  %v716_v14 = vmul.f32 %v973_v8, %v709_v11  ;;  %v721_v19 = vld [vmem:[#allocation2 + $0xa] sm:$0xff] }
 0x245   : > { %v731_v15 = vld [vmem:[#allocation2 + $0x3] sm:$0xff]  ;;  %v727_v23 = vmul.f32 %v974_v9, %v720_v12  ;;  %v732_v24 = vld [vmem:[#allocation2 + $0xb] sm:$0xff]  ;;  %v728_v28 = vmul.f32 %v974_v9, %v721_v19  ;;  %v982_v12 = vld [vmem:[%s1266_s13] ss:$0 sm:$0xff] }
 0x246   : > { %v699_v17 = vld [vmem:[#allocation2 + $0x8] sm:$0xff]  ;;  %v718_v22 = vadd.f32 %v716_v14, %v705_v13  ;;  %v738_v30 = vmul.f32 %v975_v16, %v731_v15  ;;  %v739_v35 = vmul.f32 %v975_v16, %v732_v24 }
 0x247   : > { %v710_v18 = vld [vmem:[#allocation2 + $0x9] sm:$0xff]  ;;  %v706_v20 = vmul.f32 %v972_v7, %v699_v17 }
 0x248   : > { %v717_v21 = vmul.f32 %v973_v8, %v710_v18  ;;  %v742_v25 = vld [vmem:[#allocation2 + $0x4] sm:$0xff]  ;;  %v729_v29 = vadd.f32 %v727_v23, %v718_v22  ;;  %v743_v31 = vld [vmem:[#allocation2 + $0xc] sm:$0xff] }
 0x249   : > { %v753_v32 = vld [vmem:[#allocation2 + $0x5] sm:$0xff]  ;;  %v749_v37 = vmul.f32 %v976_v26, %v742_v25  ;;  %v754_v38 = vld [vmem:[#allocation2 + $0xd] sm:$0xff]  ;;  %v750_v42 = vmul.f32 %v976_v26, %v743_v31 }
 0x24a   : > { %v719_v27 = vadd.f32 %v717_v21, %v706_v20  ;;  %v740_v36 = vadd.f32 %v738_v30, %v729_v29  ;;  %v764_v39 = vld [vmem:[#allocation2 + $0x6] sm:$0xff]  ;;  %v760_v44 = vmul.f32 %v977_v33, %v753_v32  ;;  %v765_v45 = vld [vmem:[#allocation2 + $0xe] sm:$0xff]  ;;  %v761_v47 = vmul.f32 %v977_v33, %v754_v38 }
 0x24b   : > { %v771_v49 = vmul.f32 %v978_v40, %v764_v39  ;;  %v772_v52 = vmul.f32 %v978_v40, %v765_v45 }
 0x24c   : > { %v730_v34 = vadd.f32 %v728_v28, %v719_v27  ;;  %v751_v43 = vadd.f32 %v749_v37, %v740_v36 }
 0x24e   : > { %v741_v41 = vadd.f32 %v739_v35, %v730_v34  ;;  %v762_v48 = vadd.f32 %v760_v44, %v751_v43 }
 0x250   : > { %v752_v46 = vadd.f32 %v750_v42, %v741_v41  ;;  %v773_v53 = vadd.f32 %v771_v49, %v762_v48 }
 0x252   : > { %v763_v51 = vadd.f32 %v761_v47, %v752_v46  ;;  %v782_v56 = vadd.f32 %v979_v50, %v773_v53 }
 0x254   : > { %v774_v55 = vadd.f32 %v772_v52, %v763_v51  ;;  %v791_v59 = vmul.f32 %v980_v54, %v782_v56 }
 0x256   : > { %v783_v58 = vadd.f32 %v979_v50, %v774_v55  ;;  %v800_v61 = vadd.f32 %v981_v57, %v791_v59 }
 0x258   : > { %v792_v60 = vmul.f32 %v980_v54, %v783_v58  ;;  %v802_v63 = vmul.f32 0.5, %v800_v61 }
 0x25a   : > { %v801_v62 = vadd.f32 %v981_v57, %v792_v60  ;;  %1051 = vtanh.f32 %v802_v63 }
 0x25c   : > { %v803_v2 = vmul.f32 0.5, %v801_v62 }
 0x25e   : > { %1053 = vtanh.f32 %v803_v2 }
 0x264   : > { %v1052_v3 = vpop.eup %1051 }
 0x265   : > { %v806_v4 = vadd.f32 1.0, %v1052_v3 }
 0x267   : > { %v808_v7 = vmul.f32 0.5, %v806_v4 }
 0x268   : > { %v1054_v5 = vpop.eup %1053 }
 0x269   : > { %v807_v6 = vadd.f32 1.0, %v1054_v5  ;;  %v810_v9 = vmul.f32 %v808_v7, %v800_v61 }
 0x26b   : > { %v809_v8 = vmul.f32 0.5, %v807_v6 }
 0x26d   : > { %v811_v10 = vmul.f32 %v809_v8, %v801_v62 }
 0x26f   : > { %v816_v11 = vpack.c.bf16 %v811_v10, %v810_v9 }
 0x271   : > { %1021 = vmatmul.mubr.msk.bf16.vlgmr.msra.gmra.mrb[4].mxu0 %vm495_vm0, %v816_v11 }
 0x344   : > { %v873_v13 = vpop.f32.mrb[4].mxu0 }
 0x345   : > { %v874_v14 = vadd.f32 %v982_v12, %v873_v13  ;;  %v1022_v15 = vpop.f32.mrb[5].mxu0 }
 0x346   : > { %v876_v16 = vpop.f32.mrb[6].mxu0 }
 0x347   : > { %v880_v17 = vadd.f32 %v874_v14, %v1155_v0  ;;  %v877_v18 = vadd.f32 %v982_v12, %v876_v16  ;;  %v1023_v19 = vpop.f32.mrb[7].mxu0 }
 0x349   : > { %882 = vst.msk [vmem:[%s487_s24] sm:$0xff] %vm495_vm0, %v880_v17  ;;  %v881_v20 = vadd.f32 %v877_v18, %v1157_v1 }
 0x34b   : > { %883 = vst.msk [vmem:[%s487_s24 + $0x8] sm:$0xff] %vm495_vm0, %v881_v20 }
 0x34c PF: > { %s24_s29 = sadd.s32 1, %s1061_s29  }
 0x34d   : > { %p21_p4 = scmp.ge.s32.totalorder %s24_s29, 4  }
 0x34f   :  { %23 = sbr.rel (!%p21_p4) target bundleno = 1 (0x1), region = 109 }

// kernel: transformer_encoder_forward.10
= control target key start
LH: loop header
LB: loop body
LE: loop exit
PB: predicated region body
PF: predicated region fallthrough
CT: control target
= control target key end

     0   :  { %s1431_s27 = smov 0   ;;  %s1614_s0 = inlined_call_operand.vmem [shape: f32[2,16,32], index: 0, kind: input, shape index: {}]   ;;  %s1615_s1 = inlined_call_operand.vmem [shape: f32[2,1,16], index: 1, kind: input, shape index: {}]   ;;  %s1616_s2 = inlined_call_operand.vmem [shape: f32[1,32], index: 2, kind: input, shape index: {}]   ;;  %s1617_s3 = inlined_call_operand.vmem [shape: f32[1,32], index: 3, kind: input, shape index: {}]   ;;  %s1618_s4 = inlined_call_operand.vmem [shape: bf16[32,96], index: 4, kind: input, shape index: {}]   ;;  %s1619_s5 = inlined_call_operand.vmem [shape: f32[1,96], index: 5, kind: input, shape index: {}]   ;;  %s1620_s6 = inlined_call_operand.vmem [shape: bf16[32,32], index: 6, kind: input, shape index: {}]   ;;  %s1621_s7 = inlined_call_operand.vmem [shape: f32[1,32], index: 7, kind: input, shape index: {}]   ;;  %s1622_s8 = inlined_call_operand.vmem [shape: f32[2,16,32], index: 8, kind: output, shape index: {}]  }
   0x1 LB: > { %s1164_s28 = sadd.s32 4294967295, %s1368_s27   ;;  %p1168_p0 = scmp.ge.s32.totalorder %s1368_s27, 1  ;;  %s1368_s27 = sphi %s1431_s27, %s18_s27  }
   0x2   : > { %p270_p1 = scmp.lt.s32.totalorder %s1368_s27, 3 }
   0x4   : > { %p271_p2 = pnand %p1168_p0, %p270_p1 }
   0x5   : > { %p307_p3 = scmp.lt.s32.totalorder (!%p271_p2), %s1164_s28, 1  ;;  %vm325_vm0 = vcmask (!%p271_p2), 261120   ;;  %v1306_v14 = vld [vmem:[%s1618_s4] sm:$0xff] (!%p271_p2)   ;;  %v1370_v15 = vmov (!%p271_p2), 0.0   ;;  %v1307_v16 = vld [vmem:[%s1618_s4 + $0x8] sm:$0xff] (!%p271_p2)   ;;  %vm1371_vm1 = vmmov (!%p271_p2), 0  }
   0x6   : > { %274 = sbr.rel (%p271_p2) target bundleno = 1655 (0x677), region = 52  ;;  %1218 = vmatprep.subr.bf16.mxu0 (!%p271_p2), %v1370_v15  ;;  %1226 = vmatprep.subr.bf16.mxu1 (!%p271_p2), %v1370_v15  ;;  %v1173_v25 = vld [vmem:[%s1616_s2] ss:$0 sm:$0xff] (!%p271_p2)  ;;  %vm438_vm2 = vcmask (!%p271_p2), 785408   ;;  %s1372_s21 = smov (!%p271_p2), 88   ;;  %vm445_vm3 = vcmask (!%p271_p2), 64512  }
   0x7   : > { %1219 = vmatpush3.bf16.msra.mxu0 (!%p271_p2), %v1306_v14  ;;  %1222 = vmatprep.mubr.msk.bf16.mxu0 (!%p271_p2), %vm1371_vm1, %v1370_v15  ;;  %v1174_v29 = vld [vmem:[%s1617_s3] ss:$0 sm:$0xff] (!%p271_p2)  ;;  %s1373_s22 = smov (!%p271_p2), 96   ;;  %s1374_s23 = smov (!%p271_p2), 120   ;;  %vm503_vm4 = vcmask (!%p271_p2), 130048   ;;  %vm732_vm5 = vcmask (!%p271_p2), 130112  }
   0x8   : > { %1220 = vmatprep.subr.bf16.mxu0 (!%p271_p2), %v1370_v15  ;;  %1228 = vmatprep.mubr.msk.bf16.mxu1 (!%p271_p2), %vm1371_vm1, %v1370_v15  ;;  %v1175_v34 = vld [vmem:[%s1619_s5] ss:$0 sm:$0xff] (!%p271_p2)  ;;  %s1375_s24 = smov (!%p271_p2), 112   ;;  %s1376_s25 = smov (!%p271_p2), 80   ;;  %vm878_vm6 = vcmask (!%p271_p2), 195712   ;;  %vm1024_vm7 = vcmask (!%p271_p2), 261312  }
   0x9   : > { %s1377_s26 = smov (!%p271_p2), 104   ;;  %s1378_s30 = smov (!%p271_p2), 72  }
   0xa   : > { %s1379_s9 = smov (!%p271_p2), 64   ;;  %s1380_s13 = smov (!%p271_p2), 48  }
   0xb   : > { %1221 = vmatpush3.bf16.msra.mxu0 (!%p271_p2), %v1307_v16  ;;  %s1381_s14 = smov (!%p271_p2), 40   ;;  %s1382_s15 = smov (!%p271_p2), 56  }
   0xc   : > { %1232 = vmatprep.subr.bf16.mxu0 (!%p271_p2), %v1370_v15  ;;  %s1383_s16 = smov (!%p271_p2), 8  }
   0xd   : > { %s1624_s28 = smov (!%p307_p3, %s1164_s28), 1 }
   0xe   : > { %s1194_s29 = sshll.u32 %s1624_s28, 4  ;;  %s314_s12 = scalar_lea.vmem %s1615_s1, %s1624_s28 }
   0xf   : > { %s311_s10 = scalar_lea.vmem %s1614_s0, %s1194_s29  ;;  %v1180_v55 = vld [vmem:[%s314_s12] ss:$0 sm:$0xff] }
  0x10   : > { %v1447_v0 = vld [vmem:[%s311_s10] sm:$0xff]  ;;  %v1449_v1 = vld [vmem:[%s311_s10 + $0x8] sm:$0xff] }
  0x11   : > { %v326_v2 = vsel %vm325_vm0, %v1447_v0, 0.0  ;;  %v329_v3 = vsel %vm325_vm0, %v1449_v1, 0.0 }
  0x12   : > { %327 = vadd.xlane.f32.xlu0 %v326_v2 }
  0x16   : > { %330 = vadd.xlane.f32.xlu0 %v329_v3 }
  0x9f   : > { %v328_v4 = vpop.xlane.xlu0 %327 }
  0xa0   : > { %v333_v5 = vmul.f32 0.03125, %v328_v4 }
  0xa2   : > { %v335_v6 = vsub.f32 %v1447_v0, %v333_v5 }
  0xa3   : > { %v331_v7 = vpop.xlane.xlu0 %330 }
  0xa4   : > { %v334_v8 = vmul.f32 0.03125, %v331_v7  ;;  %v337_v9 = vmul.f32 %v335_v6, %v335_v6 }
  0xa6   : > { %v336_v10 = vsub.f32 %v1449_v1, %v334_v8  ;;  %v339_v11 = vsel %vm325_vm0, %v337_v9, 0.0 }
  0xa7   : > { %340 = vadd.xlane.f32.xlu1 %v339_v11 }
  0xa8   : > { %v338_v12 = vmul.f32 %v336_v10, %v336_v10 }
  0xaa   : > { %v342_v13 = vsel %vm325_vm0, %v338_v12, 0.0 }
  0xab   : > { %343 = vadd.xlane.f32.xlu1 %v342_v13 }
 0x134   : > { %v341_v17 = vpop.xlane.xlu1 %340 }
 0x135   : > { %v345_v18 = vmul.f32 0.03125, %v341_v17 }
 0x137   : > { %v347_v19 = vadd.f32 1e-05, %v345_v18 }
 0x138   : > { %v344_v20 = vpop.xlane.xlu1 %343 }
 0x139   : > { %1310 = vrsqrt.f32 %v347_v19  ;;  %v346_v21 = vmul.f32 0.03125, %v344_v20 }
 0x13b   : > { %v348_v22 = vadd.f32 1e-05, %v346_v21 }
 0x13d   : > { %1312 = vrsqrt.f32 %v348_v22 }
 0x143   : > { %v1311_v23 = vpop.eup %1310 }
 0x144   : > { %v351_v24 = vmul.f32 %v1311_v23, %v335_v6 }
 0x146   : > { %v359_v28 = vmul.f32 %v1173_v25, %v351_v24 }
 0x147   : > { %v1313_v26 = vpop.eup %1312 }
 0x148   : > { %v352_v27 = vmul.f32 %v1313_v26, %v336_v10  ;;  %v367_v31 = vadd.f32 %v1174_v29, %v359_v28 }
 0x14a   : > { %v360_v30 = vmul.f32 %v1173_v25, %v352_v27 }
 0x14c   : > { %v368_v32 = vadd.f32 %v1174_v29, %v360_v30 }
 0x14e   : > { %v373_v33 = vpack.c.bf16 %v368_v32, %v367_v31 }
 0x150   : > { %1223 = vmatmul.mubr.msk.bf16.vlgmr.msra.gmra.mrb[0].mxu0 %vm325_vm0, %v373_v33 }
 0x151   : > { %1234 = vmatprep.mubr.msk.bf16.mxu0 %vm1371_vm1, %v1370_v15 }
 0x223   : > { %v430_v35 = vpop.f32.mrb[0].mxu0 }
 0x224   : > { %v1224_v36 = vpop.f32.mrb[1].mxu0  ;;  %v431_v38 = vadd.f32 %v1175_v34, %v430_v35 }
 0x225   : > { %v433_v37 = vpop.f32.mrb[2].mxu0 }
 0x226   : > { %v434_v39 = vadd.f32 %v1175_v34, %v433_v37  ;;  %v1225_v40 = vpop.f32.mrb[3].mxu0 }
 0x228   : > { %v437_v41 = vpack.c.bf16 %v434_v39, %v431_v38 }
 0x22a   : > { %439 = vst.msk [vmem:[#allocation2] sm:$0xff] %vm438_vm2, %v437_v41 }
 0x231   : > { %v1485_v42 = vld [vmem:[#allocation2] sm:$0xff] }
 0x232   : > { %592 = vrot.lane.b32.xlu1 %v1485_v42, %s1372_s21  ;;  %443 = vrot.lane.b32.xlu0 %v1485_v42, %s1373_s22  ;;  %s1384_s21 = smov 16   ;;  %s1385_s22 = smov 24  }
 0x236   : > { %590 = vrot.lane.b32.xlu1 %v1485_v42, %s1374_s23  ;;  %736 = vrot.lane.b32.xlu0 %v1485_v42, %s1375_s24 }
 0x23a   : > { %738 = vrot.lane.b32.xlu1 %v1485_v42, %s1376_s25  ;;  %882 = vrot.lane.b32.xlu0 %v1485_v42, %s1377_s26 }
 0x23e   : > { %884 = vrot.lane.b32.xlu1 %v1485_v42, %s1378_s30  ;;  %s319_s30 = scalar_lea.vmem %s1622_s8, %s1194_s29 }
 0x242   : > { %533 = vrot.lane.b32.xlu1 %v1485_v42, %s1379_s9 }
 0x2a4   : > { %v593_v43 = vpop.permute.xlu1 %592  ;;  %v444_v44 = vpop.permute.xlu0 %443 }
 0x2a5   : > { %v450_v45 = vsel %vm445_vm3, %v444_v44, 0  ;;  %v598_v48 = vsel %vm445_vm3, %v593_v43, 0 }
 0x2a6   : > { %1227 = vmatpush3.bf16.xpose.msra.mxu1 %v450_v45 }
 0x2a7   : > { %1238 = vmatprep.subr.bf16.mxu1 %v1370_v15 }
 0x2a8   : > { %v591_v46 = vpop.permute.xlu1 %590  ;;  %v737_v52 = vpop.permute.xlu0 %736 }
 0x2ac   : > { %v739_v47 = vpop.permute.xlu1 %738  ;;  %v883_v54 = vpop.permute.xlu0 %882 }
 0x2ad   : > { %1229 = vmatmul.mubr.msk.bf16.vlgmr.msra.gmra.mrb[0].mxu1 %vm445_vm3, %v1485_v42  ;;  %v744_v51 = vsel %vm445_vm3, %v739_v47, 0 }
 0x2ae   : > { %1239 = vmatpush3.bf16.xpose.msra.mxu1 %v598_v48  ;;  %1240 = vmatprep.mubr.msk.bf16.mxu1 %vm1371_vm1, %v1370_v15 }
 0x2af   : > { %1250 = vmatprep.subr.bf16.mxu1 %v1370_v15 }
 0x2b0   : > { %v885_v49 = vpop.permute.xlu1 %884 }
 0x2b1   : > { %v890_v53 = vsel %vm445_vm3, %v885_v49, 0 }
 0x2b4   : > { %v534_v50 = vpop.permute.xlu1 %533 }
 0x2b5   : > { %1233 = vmatpush3.bf16.msra.mxu0 %v534_v50  ;;  %1241 = vmatmul.mubr.msk.bf16.vlgmr.msra.gmra.mrb[4].mxu1 %vm445_vm3, %v591_v46 }
 0x2b6   : > { %1251 = vmatpush3.bf16.xpose.msra.mxu1 %v744_v51  ;;  %1252 = vmatprep.mubr.msk.bf16.mxu1 %vm1371_vm1, %v1370_v15 }
 0x2b7   : > { %1262 = vmatprep.subr.bf16.mxu1 %v1370_v15  ;;  %1244 = vmatprep.subr.bf16.mxu0 %v1370_v15 }
 0x2bd   : > { %1253 = vmatmul.mubr.msk.bf16.vlgmr.msra.gmra.mrb[8].mxu1 %vm445_vm3, %v737_v52 }
 0x2be   : > { %1263 = vmatpush3.bf16.xpose.msra.mxu1 %v890_v53  ;;  %1264 = vmatprep.mubr.msk.bf16.mxu1 %vm1371_vm1, %v1370_v15 }
 0x2bf   : > { %1274 = vmatprep.subr.bf16.mxu1 %v1370_v15 }
 0x2c5   : > { %1265 = vmatmul.mubr.msk.bf16.vlgmr.msra.gmra.mrb[12].mxu1 %vm445_vm3, %v883_v54 }
 0x2c6   : > { %1278 = vmatprep.mubr.msk.bf16.mxu1 %vm1371_vm1, %v1370_v15 }
 0x380   : > { %v486_v56 = vpop.f32.mrb[0].mxu1 }
 0x381   : > { %v493_v57 = vmul.f32 0.35355338, %v486_v56  ;;  %v1230_v58 = vpop.f32.mrb[1].mxu1 }
 0x382   : > { %v489_v59 = vpop.f32.mrb[2].mxu1 }
 0x383   : > { %v494_v60 = vmul.f32 0.35355338, %v489_v59  ;;  %v1231_v61 = vpop.f32.mrb[3].mxu1  ;;  %v501_v62 = vadd.f32 %v1180_v55, %v493_v57 }
 0x385   : > { %v504_v63 = vsel %vm503_vm4, %v501_v62, -inf  ;;  %v502_v2 = vadd.f32 %v1180_v55, %v494_v60 }
 0x386   : > { %505 = vmax.xlane.f32.xlu1 %v504_v63 }
 0x387   : > { %v507_v3 = vsel %vm503_vm4, %v502_v2, -inf }
 0x388   : > { %508 = vmax.xlane.f32.xlu0 %v507_v3  ;;  %v634_v4 = vpop.f32.mrb[4].mxu1 }
 0x389   : > { %v641_v5 = vmul.f32 0.35355338, %v634_v4  ;;  %v1242_v6 = vpop.f32.mrb[5].mxu1 }
 0x38a   : > { %v637_v7 = vpop.f32.mrb[6].mxu1 }
 0x38b   : > { %v642_v8 = vmul.f32 0.35355338, %v637_v7  ;;  %v1243_v9 = vpop.f32.mrb[7].mxu1  ;;  %v643_v10 = vadd.f32 %v1180_v55, %v641_v5 }
 0x38d   : > { %v645_v11 = vsel %vm503_vm4, %v643_v10, -inf  ;;  %v644_v12 = vadd.f32 %v1180_v55, %v642_v8 }
 0x38e   : > { %646 = vmax.xlane.f32.xlu0 %v645_v11 }
 0x38f   : > { %v648_v17 = vsel %vm503_vm4, %v644_v12, -inf }
 0x390   : > { %v780_v13 = vpop.f32.mrb[8].mxu1 }
 0x391   : > { %v787_v14 = vmul.f32 0.35355338, %v780_v13  ;;  %v1254_v16 = vpop.f32.mrb[9].mxu1 }
 0x392   : > { %649 = vmax.xlane.f32.xlu0 %v648_v17  ;;  %v783_v18 = vpop.f32.mrb[10].mxu1 }
 0x393   : > { %v788_v19 = vmul.f32 0.35355338, %v783_v18  ;;  %v1255_v20 = vpop.f32.mrb[11].mxu1  ;;  %v789_v21 = vadd.f32 %v1180_v55, %v787_v14 }
 0x395   : > { %v791_v22 = vsel %vm503_vm4, %v789_v21, -inf  ;;  %v790_v23 = vadd.f32 %v1180_v55, %v788_v19 }
 0x396   : > { %792 = vmax.xlane.f32.xlu1 %v791_v22 }
 0x397   : > { %v794_v24 = vsel %vm503_vm4, %v790_v23, -inf }
 0x398   : > { %795 = vmax.xlane.f32.xlu0 %v794_v24  ;;  %v926_v25 = vpop.f32.mrb[12].mxu1 }
 0x399   : > { %v933_v26 = vmul.f32 0.35355338, %v926_v25  ;;  %v1266_v27 = vpop.f32.mrb[13].mxu1 }
 0x39a   : > { %v929_v28 = vpop.f32.mrb[14].mxu1 }
 0x39b   : > { %v934_v29 = vmul.f32 0.35355338, %v929_v28  ;;  %v1267_v30 = vpop.f32.mrb[15].mxu1  ;;  %v935_v31 = vadd.f32 %v1180_v55, %v933_v26 }
 0x39d   : > { %v937_v32 = vsel %vm503_vm4, %v935_v31, -inf  ;;  %v936_v33 = vadd.f32 %v1180_v55, %v934_v29 }
 0x39e   : > { %938 = vmax.xlane.f32.xlu1 %v937_v32 }
 0x39f   : > { %v940_v34 = vsel %vm503_vm4, %v936_v33, -inf }
 0x3a0   : > { %941 = vmax.xlane.f32.xlu0 %v940_v34 }
 0x3af   : > { %820 = vrot.lane.b32.xlu1 %v1485_v42, %s1380_s13 }
 0x3b3   : > { %966 = vrot.lane.b32.xlu1 %v1485_v42, %s1381_s14 }
 0x3b6   : > { %674 = vrot.lane.b32.xlu0 %v1485_v42, %s1382_s15 }
 0x413   : > { %v1532_v35 = vpop.xlane.xlu1 %505 }
 0x414   : > { %v516_v36 = vsub.f32 %v501_v62, %v1532_v35 }
 0x415   : > { %v1535_v37 = vpop.xlane.xlu0 %508 }
 0x416   : > { %v517_v38 = vsub.f32 %v502_v2, %v1535_v37  ;;  %v518_v39 = vmul.f32 1.442695, %v516_v36 }
 0x418   : > { %v520_v40 = vmul.f32 1.442695, %v517_v38 }
 0x41a   : > { %1314 = vpow2.f32 %v520_v40 }
 0x41b   : > { %v1538_v41 = vpop.xlane.xlu0 %646  ;;  %1316 = vpow2.f32 %v518_v39 }
 0x41c   : > { %v657_v43 = vsub.f32 %v643_v10, %v1538_v41  ;;  %v651_v28 = vsub.f32 -inf, %v1538_v41 }
 0x41e   : > { %v659_v44 = vmul.f32 1.442695, %v657_v43  ;;  %v653_v32 = vmul.f32 1.442695, %v651_v28 }
 0x41f   : > { %v1541_v45 = vpop.xlane.xlu0 %649 }
 0x420   : > { %v658_v42 = vsub.f32 %v644_v12, %v1541_v45  ;;  %1318 = vpow2.f32 %v659_v44  ;;  %v652_v30 = vsub.f32 -inf, %v1541_v45 }
 0x422   : > { %v661_v46 = vmul.f32 1.442695, %v658_v42 }
 0x423   : > { %v1544_v47 = vpop.xlane.xlu1 %792 }
 0x424   : > { %v803_v48 = vsub.f32 %v789_v21, %v1544_v47  ;;  %v1315_v49 = vpop.eup %1314  ;;  %1320 = vpow2.f32 %v661_v46  ;;  %v510_v21 = vsub.f32 -inf, %v1532_v35  ;;  %v655_v35 = vmul.f32 1.442695, %v652_v30 }
 0x425   : > { %v1547_v50 = vpop.xlane.xlu0 %795  ;;  %v1317_v51 = vpop.eup %1316  ;;  %v527_v19 = vsel %vm503_vm4, %v1315_v49, 0.0 }
 0x426   : > { %v805_v52 = vmul.f32 1.442695, %v803_v48  ;;  %v804_v53 = vsub.f32 %v790_v23, %v1547_v50  ;;  %v532_v54 = vpack.c.bf16 %v1315_v49, %v1317_v51  ;;  %v524_v18 = vsel %vm503_vm4, %v1317_v51, 0.0 }
 0x427   : > { %v511_v23 = vsub.f32 -inf, %v1535_v37  ;;  %v512_v24 = vmul.f32 1.442695, %v510_v21  ;;  %v797_v37 = vsub.f32 -inf, %v1544_v47  ;;  %v798_v40 = vsub.f32 -inf, %v1547_v50 }
 0x428   : > { %v807_v55 = vmul.f32 1.442695, %v804_v53  ;;  %1322 = vpow2.f32 %v805_v52  ;;  %1235 = vmatmul.mubr.msk.bf16.vlgmr.msra.gmra.mrb[4].mxu0 %vm503_vm4, %v532_v54 }
 0x429   : > { %1246 = vmatprep.mubr.msk.bf16.mxu0 %vm1371_vm1, %v1370_v15  ;;  %v514_v25 = vmul.f32 1.442695, %v511_v23  ;;  %v799_v45 = vmul.f32 1.442695, %v797_v37  ;;  %v801_v46 = vmul.f32 1.442695, %v798_v40 }
 0x42a   : > { %v1319_v56 = vpop.eup %1318  ;;  %1324 = vpow2.f32 %v807_v55 }
 0x42b   : > { %v1553_v57 = vpop.xlane.xlu1 %938  ;;  %v665_v59 = vsel %vm503_vm4, %v1319_v56, 0.0 }
 0x42c   : > { %v949_v58 = vsub.f32 %v935_v31, %v1553_v57  ;;  %666 = vadd.xlane.f32.xlu1 %v665_v59  ;;  %v943_v48 = vsub.f32 -inf, %v1553_v57 }
 0x42d   : > { %v1557_v60 = vpop.xlane.xlu0 %941 }
 0x42e   : > { %v951_v61 = vmul.f32 1.442695, %v949_v58  ;;  %v950_v62 = vsub.f32 %v936_v33, %v1557_v60  ;;  %v1321_v63 = vpop.eup %1320  ;;  %v944_v47 = vsub.f32 -inf, %v1557_v60  ;;  %v945_v52 = vmul.f32 1.442695, %v943_v48 }
 0x42f   : > { %v668_v3 = vsel %vm503_vm4, %v1321_v63, 0.0  ;;  %v673_v6 = vpack.c.bf16 %v1321_v63, %v1319_v56  ;;  %v821_v9 = vpop.permute.xlu1 %820 }
 0x430   : > { %v953_v2 = vmul.f32 1.442695, %v950_v62  ;;  %1326 = vpow2.f32 %v951_v61  ;;  %669 = vadd.xlane.f32.xlu0 %v668_v3  ;;  %v947_v54 = vmul.f32 1.442695, %v944_v47 }
 0x431   : > { %v675_v4 = vpop.permute.xlu0 %674 }
 0x432   : > { %1245 = vmatpush3.bf16.msra.mxu0 %v675_v4  ;;  %v1323_v5 = vpop.eup %1322  ;;  %1328 = vpow2.f32 %v953_v2 }
 0x433   : > { %1256 = vmatprep.subr.bf16.mxu0 %v1370_v15  ;;  %v811_v7 = vsel %vm503_vm4, %v1323_v5, 0.0  ;;  %v967_v16 = vpop.permute.xlu1 %966  ;;  %1330 = vpow2.f32 %v512_v24 }
 0x434   : > { %v1325_v8 = vpop.eup %1324  ;;  %812 = vadd.xlane.f32.xlu0 %v811_v7  ;;  %1332 = vpow2.f32 %v514_v25 }
 0x435   : > { %1247 = vmatmul.mubr.msk.bf16.vlgmr.msra.gmra.mrb[8].mxu0 %vm503_vm4, %v673_v6  ;;  %v814_v10 = vsel %vm503_vm4, %v1325_v8, 0.0  ;;  %v819_v12 = vpack.c.bf16 %v1325_v8, %v1323_v5  ;;  %1334 = vpow2.f32 %v653_v32 }
 0x436   : > { %1257 = vmatpush3.bf16.msra.mxu0 %v821_v9  ;;  %1258 = vmatprep.mubr.msk.bf16.mxu0 %vm1371_vm1, %v1370_v15  ;;  %1336 = vpow2.f32 %v655_v35 }
 0x437   : > { %1268 = vmatprep.subr.bf16.mxu0 %v1370_v15 }
 0x438   : > { %815 = vadd.xlane.f32.xlu0 %v814_v10 }
 0x43a   : > { %v1327_v11 = vpop.eup %1326 }
 0x43b   : > { %v957_v13 = vsel %vm503_vm4, %v1327_v11, 0.0 }
 0x43c   : > { %v1329_v14 = vpop.eup %1328  ;;  %958 = vadd.xlane.f32.xlu1 %v957_v13 }
 0x43d   : > { %1259 = vmatmul.mubr.msk.bf16.vlgmr.msra.gmra.mrb[12].mxu0 %vm503_vm4, %v819_v12  ;;  %v960_v17 = vsel %vm503_vm4, %v1329_v14, 0.0  ;;  %v965_v20 = vpack.c.bf16 %v1329_v14, %v1327_v11  ;;  %v1331_v34 = vpop.eup %1330 }
 0x43e   : > { %1269 = vmatpush3.bf16.msra.mxu0 %v967_v16  ;;  %1270 = vmatprep.mubr.msk.bf16.mxu0 %vm1371_vm1, %v1370_v15  ;;  %v1333_v36 = vpop.eup %1332  ;;  %v522_v39 = vmul.f32 0.0, %v1331_v34 }
 0x43f   : > { %961 = vadd.xlane.f32.xlu0 %v960_v17  ;;  %v523_v44 = vmul.f32 0.0, %v1333_v36  ;;  %v1335_v49 = vpop.eup %1334 }
 0x440   : > { %525 = vadd.xlane.f32.xlu1 %v524_v18  ;;  %v1337_v51 = vpop.eup %1336  ;;  %v663_v53 = vmul.f32 0.0, %v1335_v49 }
 0x441   : > { %v664_v55 = vmul.f32 0.0, %v1337_v51 }
 0x443   : > { %528 = vadd.xlane.f32.xlu0 %v527_v19 }
 0x445   : > { %1271 = vmatmul.mubr.msk.bf16.vlgmr.msra.gmra.mrb[16].mxu0 %vm503_vm4, %v965_v20 }
 0x4b9   : > { %v667_v27 = vpop.xlane.xlu1 %666 }
 0x4ba   : > { %v671_v50 = vadd.f32 %v667_v27, %v663_v53 }
 0x4bd   : > { %v670_v22 = vpop.xlane.xlu0 %669 }
 0x4be   : > { %v672_v62 = vadd.f32 %v670_v22, %v664_v55 }
 0x4c1   : > { %v813_v26 = vpop.xlane.xlu0 %812 }
 0x4c5   : > { %v816_v29 = vpop.xlane.xlu0 %815 }
 0x4c9   : > { %v1580_v31 = vpop.xlane.xlu1 %958 }
 0x4cc   : > { %v1582_v33 = vpop.xlane.xlu0 %961 }
 0x4cd   : > { %v526_v38 = vpop.xlane.xlu1 %525 }
 0x4ce   : > { %v530_v43 = vadd.f32 %v526_v38, %v522_v39 }
 0x4d0   : > { %v529_v41 = vpop.xlane.xlu0 %528  ;;  %1338 = vrcp.f32 %v530_v43 }
 0x4d1   : > { %v531_v42 = vadd.f32 %v529_v41, %v523_v44  ;;  %1340 = vpow2.f32 %v799_v45 }
 0x4d3   : > { %1342 = vrcp.f32 %v531_v42 }
 0x4d4   : > { %1344 = vpow2.f32 %v801_v46 }
 0x4d5   : > { %1346 = vpow2.f32 %v945_v52 }
 0x4d6   : > { %1348 = vpow2.f32 %v947_v54 }
 0x4d7   : > { %1350 = vrcp.f32 %v671_v50 }
 0x4d8   : > { %1352 = vrcp.f32 %v672_v62 }
 0x4da   : > { %v1339_v61 = vpop.eup %1338 }
 0x4db   : > { %v1341_v2 = vpop.eup %1340 }
 0x4dc   : > { %v809_v7 = vmul.f32 0.0, %v1341_v2 }
 0x4dd   : > { %v1343_v5 = vpop.eup %1342 }
 0x4de   : > { %v1345_v60 = vpop.eup %1344  ;;  %v817_v9 = vadd.f32 %v813_v26, %v809_v7 }
 0x4df   : > { %v810_v10 = vmul.f32 0.0, %v1345_v60  ;;  %v1347_v12 = vpop.eup %1346 }
 0x4e0   : > { %1354 = vrcp.f32 %v817_v9  ;;  %v1349_v14 = vpop.eup %1348  ;;  %v955_v19 = vmul.f32 0.0, %v1347_v12 }
 0x4e1   : > { %v818_v11 = vadd.f32 %v816_v29, %v810_v10  ;;  %v1351_v18 = vpop.eup %1350  ;;  %v956_v26 = vmul.f32 0.0, %v1349_v14 }
 0x4e2   : > { %v1353_v24 = vpop.eup %1352  ;;  %v963_v25 = vadd.f32 %v1580_v31, %v955_v19  ;;  %v1308_v31 = vld [vmem:[%s1620_s6] sm:$0xff]  }
 0x4e3   : > { %1356 = vrcp.f32 %v818_v11  ;;  %v964_v28 = vadd.f32 %v1582_v33, %v956_v26  ;;  %1275 = vmatpush3.bf16.msra.mxu1 %v1308_v31  ;;  %v1309_v33 = vld [vmem:[%s1620_s6 + $0x8] sm:$0xff]  }
 0x4e4   : > { %1358 = vrcp.f32 %v963_v25  ;;  %1276 = vmatprep.subr.bf16.mxu1 %v1370_v15 }
 0x4e5   : > { %1360 = vrcp.f32 %v964_v28 }
 0x4e7   : > { %1277 = vmatpush3.bf16.msra.mxu1 %v1309_v33 }
 0x4ea   : > { %v1355_v35 = vpop.eup %1354 }
 0x4ed   : > { %v1357_v40 = vpop.eup %1356 }
 0x4ee   : > { %v1359_v46 = vpop.eup %1358 }
 0x4ef   : > { %v1361_v52 = vpop.eup %1360 }
 0x4fb   : > { %v573_v56 = vpop.f32.mrb[4].mxu0 }
 0x4fc   : > { %v580_v58 = vadd.f32 %v573_v56, %v522_v39  ;;  %v1236_v59 = vpop.f32.mrb[5].mxu0 }
 0x4fd   : > { %v576_v63 = vpop.f32.mrb[6].mxu0  ;;  %v1191_v59 = vld [vmem:[%s1621_s7] ss:$0 sm:$0xff] }
 0x4fe   : > { %v583_v57 = vmul.f32 %v1339_v61, %v580_v58  ;;  %v581_v3 = vadd.f32 %v576_v63, %v523_v44  ;;  %v1237_v4 = vpop.f32.mrb[7].mxu0 }
 0x500   : > { %v585_v6 = vmul.f32 %v1343_v5, %v581_v3 }
 0x502   : > { %v586_v8 = vpack.c.bf16 %v585_v6, %v583_v57 }
 0x504   : > { %587 = vst.msk [vmem:[#allocation3] sm:$0xff] %vm445_vm3, %v586_v8 }
 0x508   : > { %v714_v13 = vpop.f32.mrb[8].mxu0 }
 0x509   : > { %v721_v16 = vadd.f32 %v714_v13, %v663_v53  ;;  %v1248_v17 = vpop.f32.mrb[9].mxu0 }
 0x50a   : > { %v717_v20 = vpop.f32.mrb[10].mxu0 }
 0x50b   : > { %v724_v21 = vmul.f32 %v1351_v18, %v721_v16  ;;  %v722_v22 = vadd.f32 %v717_v20, %v664_v55  ;;  %v1249_v23 = vpop.f32.mrb[11].mxu0 }
 0x50d   : > { %v726_v27 = vmul.f32 %v1353_v24, %v722_v22 }
 0x50f   : > { %v727_v29 = vpack.c.bf16 %v726_v27, %v724_v21 }
 0x510   : > { %v860_v30 = vpop.f32.mrb[12].mxu0 }
 0x511   : > { %v867_v32 = vadd.f32 %v860_v30, %v809_v7  ;;  %729 = vrot.lane.b32.xlu1 %v727_v29, %s1383_s16  ;;  %v1260_v34 = vpop.f32.mrb[13].mxu0 }
 0x512   : > { %v863_v36 = vpop.f32.mrb[14].mxu0 }
 0x513   : > { %v870_v37 = vmul.f32 %v1355_v35, %v867_v32  ;;  %v868_v38 = vadd.f32 %v863_v36, %v810_v10  ;;  %v1261_v39 = vpop.f32.mrb[15].mxu0 }
 0x515   : > { %v872_v41 = vmul.f32 %v1357_v40, %v868_v38 }
 0x517   : > { %v873_v43 = vpack.c.bf16 %v872_v41, %v870_v37 }
 0x518   : > { %v1006_v44 = vpop.f32.mrb[16].mxu0 }
 0x519   : > { %v1013_v45 = vadd.f32 %v1006_v44, %v955_v19  ;;  %875 = vrot.lane.b32.xlu0 %v873_v43, %s1384_s21  ;;  %v1272_v42 = vpop.f32.mrb[17].mxu0 }
 0x51a   : > { %v1009_v48 = vpop.f32.mrb[18].mxu0 }
 0x51b   : > { %v1016_v49 = vmul.f32 %v1359_v46, %v1013_v45  ;;  %v1014_v47 = vadd.f32 %v1009_v48, %v956_v26  ;;  %v1273_v51 = vpop.f32.mrb[19].mxu0 }
 0x51d   : > { %v1018_v53 = vmul.f32 %v1361_v52, %v1014_v47 }
 0x51f   : > { %v1019_v54 = vpack.c.bf16 %v1018_v53, %v1016_v49 }
 0x521   : > { %1021 = vrot.lane.b32.xlu1 %v1019_v54, %s1385_s22 }
 0x583   : > { %v730_v50 = vpop.permute.xlu1 %729 }
 0x584   : > { %733 = vst.msk [vmem:[#allocation3] sm:$0xff] %vm732_vm5, %v730_v50 }
 0x58b   : > { %v876_v15 = vpop.permute.xlu0 %875 }
 0x58c   : > { %879 = vst.msk [vmem:[#allocation3] sm:$0xff] %vm878_vm6, %v876_v15 }
 0x593   : > { %v1022_v55 = vpop.permute.xlu1 %1021 }
 0x594   : > { %1025 = vst.msk [vmem:[#allocation3] sm:$0xff] %vm1024_vm7, %v1022_v55 }
 0x59b   : > { %v1026_v56 = vld [vmem:[#allocation3] sm:$0xff] }
 0x59c   : > { %1279 = vmatmul.mubr.msk.bf16.vlgmr.msra.gmra.mrb[16].mxu1 %vm325_vm0, %v1026_v56 }
 0x66f   : > { %v1080_v58 = vpop.f32.mrb[16].mxu1 }
 0x670   : > { %v1087_v61 = vadd.f32 %v1080_v58, %v1447_v0  ;;  %v1280_v62 = vpop.f32.mrb[17].mxu1 }
 0x671   : > { %v1083_v63 = vpop.f32.mrb[18].mxu1 }
 0x672   : > { %v1096_v2 = vadd.f32 %v1191_v59, %v1087_v61  ;;  %v1088_v57 = vadd.f32 %v1083_v63, %v1449_v1  ;;  %v1281_v3 = vpop.f32.mrb[19].mxu1 }
 0x674   : > { %1098 = vst.msk [vmem:[%s319_s30] sm:$0xff] %vm325_vm0, %v1096_v2  ;;  %v1097_v4 = vadd.f32 %v1191_v59, %v1088_v57 }
 0x676   : > { %1099 = vst.msk [vmem:[%s319_s30 + $0x8] sm:$0xff] %vm325_vm0, %v1097_v4 }
 0x677 PF: > { %s18_s27 = sadd.s32 1, %s1368_s27  }
 0x678   : > { %p15_p4 = scmp.ge.s32.totalorder %s18_s27, 4  }
 0x67a   :  { %17 = sbr.rel (!%p15_p4) target bundleno = 1 (0x1), region = 85 }

// kernel: transformer_encoder_forward.12
= control target key start
LH: loop header
LB: loop body
LE: loop exit
PB: predicated region body
PF: predicated region fallthrough
CT: control target
= control target key end

     0   :  { %s795_s30 = smov 0   ;;  %s876_s0 = inlined_call_operand.vmem [shape: f32[32,32], index: 0, kind: input, shape index: {}]   ;;  %s877_s1 = inlined_call_operand.vmem [shape: f32[1,32], index: 1, kind: input, shape index: {}]   ;;  %s878_s2 = inlined_call_operand.vmem [shape: f32[1,32], index: 2, kind: input, shape index: {}]   ;;  %s879_s3 = inlined_call_operand.vmem [shape: bf16[32,64], index: 3, kind: input, shape index: {}]   ;;  %s880_s4 = inlined_call_operand.vmem [shape: f32[1,64], index: 4, kind: input, shape index: {}]   ;;  %s881_s5 = inlined_call_operand.vmem [shape: bf16[64,32], index: 5, kind: input, shape index: {}]   ;;  %s882_s6 = inlined_call_operand.vmem [shape: f32[1,32], index: 6, kind: input, shape index: {}]   ;;  %s883_s7 = inlined_call_operand.vmem [shape: f32[1,32], index: 7, kind: input, shape index: {}]   ;;  %s884_s8 = inlined_call_operand.vmem [shape: f32[1,32], index: 8, kind: input, shape index: {}]   ;;  %s885_s9 = inlined_call_operand.vmem [shape: f32[32,32], index: 9, kind: output, shape index: {}]  }
   0x1 LB: > { %s654_s10 = sadd.s32 4294967295, %s741_s30   ;;  %p658_p0 = scmp.ge.s32.totalorder %s741_s30, 1  ;;  %s741_s30 = sphi %s795_s30, %s19_s30  }
   0x2   : > { %p288_p1 = scmp.lt.s32.totalorder %s741_s30, 3 }
   0x4   : > { %p289_p2 = pnand %p658_p0, %p288_p1 }
   0x5   : > { %s659_s11 = sshll.u32 (!%p289_p2), %s654_s10, 1  ;;  %vm341_vm0 = vcmask (!%p289_p2), 261120   ;;  %v717_v14 = vld [vmem:[%s879_s3] sm:$0xff] (!%p289_p2)   ;;  %v743_v15 = vmov (!%p289_p2), 0.0   ;;  %v718_v16 = vld [vmem:[%s879_s3 + $0x8] sm:$0xff] (!%p289_p2)   ;;  %vm744_vm1 = vmmov (!%p289_p2), 0  }
   0x6   : > { %292 = sbr.rel (%p289_p2) target bundleno = 1107 (0x453), region = 56  ;;  %p325_p3 = scmp.lt.s32.totalorder (!%p289_p2), %s659_s11, 3  ;;  %687 = vmatprep.subr.bf16.mxu0 (!%p289_p2), %v743_v15  ;;  %695 = vmatprep.subr.bf16.mxu1 (!%p289_p2), %v743_v15  ;;  %v663_v25 = vld [vmem:[%s877_s1] ss:$0 sm:$0xff] (!%p289_p2)  ;;  %v720_v35 = vld [vmem:[%s881_s5 + $0x8] sm:$0xff] (!%p289_p2)   ;;  %v721_v36 = vld [vmem:[%s881_s5 + $0x10] sm:$0xff] (!%p289_p2)  }
   0x7   : > { %688 = vmatpush3.bf16.msra.mxu0 (!%p289_p2), %v717_v14  ;;  %691 = vmatprep.mubr.msk.bf16.mxu0 (!%p289_p2), %vm744_vm1, %v743_v15  ;;  %v664_v29 = vld [vmem:[%s878_s2] ss:$0 sm:$0xff] (!%p289_p2)  ;;  %v722_v37 = vld [vmem:[%s881_s5 + $0x18] sm:$0xff] (!%p289_p2)   ;;  %vm503_vm2 = vcmask (!%p289_p2), 523264  }
   0x8   : > { %689 = vmatprep.subr.bf16.mxu0 (!%p289_p2), %v743_v15  ;;  %703 = vmatprep.mubr.msk.bf16.mxu1 (!%p289_p2), %vm744_vm1, %v743_v15  ;;  %v719_v34 = vld [vmem:[%s881_s5] sm:$0xff] (!%p289_p2)  }
   0x9   : > { %696 = vmatpush3.bf16.msra.mxu1 (!%p289_p2), %v719_v34  ;;  %v665_v38 = vld [vmem:[%s880_s4] ss:$0 sm:$0xff] (!%p289_p2) }
   0xa   : > { %697 = vmatprep.subr.bf16.mxu1 (!%p289_p2), %v743_v15  ;;  %v669_v56 = vld [vmem:[%s882_s6] ss:$0 sm:$0xff] (!%p289_p2) }
   0xb   : > { %690 = vmatpush3.bf16.msra.mxu0 (!%p289_p2), %v718_v16 }
   0xd   : > { %s887_s11 = smov (!%p325_p3, %s659_s11), 3  ;;  %698 = vmatpush3.bf16.msra.mxu1 %v720_v35 }
   0xe   : > { %s660_s12 = sshll.u32 %s887_s11, 3  ;;  %699 = vmatprep.subr.bf16.mxu1 %v743_v15 }
   0xf   : > { %s328_s15 = scalar_lea.vmem %s876_s0, %s660_s12  ;;  %s334_s24 = scalar_lea.vmem %s885_s9, %s660_s12 }
  0x10   : > { %v811_v0 = vld [vmem:[%s328_s15] sm:$0xff]  ;;  %v813_v1 = vld [vmem:[%s328_s15 + $0x8] sm:$0xff] }
  0x11   : > { %v342_v2 = vsel %vm341_vm0, %v811_v0, 0.0  ;;  %v345_v3 = vsel %vm341_vm0, %v813_v1, 0.0  ;;  %700 = vmatpush3.bf16.msra.mxu1 %v721_v36 }
  0x12   : > { %343 = vadd.xlane.f32.xlu0 %v342_v2  ;;  %701 = vmatprep.subr.bf16.mxu1 %v743_v15 }
  0x15   : > { %702 = vmatpush3.bf16.msra.mxu1 %v722_v37 }
  0x16   : > { %346 = vadd.xlane.f32.xlu0 %v345_v3 }
  0x9f   : > { %v344_v4 = vpop.xlane.xlu0 %343 }
  0xa0   : > { %v349_v5 = vmul.f32 0.03125, %v344_v4 }
  0xa2   : > { %v351_v6 = vsub.f32 %v811_v0, %v349_v5 }
  0xa3   : > { %v347_v7 = vpop.xlane.xlu0 %346 }
  0xa4   : > { %v350_v8 = vmul.f32 0.03125, %v347_v7  ;;  %v353_v9 = vmul.f32 %v351_v6, %v351_v6 }
  0xa6   : > { %v352_v10 = vsub.f32 %v813_v1, %v350_v8  ;;  %v355_v11 = vsel %vm341_vm0, %v353_v9, 0.0 }
  0xa7   : > { %356 = vadd.xlane.f32.xlu1 %v355_v11 }
  0xa8   : > { %v354_v12 = vmul.f32 %v352_v10, %v352_v10 }
  0xaa   : > { %v358_v13 = vsel %vm341_vm0, %v354_v12, 0.0 }
  0xab   : > { %359 = vadd.xlane.f32.xlu1 %v358_v13 }
 0x134   : > { %v357_v17 = vpop.xlane.xlu1 %356 }
 0x135   : > { %v361_v18 = vmul.f32 0.03125, %v357_v17 }
 0x137   : > { %v363_v19 = vadd.f32 1e-05, %v361_v18 }
 0x138   : > { %v360_v20 = vpop.xlane.xlu1 %359 }
 0x139   : > { %723 = vrsqrt.f32 %v363_v19  ;;  %v362_v21 = vmul.f32 0.03125, %v360_v20 }
 0x13b   : > { %v364_v22 = vadd.f32 1e-05, %v362_v21 }
 0x13d   : > { %725 = vrsqrt.f32 %v364_v22  ;;  %v675_v22 = vld [vmem:[%s883_s7] ss:$0 sm:$0xff] }
 0x143   : > { %v724_v23 = vpop.eup %723 }
 0x144   : > { %v367_v24 = vmul.f32 %v724_v23, %v351_v6 }
 0x146   : > { %v375_v28 = vmul.f32 %v663_v25, %v367_v24 }
 0x147   : > { %v726_v26 = vpop.eup %725 }
 0x148   : > { %v368_v27 = vmul.f32 %v726_v26, %v352_v10  ;;  %v383_v31 = vadd.f32 %v664_v29, %v375_v28 }
 0x14a   : > { %v376_v30 = vmul.f32 %v663_v25, %v368_v27  ;;  %v676_v25 = vld [vmem:[%s884_s8] ss:$0 sm:$0xff] }
 0x14c   : > { %v384_v32 = vadd.f32 %v664_v29, %v376_v30 }
 0x14e   : > { %v389_v33 = vpack.c.bf16 %v384_v32, %v383_v31 }
 0x150   : > { %692 = vmatmul.mubr.msk.bf16.vlgmr.msra.gmra.mrb[0].mxu0 %vm341_vm0, %v389_v33 }
 0x223   : > { %v446_v39 = vpop.f32.mrb[0].mxu0 }
 0x224   : > { %v447_v40 = vadd.f32 %v665_v38, %v446_v39  ;;  %v693_v41 = vpop.f32.mrb[1].mxu0 }
 0x225   : > { %v449_v42 = vpop.f32.mrb[2].mxu0 }
 0x226   : > { %v453_v43 = vmul.f32 0.5, %v447_v40  ;;  %v450_v44 = vadd.f32 %v665_v38, %v449_v42  ;;  %v694_v45 = vpop.f32.mrb[3].mxu0 }
 0x228   : > { %727 = vtanh.f32 %v453_v43  ;;  %v454_v46 = vmul.f32 0.5, %v450_v44 }
 0x22a   : > { %729 = vtanh.f32 %v454_v46 }
 0x232   : > { %v728_v47 = vpop.eup %727 }
 0x233   : > { %v457_v48 = vadd.f32 1.0, %v728_v47 }
 0x234   : > { %v730_v49 = vpop.eup %729 }
 0x235   : > { %v459_v50 = vmul.f32 0.5, %v457_v48  ;;  %v458_v51 = vadd.f32 1.0, %v730_v49 }
 0x237   : > { %v460_v52 = vmul.f32 0.5, %v458_v51  ;;  %v461_v53 = vmul.f32 %v459_v50, %v447_v40 }
 0x239   : > { %v462_v54 = vmul.f32 %v460_v52, %v450_v44 }
 0x23b   : > { %v471_v55 = vpack.c.bf16 %v462_v54, %v461_v53 }
 0x23d   : > { %704 = vmatmul.mubr.msk.bf16.vlgmr.msra.gmra.mrb[0].mxu1 %vm503_vm2, %v471_v55 }
 0x310   : > { %v541_v57 = vpop.f32.mrb[0].mxu1 }
 0x311   : > { %v542_v58 = vadd.f32 %v669_v56, %v541_v57  ;;  %v705_v59 = vpop.f32.mrb[1].mxu1 }
 0x312   : > { %v544_v60 = vpop.f32.mrb[2].mxu1 }
 0x313   : > { %v548_v61 = vmul.f32 0.5, %v542_v58  ;;  %v545_v62 = vadd.f32 %v669_v56, %v544_v60  ;;  %v706_v63 = vpop.f32.mrb[3].mxu1 }
 0x315   : > { %v549_v2 = vmul.f32 0.5, %v545_v62  ;;  %v550_v3 = vadd.f32 %v548_v61, %v811_v0 }
 0x317   : > { %v554_v4 = vsel %vm341_vm0, %v550_v3, 0.0  ;;  %v551_v5 = vadd.f32 %v549_v2, %v813_v1 }
 0x318   : > { %555 = vadd.xlane.f32.xlu0 %v554_v4 }
 0x319   : > { %v557_v6 = vsel %vm341_vm0, %v551_v5, 0.0 }
 0x31a   : > { %558 = vadd.xlane.f32.xlu1 %v557_v6 }
 0x3a5   : > { %v556_v7 = vpop.xlane.xlu0 %555 }
 0x3a6   : > { %v560_v8 = vmul.f32 0.03125, %v556_v7 }
 0x3a7   : > { %v559_v9 = vpop.xlane.xlu1 %558 }
 0x3a8   : > { %v562_v10 = vsub.f32 %v550_v3, %v560_v8  ;;  %v561_v11 = vmul.f32 0.03125, %v559_v9 }
 0x3aa   : > { %v563_v12 = vsub.f32 %v551_v5, %v561_v11  ;;  %v564_v13 = vmul.f32 %v562_v10, %v562_v10 }
 0x3ac   : > { %v566_v14 = vsel %vm341_vm0, %v564_v13, 0.0  ;;  %v565_v15 = vmul.f32 %v563_v12, %v563_v12 }
 0x3ad   : > { %567 = vadd.xlane.f32.xlu0 %v566_v14 }
 0x3ae   : > { %v569_v0 = vsel %vm341_vm0, %v565_v15, 0.0 }
 0x3af   : > { %570 = vadd.xlane.f32.xlu1 %v569_v0 }
 0x43a   : > { %v568_v1 = vpop.xlane.xlu0 %567 }
 0x43b   : > { %v572_v16 = vmul.f32 0.03125, %v568_v1 }
 0x43c   : > { %v571_v17 = vpop.xlane.xlu1 %570 }
 0x43d   : > { %v574_v18 = vadd.f32 1e-05, %v572_v16  ;;  %v573_v19 = vmul.f32 0.03125, %v571_v17 }
 0x43f   : > { %731 = vrsqrt.f32 %v574_v18  ;;  %v575_v20 = vadd.f32 1e-05, %v573_v19 }
 0x441   : > { %733 = vrsqrt.f32 %v575_v20 }
 0x449   : > { %v732_v21 = vpop.eup %731 }
 0x44a   : > { %v578_v23 = vmul.f32 %v732_v21, %v562_v10 }
 0x44b   : > { %v734_v24 = vpop.eup %733 }
 0x44c   : > { %v586_v26 = vmul.f32 %v675_v22, %v578_v23  ;;  %v579_v27 = vmul.f32 %v734_v24, %v563_v12 }
 0x44e   : > { %v594_v28 = vadd.f32 %v676_v25, %v586_v26  ;;  %v587_v29 = vmul.f32 %v675_v22, %v579_v27 }
 0x450   : > { %596 = vst.msk [vmem:[%s334_s24] sm:$0xff] %vm341_vm0, %v594_v28  ;;  %v595_v30 = vadd.f32 %v676_v25, %v587_v29 }
 0x452   : > { %597 = vst.msk [vmem:[%s334_s24 + $0x8] sm:$0xff] %vm341_vm0, %v595_v30 }
 0x453 PF: > { %s19_s30 = sadd.s32 1, %s741_s30  }
 0x454   : > { %p16_p4 = scmp.ge.s32.totalorder %s19_s30, 4  }
 0x456   :  { %18 = sbr.rel (!%p16_p4) target bundleno = 1 (0x1), region = 86 }

// kernel: transformer_encoder_forward.17
= control target key start
LH: loop header
LB: loop body
LE: loop exit
PB: predicated region body
PF: predicated region fallthrough
CT: control target
= control target key end

     0   :  { %s333_s12 = smov 0   ;;  %s369_s0 = inlined_call_operand.vmem [shape: f32[32,32], index: 0, kind: input, shape index: {}]   ;;  %s370_s1 = inlined_call_operand.vmem [shape: f32[1,32], index: 1, kind: input, shape index: {}]   ;;  %s371_s2 = inlined_call_operand.vmem [shape: f32[1,32], index: 2, kind: input, shape index: {}]   ;;  %s372_s3 = inlined_call_operand.vmem [shape: f32[32,32], index: 3, kind: output, shape index: {}]  }
   0x1 LB: > { %s280_s13 = sadd.s32 4294967295, %s311_s12   ;;  %p284_p0 = scmp.ge.s32.totalorder %s311_s12, 1  ;;  %s311_s12 = sphi %s333_s12, %s13_s12  }
   0x2   : > { %p138_p1 = scmp.lt.s32.totalorder %s311_s12, 3 }
   0x4   : > { %p139_p2 = pnand %p284_p0, %p138_p1 }
   0x5   : > { %s285_s14 = sshll.u32 (!%p139_p2), %s280_s13, 1  ;;  %vm178_vm0 = vcmask (!%p139_p2), 261120   ;;  %v289_v21 = vld [vmem:[%s370_s1] ss:$0 sm:$0xff] (!%p139_p2) }
   0x6   : > { %142 = sbr.rel (%p139_p2) target bundleno = 335 (0x14f), region = 32  ;;  %p163_p3 = scmp.lt.s32.totalorder (!%p139_p2), %s285_s14, 3  ;;  %v290_v23 = vld [vmem:[%s371_s2] ss:$0 sm:$0xff] (!%p139_p2) }
   0xd   : > { %s374_s14 = smov (!%p163_p3, %s285_s14), 3 }
   0xe   : > { %s286_s15 = sshll.u32 %s374_s14, 3 }
   0xf   : > { %s166_s18 = scalar_lea.vmem %s369_s0, %s286_s15  ;;  %s172_s25 = scalar_lea.vmem %s372_s3, %s286_s15 }
  0x10   : > { %v174_v0 = vld [vmem:[%s166_s18] sm:$0xff]  ;;  %v175_v1 = vld [vmem:[%s166_s18 + $0x8] sm:$0xff] }
  0x11   : > { %v179_v2 = vsel %vm178_vm0, %v174_v0, 0.0  ;;  %v182_v3 = vsel %vm178_vm0, %v175_v1, 0.0 }
  0x12   : > { %180 = vadd.xlane.f32.xlu0 %v179_v2 }
  0x16   : > { %183 = vadd.xlane.f32.xlu0 %v182_v3 }
  0x9f   : > { %v181_v4 = vpop.xlane.xlu0 %180 }
  0xa0   : > { %v186_v5 = vmul.f32 0.03125, %v181_v4 }
  0xa2   : > { %v188_v6 = vsub.f32 %v174_v0, %v186_v5 }
  0xa3   : > { %v184_v7 = vpop.xlane.xlu0 %183 }
  0xa4   : > { %v187_v8 = vmul.f32 0.03125, %v184_v7  ;;  %v190_v9 = vmul.f32 %v188_v6, %v188_v6 }
  0xa6   : > { %v189_v10 = vsub.f32 %v175_v1, %v187_v8  ;;  %v192_v11 = vsel %vm178_vm0, %v190_v9, 0.0 }
  0xa7   : > { %193 = vadd.xlane.f32.xlu1 %v192_v11 }
  0xa8   : > { %v191_v12 = vmul.f32 %v189_v10, %v189_v10 }
  0xaa   : > { %v195_v13 = vsel %vm178_vm0, %v191_v12, 0.0 }
  0xab   : > { %196 = vadd.xlane.f32.xlu1 %v195_v13 }
 0x134   : > { %v194_v14 = vpop.xlane.xlu1 %193 }
 0x135   : > { %v198_v15 = vmul.f32 0.03125, %v194_v14 }
 0x137   : > { %v200_v16 = vadd.f32 1e-06, %v198_v15 }
 0x138   : > { %v197_v17 = vpop.xlane.xlu1 %196 }
 0x139   : > { %301 = vrsqrt.f32 %v200_v16  ;;  %v199_v18 = vmul.f32 0.03125, %v197_v17 }
 0x13b   : > { %v201_v19 = vadd.f32 1e-06, %v199_v18 }
 0x13d   : > { %303 = vrsqrt.f32 %v201_v19 }
 0x143   : > { %v302_v20 = vpop.eup %301 }
 0x144   : > { %v204_v22 = vmul.f32 %v302_v20, %v188_v6 }
 0x146   : > { %v212_v24 = vmul.f32 %v289_v21, %v204_v22 }
 0x147   : > { %v304_v25 = vpop.eup %303 }
 0x148   : > { %v220_v26 = vadd.f32 %v290_v23, %v212_v24  ;;  %v205_v27 = vmul.f32 %v304_v25, %v189_v10 }
 0x14a   : > { %222 = vst.msk [vmem:[%s172_s25] sm:$0xff] %vm178_vm0, %v220_v26  ;;  %v213_v28 = vmul.f32 %v289_v21, %v205_v27 }
 0x14c   : > { %v221_v29 = vadd.f32 %v290_v23, %v213_v28 }
 0x14e   : > { %223 = vst.msk [vmem:[%s172_s25 + $0x8] sm:$0xff] %vm178_vm0, %v221_v29 }
 0x14f PF: > { %s13_s12 = sadd.s32 1, %s311_s12  }
 0x150   : > { %p10_p4 = scmp.ge.s32.totalorder %s13_s12, 4  }
 0x152   :  { %12 = sbr.rel (!%p10_p4) target bundleno = 1 (0x1), region = 62 }

// kernel: transformer_encoder_forward.13
= control target key start
LH: loop header
LB: loop body
LE: loop exit
PB: predicated region body
PF: predicated region fallthrough
CT: control target
= control target key end

     0   :  { %s745_s30 = smov 0   ;;  %s816_s0 = inlined_call_operand.vmem [shape: f32[32,32], index: 0, kind: input, shape index: {}]   ;;  %s817_s1 = inlined_call_operand.vmem [shape: f32[1,32], index: 1, kind: input, shape index: {}]   ;;  %s818_s2 = inlined_call_operand.vmem [shape: f32[1,32], index: 2, kind: input, shape index: {}]   ;;  %s819_s3 = inlined_call_operand.vmem [shape: bf16[32,64], index: 3, kind: input, shape index: {}]   ;;  %s820_s4 = inlined_call_operand.vmem [shape: f32[1,64], index: 4, kind: input, shape index: {}]   ;;  %s821_s5 = inlined_call_operand.vmem [shape: bf16[64,32], index: 5, kind: input, shape index: {}]   ;;  %s822_s6 = inlined_call_operand.vmem [shape: f32[1,32], index: 6, kind: input, shape index: {}]   ;;  %s823_s7 = inlined_call_operand.vmem [shape: f32[1,32], index: 7, kind: input, shape index: {}]   ;;  %s824_s8 = inlined_call_operand.vmem [shape: f32[1,32], index: 8, kind: input, shape index: {}]   ;;  %s825_s9 = inlined_call_operand.vmem [shape: f32[32,32], index: 9, kind: output, shape index: {}]  }
   0x1 LB: > { %s610_s10 = sadd.s32 4294967295, %s691_s30   ;;  %p614_p0 = scmp.ge.s32.totalorder %s691_s30, 1  ;;  %s691_s30 = sphi %s745_s30, %s19_s30  }
   0x2   : > { %p288_p1 = scmp.lt.s32.totalorder %s691_s30, 3 }
   0x4   : > { %p289_p2 = pnand %p614_p0, %p288_p1 }
   0x5   : > { %s615_s7 = sshll.u32 (!%p289_p2), %s610_s10, 1  ;;  %vm341_vm0 = vcmask (!%p289_p2), 261120   ;;  %v671_v14 = vld [vmem:[%s819_s3] sm:$0xff] (!%p289_p2)   ;;  %v693_v15 = vmov (!%p289_p2), 0.0   ;;  %v672_v16 = vld [vmem:[%s819_s3 + $0x8] sm:$0xff] (!%p289_p2)   ;;  %vm694_vm1 = vmmov (!%p289_p2), 0  }
   0x6   : > { %292 = sbr.rel (%p289_p2) target bundleno = 794 (0x31a), region = 56  ;;  %p325_p3 = scmp.lt.s32.totalorder (!%p289_p2), %s615_s7, 3  ;;  %641 = vmatprep.subr.bf16.mxu0 (!%p289_p2), %v693_v15  ;;  %649 = vmatprep.subr.bf16.mxu1 (!%p289_p2), %v693_v15  ;;  %v619_v25 = vld [vmem:[%s817_s1] ss:$0 sm:$0xff] (!%p289_p2)  ;;  %v674_v35 = vld [vmem:[%s821_s5 + $0x8] sm:$0xff] (!%p289_p2)   ;;  %v675_v36 = vld [vmem:[%s821_s5 + $0x10] sm:$0xff] (!%p289_p2)  }
   0x7   : > { %642 = vmatpush3.bf16.msra.mxu0 (!%p289_p2), %v671_v14  ;;  %645 = vmatprep.mubr.msk.bf16.mxu0 (!%p289_p2), %vm694_vm1, %v693_v15  ;;  %v620_v29 = vld [vmem:[%s818_s2] ss:$0 sm:$0xff] (!%p289_p2)  ;;  %v676_v37 = vld [vmem:[%s821_s5 + $0x18] sm:$0xff] (!%p289_p2)   ;;  %vm503_vm2 = vcmask (!%p289_p2), 523264  }
   0x8   : > { %643 = vmatprep.subr.bf16.mxu0 (!%p289_p2), %v693_v15  ;;  %657 = vmatprep.mubr.msk.bf16.mxu1 (!%p289_p2), %vm694_vm1, %v693_v15  ;;  %v673_v34 = vld [vmem:[%s821_s5] sm:$0xff] (!%p289_p2)  }
   0x9   : > { %650 = vmatpush3.bf16.msra.mxu1 (!%p289_p2), %v673_v34  ;;  %v621_v38 = vld [vmem:[%s820_s4] ss:$0 sm:$0xff] (!%p289_p2) }
   0xa   : > { %651 = vmatprep.subr.bf16.mxu1 (!%p289_p2), %v693_v15  ;;  %v625_v56 = vld [vmem:[%s822_s6] ss:$0 sm:$0xff] (!%p289_p2) }
   0xb   : > { %644 = vmatpush3.bf16.msra.mxu0 (!%p289_p2), %v672_v16 }
   0xd   : > { %s827_s7 = smov (!%p325_p3, %s615_s7), 3  ;;  %652 = vmatpush3.bf16.msra.mxu1 %v674_v35 }
   0xe   : > { %s616_s8 = sshll.u32 %s827_s7, 3  ;;  %653 = vmatprep.subr.bf16.mxu1 %v693_v15 }
   0xf   : > { %s328_s13 = scalar_lea.vmem %s816_s0, %s616_s8  ;;  %s334_s16 = scalar_lea.vmem %s825_s9, %s616_s8 }
  0x10   : > { %v761_v0 = vld [vmem:[%s328_s13] sm:$0xff]  ;;  %v763_v1 = vld [vmem:[%s328_s13 + $0x8] sm:$0xff] }
  0x11   : > { %v342_v2 = vsel %vm341_vm0, %v761_v0, 0.0  ;;  %v345_v3 = vsel %vm341_vm0, %v763_v1, 0.0  ;;  %654 = vmatpush3.bf16.msra.mxu1 %v675_v36 }
  0x12   : > { %343 = vadd.xlane.f32.xlu0 %v342_v2  ;;  %655 = vmatprep.subr.bf16.mxu1 %v693_v15 }
  0x15   : > { %656 = vmatpush3.bf16.msra.mxu1 %v676_v37 }
  0x16   : > { %346 = vadd.xlane.f32.xlu0 %v345_v3 }
  0x9f   : > { %v344_v4 = vpop.xlane.xlu0 %343 }
  0xa0   : > { %v349_v5 = vmul.f32 0.03125, %v344_v4 }
  0xa2   : > { %v351_v6 = vsub.f32 %v761_v0, %v349_v5 }
  0xa3   : > { %v347_v7 = vpop.xlane.xlu0 %346 }
  0xa4   : > { %v350_v8 = vmul.f32 0.03125, %v347_v7  ;;  %v353_v9 = vmul.f32 %v351_v6, %v351_v6 }
  0xa6   : > { %v352_v10 = vsub.f32 %v763_v1, %v350_v8  ;;  %v355_v11 = vsel %vm341_vm0, %v353_v9, 0.0 }
  0xa7   : > { %356 = vadd.xlane.f32.xlu1 %v355_v11 }
  0xa8   : > { %v354_v12 = vmul.f32 %v352_v10, %v352_v10 }
  0xaa   : > { %v358_v13 = vsel %vm341_vm0, %v354_v12, 0.0 }
  0xab   : > { %359 = vadd.xlane.f32.xlu1 %v358_v13 }
 0x134   : > { %v357_v17 = vpop.xlane.xlu1 %356 }
 0x135   : > { %v361_v18 = vmul.f32 0.03125, %v357_v17 }
 0x137   : > { %v363_v19 = vadd.f32 1e-05, %v361_v18 }
 0x138   : > { %v360_v20 = vpop.xlane.xlu1 %359 }
 0x139   : > { %677 = vrsqrt.f32 %v363_v19  ;;  %v362_v21 = vmul.f32 0.03125, %v360_v20 }
 0x13b   : > { %v364_v22 = vadd.f32 1e-05, %v362_v21 }
 0x13d   : > { %679 = vrsqrt.f32 %v364_v22 }
 0x143   : > { %v678_v23 = vpop.eup %677 }
 0x144   : > { %v367_v24 = vmul.f32 %v678_v23, %v351_v6 }
 0x146   : > { %v375_v28 = vmul.f32 %v619_v25, %v367_v24 }
 0x147   : > { %v680_v26 = vpop.eup %679 }
 0x148   : > { %v368_v27 = vmul.f32 %v680_v26, %v352_v10  ;;  %v383_v31 = vadd.f32 %v620_v29, %v375_v28 }
 0x14a   : > { %v376_v30 = vmul.f32 %v619_v25, %v368_v27 }
 0x14c   : > { %v384_v32 = vadd.f32 %v620_v29, %v376_v30 }
 0x14e   : > { %v389_v33 = vpack.c.bf16 %v384_v32, %v383_v31 }
 0x150   : > { %646 = vmatmul.mubr.msk.bf16.vlgmr.msra.gmra.mrb[0].mxu0 %vm341_vm0, %v389_v33 }
 0x223   : > { %v446_v39 = vpop.f32.mrb[0].mxu0 }
 0x224   : > { %v447_v40 = vadd.f32 %v621_v38, %v446_v39  ;;  %v647_v41 = vpop.f32.mrb[1].mxu0 }
 0x225   : > { %v449_v42 = vpop.f32.mrb[2].mxu0 }
 0x226   : > { %v453_v43 = vmul.f32 0.5, %v447_v40  ;;  %v450_v44 = vadd.f32 %v621_v38, %v449_v42  ;;  %v648_v45 = vpop.f32.mrb[3].mxu0 }
 0x228   : > { %681 = vtanh.f32 %v453_v43  ;;  %v454_v46 = vmul.f32 0.5, %v450_v44 }
 0x22a   : > { %683 = vtanh.f32 %v454_v46 }
 0x232   : > { %v682_v47 = vpop.eup %681 }
 0x233   : > { %v457_v48 = vadd.f32 1.0, %v682_v47 }
 0x234   : > { %v684_v49 = vpop.eup %683 }
 0x235   : > { %v459_v50 = vmul.f32 0.5, %v457_v48  ;;  %v458_v51 = vadd.f32 1.0, %v684_v49 }
 0x237   : > { %v460_v52 = vmul.f32 0.5, %v458_v51  ;;  %v461_v53 = vmul.f32 %v459_v50, %v447_v40 }
 0x239   : > { %v462_v54 = vmul.f32 %v460_v52, %v450_v44 }
 0x23b   : > { %v471_v55 = vpack.c.bf16 %v462_v54, %v461_v53 }
 0x23d   : > { %658 = vmatmul.mubr.msk.bf16.vlgmr.msra.gmra.mrb[0].mxu1 %vm503_vm2, %v471_v55 }
 0x310   : > { %v541_v57 = vpop.f32.mrb[0].mxu1 }
 0x311   : > { %v542_v58 = vadd.f32 %v625_v56, %v541_v57  ;;  %v659_v59 = vpop.f32.mrb[1].mxu1 }
 0x312   : > { %v544_v60 = vpop.f32.mrb[2].mxu1 }
 0x313   : > { %v548_v61 = vmul.f32 0.5, %v542_v58  ;;  %v545_v62 = vadd.f32 %v625_v56, %v544_v60  ;;  %v660_v63 = vpop.f32.mrb[3].mxu1 }
 0x315   : > { %v550_v2 = vadd.f32 %v548_v61, %v761_v0  ;;  %v549_v3 = vmul.f32 0.5, %v545_v62 }
 0x317   : > { %552 = vst.msk [vmem:[%s334_s16] sm:$0xff] %vm341_vm0, %v550_v2  ;;  %v551_v4 = vadd.f32 %v549_v3, %v763_v1 }
 0x319   : > { %553 = vst.msk [vmem:[%s334_s16 + $0x8] sm:$0xff] %vm341_vm0, %v551_v4 }
 0x31a PF: > { %s19_s30 = sadd.s32 1, %s691_s30  }
 0x31b   : > { %p16_p4 = scmp.ge.s32.totalorder %s19_s30, 4  }
 0x31d   :  { %18 = sbr.rel (!%p16_p4) target bundleno = 1 (0x1), region = 86 }

</bundles_post_ra>
